<compile_context>
chip_gen: v7x
topology: tpu7x:2x2x1
jax: 0.10.0
libtpu: 0.0.40
codegen_flags: <defaults>
</compile_context>

<pallas_src>
import math

import jax
import jax.numpy as jnp
from jax.experimental import pallas as pl
from jax.experimental.pallas import tpu as pltpu


# ---------------------------------------------------------------------------
# Fused whole-model kernel builder
# ---------------------------------------------------------------------------
def _build_fused_kernel(T, Bp, H, O, num_layers):
    """Kernel ref order:
       x, (wih, whh_f, whh_b, bias) * L, fc_w_f, fc_w_b, fc_b, out, xg_scr, seq_scr
         x       : (T*Bp, I0)  time-major input, row t*Bp + b == x[b, t] (batch padded to Bp)
         wih     : (I_l, 8H)   [Wih_fwd^T | Wih_bwd^T], gate order (i, f, g, o); g cols x2
         whh_f/b : (H, 4H)     dense per-direction Whh^T; g cols x2
         bias    : (1, 8H)     [b_ih_f + b_hh_f | b_ih_b + b_hh_b]; g cols x2
         fc_w_f  : (H, O), fc_w_b : (H, O), fc_b : (1, O)
         out     : (Bp, O)
         xg_scr  : (T*Bp, 8H) VMEM  -- hoisted input projection (both directions)
         seq_scr : (T*Bp, 2H) VMEM  -- per-layer sequence output [h_fwd | h_bwd]
                   (only written by layers 0..L-2 and read by the following layer; every row
                    block is covered each layer, so no stale-VMEM reads)
    """
    L = num_layers
    H4 = 4 * H

    def kernel(*refs):
        x_ref = refs[0]
        layer_refs = refs[1:1 + 4 * L]
        fc_wf_ref = refs[1 + 4 * L]
        fc_wb_ref = refs[2 + 4 * L]
        fc_b_ref = refs[3 + 4 * L]
        out_ref = refs[4 + 4 * L]
        xg_scr = refs[5 + 4 * L]
        seq_scr = refs[6 + 4 * L]

        last_f = None
        last_b = None

        for layer in range(L):
            wih_ref = layer_refs[4 * layer + 0]
            whh_f_ref = layer_refs[4 * layer + 1]
            whh_b_ref = layer_refs[4 * layer + 2]
            b_ref = layer_refs[4 * layer + 3]

            # Layer input: raw x for layer 0, previous layer's [h_fwd|h_bwd] sequence otherwise.
            inp = x_ref[...] if layer == 0 else seq_scr[...]            # (T*Bp, I_l)

            # Hoisted input projection: all timesteps, both directions, one MXU matmul.
            xg_scr[...] = (
                jnp.dot(inp, wih_ref[...], preferred_element_type=jnp.float32)
                + b_ref[...]
            )                                                            # (T*Bp, 8H)

            # Per-direction dense recurrent weights, held in vregs across the time loop.
            whh_f = whh_f_ref[...]                                       # (H, 4H)
            whh_b = whh_b_ref[...]                                       # (H, 4H)

            h_f = jnp.zeros((Bp, H), jnp.float32)
            c_f = jnp.zeros((Bp, H), jnp.float32)
            h_b = jnp.zeros((Bp, H), jnp.float32)
            c_b = jnp.zeros((Bp, H), jnp.float32)

            # Fully unrolled recurrence (T small & static -> constant slice offsets).
            for s in range(T):
                # Lane-tile-aligned, sublane-dense (Bp, 4H) loads; no select needed.
                gx_f = xg_scr[pl.ds(s * Bp, Bp), pl.ds(0, H4)]           # proj of x[s]
                gx_b = xg_scr[pl.ds((T - 1 - s) * Bp, Bp), pl.ds(H4, H4)]  # proj of x[T-1-s]

                # TODO(synk): replace with MXU-resident RHS (matmul_push_rhs once per layer).
                gates_f = gx_f + jnp.dot(h_f, whh_f, preferred_element_type=jnp.float32)
                gates_b = gx_b + jnp.dot(h_b, whh_b, preferred_element_type=jnp.float32)

                # Single transcendental per direction: g columns were pre-scaled by 2 on the
                # host, so tanh(g) == 2*sigmoid(2g) - 1 == 2*s_g - 1.
                s_f = jax.nn.sigmoid(gates_f)
                s_b = jax.nn.sigmoid(gates_b)

                i_f = s_f[:, 0 * H:1 * H]
                f_f = s_f[:, 1 * H:2 * H]
                g_f = 2.0 * s_f[:, 2 * H:3 * H] - 1.0
                o_f = s_f[:, 3 * H:4 * H]
                i_b = s_b[:, 0 * H:1 * H]
                f_b = s_b[:, 1 * H:2 * H]
                g_b = 2.0 * s_b[:, 2 * H:3 * H] - 1.0
                o_b = s_b[:, 3 * H:4 * H]

                c_f = f_f * c_f + i_f * g_f
                h_f = o_f * jnp.tanh(c_f)
                c_b = f_b * c_b + i_b * g_b
                h_b = o_b * jnp.tanh(c_b)

                if layer < L - 1:
                    # PyTorch layout: output[t] = [h_fwd_t | h_bwd_t]; bwd step s is time T-1-s.
                    seq_scr[pl.ds(s * Bp, Bp), pl.ds(0, H)] = h_f
                    seq_scr[pl.ds((T - 1 - s) * Bp, Bp), pl.ds(H, H)] = h_b
                else:
                    # Last layer: only the last timestep is needed; keep it in registers.
                    if s == 0:
                        last_b = h_b          # h_bwd for time T-1 is produced at step 0
                    if s == T - 1:
                        last_f = h_f          # h_fwd for time T-1

        # Final FC on the last timestep: [h_f | h_b] @ W_fc^T + b  (weight split per direction
        # on the host so no in-kernel concatenate is required).
        out_ref[...] = (
            jnp.dot(last_f, fc_wf_ref[...], preferred_element_type=jnp.float32)
            + jnp.dot(last_b, fc_wb_ref[...], preferred_element_type=jnp.float32)
            + fc_b_ref[...]
        )

    return kernel


# ---------------------------------------------------------------------------
# Forward pass wrapper (single pallas_call for the entire model)
# ---------------------------------------------------------------------------
@jax.jit
def lstm_model_forward(params, x_bti):
    """x_bti: (B, T, I) batch-first input (as in the PyTorch module). Returns (B, output_cnt)."""
    B, T, I = x_bti.shape
    layers = params["layers"]
    L = len(layers)
    H = layers[0]["whh_f"].shape[0]
    O = params["fc_b"].shape[1]

    # Pad the batch to a full sublane group: B<=8 costs the same vregs / MXU rows as B,
    # and it makes every per-step load/store sublane-dense. Padded rows are discarded.
    Bp = ((B + 7) // 8) * 8

    # Time-major, batch-padded, flattened over (t, b): row t*Bp + b == x[b, t].
    x_tbi = jnp.transpose(x_bti, (1, 0, 2)).astype(jnp.float32)          # (T, B, I)
    x_tbi = jnp.pad(x_tbi, ((0, 0), (0, Bp - B), (0, 0)))                # (T, Bp, I)
    x2d = x_tbi.reshape(T * Bp, I)

    operands = [x2d]
    in_specs = [pl.BlockSpec(x2d.shape, lambda i: (0, 0))]
    for lyr in layers:
        for name in ("wih", "whh_f", "whh_b", "bias"):
            arr = lyr[name]
            operands.append(arr)
            in_specs.append(pl.BlockSpec(arr.shape, lambda i: (0, 0)))
    operands += [params["fc_w_f"], params["fc_w_b"], params["fc_b"]]
    in_specs += [
        pl.BlockSpec(params["fc_w_f"].shape, lambda i: (0, 0)),
        pl.BlockSpec(params["fc_w_b"].shape, lambda i: (0, 0)),
        pl.BlockSpec(params["fc_b"].shape, lambda i: (0, 0)),
    ]

    kernel = _build_fused_kernel(T, Bp, H, O, L)

    y_pad = pl.pallas_call(
        kernel,
        out_shape=jax.ShapeDtypeStruct((Bp, O), jnp.float32),
        grid_spec=pltpu.PrefetchScalarGridSpec(
            num_scalar_prefetch=0,
            grid=(1,),
            in_specs=in_specs,
            out_specs=pl.BlockSpec((Bp, O), lambda i: (0, 0)),
            scratch_shapes=[
                pltpu.VMEM((T * Bp, 8 * H), jnp.float32),   # hoisted input projection
                pltpu.VMEM((T * Bp, 2 * H), jnp.float32),   # per-layer sequence output
            ],
        ),
        compiler_params=pltpu.CompilerParams(
            dimension_semantics=("arbitrary",),
        ),
    )(*operands)
    return y_pad[:B]


# ---------------------------------------------------------------------------
# Parameter construction (PyTorch-style U(-1/sqrt(H), 1/sqrt(H))), bidirectional.
# Returns (packed params for the fused kernel, raw params for the pure-JAX reference).
# Packing: per direction, the g-gate columns of Wih^T / Whh^T / bias are scaled by 2 so the
# kernel can use tanh(x) = 2*sigmoid(2x) - 1 with a single sigmoid over the gate tile.
# ---------------------------------------------------------------------------
def init_params(key, input_size, hidden_size, num_layers, output_cnt):
    H = hidden_size
    k = 1.0 / math.sqrt(H)
    col_scale = jnp.ones((4 * H,), jnp.float32).at[2 * H:3 * H].set(2.0)   # x2 on g columns

    packed_layers, raw_layers = [], []
    for layer in range(num_layers):
        in_sz = input_size if layer == 0 else 2 * H
        dirs_raw, dirs_pk = [], []
        for _ in range(2):  # forward, backward
            key, k1, k2, k3, k4 = jax.random.split(key, 5)
            wih = jax.random.uniform(k1, (4 * H, in_sz), jnp.float32, -k, k)
            whh = jax.random.uniform(k2, (4 * H, H), jnp.float32, -k, k)
            bih = jax.random.uniform(k3, (4 * H,), jnp.float32, -k, k)
            bhh = jax.random.uniform(k4, (4 * H,), jnp.float32, -k, k)
            dirs_raw.append(dict(wih_t=wih.T, whh_t=whh.T, bias=(bih + bhh)[None, :]))
            dirs_pk.append(dict(
                wih_t=wih.T * col_scale[None, :],
                whh_t=whh.T * col_scale[None, :],
                bias=((bih + bhh) * col_scale)[None, :],
            ))
        raw_layers.append(dirs_raw)
        packed_layers.append(dict(
            wih=jnp.concatenate([dirs_pk[0]["wih_t"], dirs_pk[1]["wih_t"]], axis=1),  # (in, 8H)
            whh_f=dirs_pk[0]["whh_t"],                                                # (H, 4H)
            whh_b=dirs_pk[1]["whh_t"],                                                # (H, 4H)
            bias=jnp.concatenate([dirs_pk[0]["bias"], dirs_pk[1]["bias"]], axis=1),   # (1, 8H)
        ))

    key, k1, k2 = jax.random.split(key, 3)
    fc_in = 2 * H
    kf = 1.0 / math.sqrt(fc_in)
    fc_w = jax.random.uniform(k1, (output_cnt, fc_in), jnp.float32, -kf, kf)
    fc_b = jax.random.uniform(k2, (output_cnt,), jnp.float32, -kf, kf)

    packed = dict(layers=packed_layers,
                  fc_w_f=fc_w.T[:H, :], fc_w_b=fc_w.T[H:, :], fc_b=fc_b[None, :])
    raw = dict(layers=raw_layers, fc_w_t=fc_w.T, fc_b=fc_b[None, :])
    return packed, raw


# ---------------------------------------------------------------------------
# Pure-JAX reference (independent of the packed weight layout; correctness check only)
# ---------------------------------------------------------------------------
def _ref_forward(raw_params, x_bti):
    x = jnp.transpose(x_bti, (1, 0, 2)).astype(jnp.float32)   # (T, B, I)

    def run_dir(x_tbi, p):
        H = p["whh_t"].shape[0]

        def step(carry, x_t):
            h, c = carry
            g = x_t @ p["wih_t"] + h @ p["whh_t"] + p["bias"]
            i = jax.nn.sigmoid(g[:, 0 * H:1 * H])
            f = jax.nn.sigmoid(g[:, 1 * H:2 * H])
            gg = jnp.tanh(g[:, 2 * H:3 * H])
            o = jax.nn.sigmoid(g[:, 3 * H:4 * H])
            c = f * c + i * gg
            h = o * jnp.tanh(c)
            return (h, c), h

        B = x_tbi.shape[1]
        h0 = jnp.zeros((B, H), jnp.float32)
        _, hs = jax.lax.scan(step, (h0, h0), x_tbi)
        return hs

    for dirs in raw_params["layers"]:
        outs = [run_dir(x, dirs[0])]
        outs.append(run_dir(x[::-1], dirs[1])[::-1])
        x = jnp.concatenate(outs, axis=-1)
    return x[-1] @ raw_params["fc_w_t"] + raw_params["fc_b"]


if __name__ == "__main__":
    # Small shapes consistent with the module: batch=2, seq=8, input_size=16,
    # hidden_size=32, num_layers=2, output_cnt=8, bidirectional=True.
    B, T, I, H, L, O = 2, 8, 16, 32, 2, 8

    key = jax.random.PRNGKey(0)
    key, pkey, xkey = jax.random.split(key, 3)
    params, raw_params = init_params(pkey, I, H, L, O)
    x = jax.random.normal(xkey, (B, T, I), dtype=jnp.float32)

    y = jax.block_until_ready(lstm_model_forward(params, x))
    y_ref = jax.block_until_ready(_ref_forward(raw_params, x))

    assert y.shape == (B, O)
    err = float(jnp.max(jnp.abs(y - y_ref)))
    assert jnp.allclose(y, y_ref, atol=1e-4, rtol=1e-4), f"Pallas mismatch, max abs err {err}"

    print("KERNEL_OK")
</pallas_src>

<mosaic_0001>
module attributes {stable_mosaic.version = 11 : i64} {
  func.func @kernel(%arg0: i32, %arg1: memref<64x16xf32, #tpu.memory_space<vmem>>, %arg2: memref<16x256xf32, #tpu.memory_space<vmem>>, %arg3: memref<32x128xf32, #tpu.memory_space<vmem>>, %arg4: memref<32x128xf32, #tpu.memory_space<vmem>>, %arg5: memref<1x256xf32, #tpu.memory_space<vmem>>, %arg6: memref<64x256xf32, #tpu.memory_space<vmem>>, %arg7: memref<32x128xf32, #tpu.memory_space<vmem>>, %arg8: memref<32x128xf32, #tpu.memory_space<vmem>>, %arg9: memref<1x256xf32, #tpu.memory_space<vmem>>, %arg10: memref<32x8xf32, #tpu.memory_space<vmem>>, %arg11: memref<32x8xf32, #tpu.memory_space<vmem>>, %arg12: memref<1x8xf32, #tpu.memory_space<vmem>>, %arg13: memref<8x8xf32, #tpu.memory_space<vmem>>, %arg14: memref<64x256xf32, #tpu.memory_space<vmem>>, %arg15: memref<64x64xf32, #tpu.memory_space<vmem>>) attributes {dimension_semantics = [#tpu.dimension_semantics<arbitrary>], iteration_bounds = array<i64: 1>, scalar_prefetch = 0 : i64, scratch_operands = 2 : i64, tpu.core_type = #tpu.core_type<tc>, window_params = [{pipeline_mode = #tpu.pipeline_mode<synchronous>, transform_indices = @transform_0, window_bounds = array<i64: 64, 16>}, {pipeline_mode = #tpu.pipeline_mode<synchronous>, transform_indices = @transform_1, window_bounds = array<i64: 16, 256>}, {pipeline_mode = #tpu.pipeline_mode<synchronous>, transform_indices = @transform_2, window_bounds = array<i64: 32, 128>}, {pipeline_mode = #tpu.pipeline_mode<synchronous>, transform_indices = @transform_3, window_bounds = array<i64: 32, 128>}, {pipeline_mode = #tpu.pipeline_mode<synchronous>, transform_indices = @transform_4, window_bounds = array<i64: 1, 256>}, {pipeline_mode = #tpu.pipeline_mode<synchronous>, transform_indices = @transform_5, window_bounds = array<i64: 64, 256>}, {pipeline_mode = #tpu.pipeline_mode<synchronous>, transform_indices = @transform_6, window_bounds = array<i64: 32, 128>}, {pipeline_mode = #tpu.pipeline_mode<synchronous>, transform_indices = @transform_7, window_bounds = array<i64: 32, 128>}, {pipeline_mode = #tpu.pipeline_mode<synchronous>, transform_indices = @transform_8, window_bounds = array<i64: 1, 256>}, {pipeline_mode = #tpu.pipeline_mode<synchronous>, transform_indices = @transform_9, window_bounds = array<i64: 32, 8>}, {pipeline_mode = #tpu.pipeline_mode<synchronous>, transform_indices = @transform_10, window_bounds = array<i64: 32, 8>}, {pipeline_mode = #tpu.pipeline_mode<synchronous>, transform_indices = @transform_11, window_bounds = array<i64: 1, 8>}, {pipeline_mode = #tpu.pipeline_mode<synchronous>, transform_indices = @transform_12, window_bounds = array<i64: 8, 8>}]} {
    %c0 = arith.constant 0 : index
    %c0_0 = arith.constant 0 : index
    %0 = vector.load %arg1[%c0, %c0_0] : memref<64x16xf32, #tpu.memory_space<vmem>>, vector<64x16xf32>
    %c0_1 = arith.constant 0 : index
    %c0_2 = arith.constant 0 : index
    %1 = vector.load %arg2[%c0_1, %c0_2] : memref<16x256xf32, #tpu.memory_space<vmem>>, vector<16x256xf32>
    %cst = arith.constant dense<0.000000e+00> : vector<64x256xf32>
    %2 = tpu.matmul %0, %1, %cst {dimension_numbers = #tpu.dot_dimension_numbers<[1], [0], [0], [1], [0, 0, 1, 1], [], []>} : vector<64x16xf32>, vector<16x256xf32>, vector<64x256xf32> -> vector<64x256xf32>
    %c0_3 = arith.constant 0 : index
    %c0_4 = arith.constant 0 : index
    %3 = vector.load %arg5[%c0_3, %c0_4] : memref<1x256xf32, #tpu.memory_space<vmem>>, vector<1x256xf32>
    %4 = vector.broadcast %3 : vector<1x256xf32> to vector<64x256xf32>
    %5 = arith.addf %2, %4 : vector<64x256xf32>
    %c0_5 = arith.constant 0 : index
    %c0_6 = arith.constant 0 : index
    %6 = vector.load %arg14[%c0_5, %c0_6] : memref<64x256xf32, #tpu.memory_space<vmem>>, vector<64x256xf32>
    tpu.vector_store %arg14[%c0_5, %c0_6], %5 {strides = array<i32>} : memref<64x256xf32, #tpu.memory_space<vmem>>, vector<64x256xf32>,
    %c0_7 = arith.constant 0 : index
    %c0_8 = arith.constant 0 : index
    %7 = vector.load %arg3[%c0_7, %c0_8] : memref<32x128xf32, #tpu.memory_space<vmem>>, vector<32x128xf32>
    %c0_9 = arith.constant 0 : index
    %c0_10 = arith.constant 0 : index
    %8 = vector.load %arg4[%c0_9, %c0_10] : memref<32x128xf32, #tpu.memory_space<vmem>>, vector<32x128xf32>
    %cst_11 = arith.constant 0.000000e+00 : f32
    %9 = vector.broadcast %cst_11 : f32 to vector<8x32xf32>
    %cst_12 = arith.constant 0.000000e+00 : f32
    %10 = vector.broadcast %cst_12 : f32 to vector<8x32xf32>
    %cst_13 = arith.constant 0.000000e+00 : f32
    %11 = vector.broadcast %cst_13 : f32 to vector<8x32xf32>
    %cst_14 = arith.constant 0.000000e+00 : f32
    %12 = vector.broadcast %cst_14 : f32 to vector<8x32xf32>
    %c0_15 = arith.constant 0 : index
    %c0_16 = arith.constant 0 : index
    %13 = vector.load %arg14[%c0_15, %c0_16] : memref<64x256xf32, #tpu.memory_space<vmem>>, vector<8x128xf32>
    %c56 = arith.constant 56 : index
    %c128 = arith.constant 128 : index
    %14 = vector.load %arg14[%c56, %c128] : memref<64x256xf32, #tpu.memory_space<vmem>>, vector<8x128xf32>
    %cst_17 = arith.constant dense<0.000000e+00> : vector<8x128xf32>
    %15 = tpu.matmul %9, %7, %cst_17 {dimension_numbers = #tpu.dot_dimension_numbers<[1], [0], [0], [1], [0, 0, 1, 1], [], []>} : vector<8x32xf32>, vector<32x128xf32>, vector<8x128xf32> -> vector<8x128xf32>
    %16 = arith.addf %13, %15 : vector<8x128xf32>
    %cst_18 = arith.constant dense<0.000000e+00> : vector<8x128xf32>
    %17 = tpu.matmul %11, %8, %cst_18 {dimension_numbers = #tpu.dot_dimension_numbers<[1], [0], [0], [1], [0, 0, 1, 1], [], []>} : vector<8x32xf32>, vector<32x128xf32>, vector<8x128xf32> -> vector<8x128xf32>
    %18 = arith.addf %14, %17 : vector<8x128xf32>
    %19 = arith.negf %16 : vector<8x128xf32>
    %20 = math.exp %19 : vector<8x128xf32>
    %cst_19 = arith.constant 1.000000e+00 : f32
    %21 = vector.broadcast %cst_19 : f32 to vector<8x128xf32>
    %22 = arith.addf %21, %20 : vector<8x128xf32>
    %23 = arith.divf %21, %22 : vector<8x128xf32>
    %24 = arith.negf %18 : vector<8x128xf32>
    %25 = math.exp %24 : vector<8x128xf32>
    %cst_20 = arith.constant 1.000000e+00 : f32
    %26 = vector.broadcast %cst_20 : f32 to vector<8x128xf32>
    %27 = arith.addf %26, %25 : vector<8x128xf32>
    %28 = arith.divf %26, %27 : vector<8x128xf32>
    %29 = vector.extract_strided_slice %23 {offsets = [0, 0], sizes = [8, 32], strides = [1, 1]} : vector<8x128xf32> to vector<8x32xf32>
    %30 = vector.extract_strided_slice %23 {offsets = [0, 32], sizes = [8, 32], strides = [1, 1]} : vector<8x128xf32> to vector<8x32xf32>
    %31 = vector.extract_strided_slice %23 {offsets = [0, 64], sizes = [8, 32], strides = [1, 1]} : vector<8x128xf32> to vector<8x32xf32>
    %cst_21 = arith.constant 2.000000e+00 : f32
    %32 = vector.broadcast %cst_21 : f32 to vector<8x32xf32>
    %33 = arith.mulf %32, %31 : vector<8x32xf32>
    %cst_22 = arith.constant 1.000000e+00 : f32
    %34 = vector.broadcast %cst_22 : f32 to vector<8x32xf32>
    %35 = arith.subf %33, %34 : vector<8x32xf32>
    %36 = vector.extract_strided_slice %23 {offsets = [0, 96], sizes = [8, 32], strides = [1, 1]} : vector<8x128xf32> to vector<8x32xf32>
    %37 = vector.extract_strided_slice %28 {offsets = [0, 0], sizes = [8, 32], strides = [1, 1]} : vector<8x128xf32> to vector<8x32xf32>
    %38 = vector.extract_strided_slice %28 {offsets = [0, 32], sizes = [8, 32], strides = [1, 1]} : vector<8x128xf32> to vector<8x32xf32>
    %39 = vector.extract_strided_slice %28 {offsets = [0, 64], sizes = [8, 32], strides = [1, 1]} : vector<8x128xf32> to vector<8x32xf32>
    %cst_23 = arith.constant 2.000000e+00 : f32
    %40 = vector.broadcast %cst_23 : f32 to vector<8x32xf32>
    %41 = arith.mulf %40, %39 : vector<8x32xf32>
    %cst_24 = arith.constant 1.000000e+00 : f32
    %42 = vector.broadcast %cst_24 : f32 to vector<8x32xf32>
    %43 = arith.subf %41, %42 : vector<8x32xf32>
    %44 = vector.extract_strided_slice %28 {offsets = [0, 96], sizes = [8, 32], strides = [1, 1]} : vector<8x128xf32> to vector<8x32xf32>
    %45 = arith.mulf %30, %10 : vector<8x32xf32>
    %46 = arith.mulf %29, %35 : vector<8x32xf32>
    %47 = arith.addf %45, %46 : vector<8x32xf32>
    %48 = math.tanh %47 : vector<8x32xf32>
    %49 = arith.mulf %36, %48 : vector<8x32xf32>
    %50 = arith.mulf %38, %12 : vector<8x32xf32>
    %51 = arith.mulf %37, %43 : vector<8x32xf32>
    %52 = arith.addf %50, %51 : vector<8x32xf32>
    %53 = math.tanh %52 : vector<8x32xf32>
    %54 = arith.mulf %44, %53 : vector<8x32xf32>
    %c0_25 = arith.constant 0 : index
    %c0_26 = arith.constant 0 : index
    %55 = vector.load %arg15[%c0_25, %c0_26] : memref<64x64xf32, #tpu.memory_space<vmem>>, vector<8x32xf32>
    tpu.vector_store %arg15[%c0_25, %c0_26], %49 {strides = array<i32>} : memref<64x64xf32, #tpu.memory_space<vmem>>, vector<8x32xf32>,
    %c56_27 = arith.constant 56 : index
    %c32 = arith.constant 32 : index
    %56 = vector.load %arg15[%c56_27, %c32] : memref<64x64xf32, #tpu.memory_space<vmem>>, vector<8x32xf32>
    tpu.vector_store %arg15[%c56_27, %c32], %54 {strides = array<i32>} : memref<64x64xf32, #tpu.memory_space<vmem>>, vector<8x32xf32>,
    %c8 = arith.constant 8 : index
    %c0_28 = arith.constant 0 : index
    %57 = vector.load %arg14[%c8, %c0_28] : memref<64x256xf32, #tpu.memory_space<vmem>>, vector<8x128xf32>
    %c48 = arith.constant 48 : index
    %c128_29 = arith.constant 128 : index
    %58 = vector.load %arg14[%c48, %c128_29] : memref<64x256xf32, #tpu.memory_space<vmem>>, vector<8x128xf32>
    %cst_30 = arith.constant dense<0.000000e+00> : vector<8x128xf32>
    %59 = tpu.matmul %49, %7, %cst_30 {dimension_numbers = #tpu.dot_dimension_numbers<[1], [0], [0], [1], [0, 0, 1, 1], [], []>} : vector<8x32xf32>, vector<32x128xf32>, vector<8x128xf32> -> vector<8x128xf32>
    %60 = arith.addf %57, %59 : vector<8x128xf32>
    %cst_31 = arith.constant dense<0.000000e+00> : vector<8x128xf32>
    %61 = tpu.matmul %54, %8, %cst_31 {dimension_numbers = #tpu.dot_dimension_numbers<[1], [0], [0], [1], [0, 0, 1, 1], [], []>} : vector<8x32xf32>, vector<32x128xf32>, vector<8x128xf32> -> vector<8x128xf32>
    %62 = arith.addf %58, %61 : vector<8x128xf32>
    %63 = arith.negf %60 : vector<8x128xf32>
    %64 = math.exp %63 : vector<8x128xf32>
    %cst_32 = arith.constant 1.000000e+00 : f32
    %65 = vector.broadcast %cst_32 : f32 to vector<8x128xf32>
    %66 = arith.addf %65, %64 : vector<8x128xf32>
    %67 = arith.divf %65, %66 : vector<8x128xf32>
    %68 = arith.negf %62 : vector<8x128xf32>
    %69 = math.exp %68 : vector<8x128xf32>
    %cst_33 = arith.constant 1.000000e+00 : f32
    %70 = vector.broadcast %cst_33 : f32 to vector<8x128xf32>
    %71 = arith.addf %70, %69 : vector<8x128xf32>
    %72 = arith.divf %70, %71 : vector<8x128xf32>
    %73 = vector.extract_strided_slice %67 {offsets = [0, 0], sizes = [8, 32], strides = [1, 1]} : vector<8x128xf32> to vector<8x32xf32>
    %74 = vector.extract_strided_slice %67 {offsets = [0, 32], sizes = [8, 32], strides = [1, 1]} : vector<8x128xf32> to vector<8x32xf32>
    %75 = vector.extract_strided_slice %67 {offsets = [0, 64], sizes = [8, 32], strides = [1, 1]} : vector<8x128xf32> to vector<8x32xf32>
    %cst_34 = arith.constant 2.000000e+00 : f32
    %76 = vector.broadcast %cst_34 : f32 to vector<8x32xf32>
    %77 = arith.mulf %76, %75 : vector<8x32xf32>
    %cst_35 = arith.constant 1.000000e+00 : f32
    %78 = vector.broadcast %cst_35 : f32 to vector<8x32xf32>
    %79 = arith.subf %77, %78 : vector<8x32xf32>
    %80 = vector.extract_strided_slice %67 {offsets = [0, 96], sizes = [8, 32], strides = [1, 1]} : vector<8x128xf32> to vector<8x32xf32>
    %81 = vector.extract_strided_slice %72 {offsets = [0, 0], sizes = [8, 32], strides = [1, 1]} : vector<8x128xf32> to vector<8x32xf32>
    %82 = vector.extract_strided_slice %72 {offsets = [0, 32], sizes = [8, 32], strides = [1, 1]} : vector<8x128xf32> to vector<8x32xf32>
    %83 = vector.extract_strided_slice %72 {offsets = [0, 64], sizes = [8, 32], strides = [1, 1]} : vector<8x128xf32> to vector<8x32xf32>
    %cst_36 = arith.constant 2.000000e+00 : f32
    %84 = vector.broadcast %cst_36 : f32 to vector<8x32xf32>
    %85 = arith.mulf %84, %83 : vector<8x32xf32>
    %cst_37 = arith.constant 1.000000e+00 : f32
    %86 = vector.broadcast %cst_37 : f32 to vector<8x32xf32>
    %87 = arith.subf %85, %86 : vector<8x32xf32>
    %88 = vector.extract_strided_slice %72 {offsets = [0, 96], sizes = [8, 32], strides = [1, 1]} : vector<8x128xf32> to vector<8x32xf32>
    %89 = arith.mulf %74, %47 : vector<8x32xf32>
    %90 = arith.mulf %73, %79 : vector<8x32xf32>
    %91 = arith.addf %89, %90 : vector<8x32xf32>
    %92 = math.tanh %91 : vector<8x32xf32>
    %93 = arith.mulf %80, %92 : vector<8x32xf32>
    %94 = arith.mulf %82, %52 : vector<8x32xf32>
    %95 = arith.mulf %81, %87 : vector<8x32xf32>
    %96 = arith.addf %94, %95 : vector<8x32xf32>
    %97 = math.tanh %96 : vector<8x32xf32>
    %98 = arith.mulf %88, %97 : vector<8x32xf32>
    %c8_38 = arith.constant 8 : index
    %c0_39 = arith.constant 0 : index
    %99 = vector.load %arg15[%c8_38, %c0_39] : memref<64x64xf32, #tpu.memory_space<vmem>>, vector<8x32xf32>
    tpu.vector_store %arg15[%c8_38, %c0_39], %93 {strides = array<i32>} : memref<64x64xf32, #tpu.memory_space<vmem>>, vector<8x32xf32>,
    %c48_40 = arith.constant 48 : index
    %c32_41 = arith.constant 32 : index
    %100 = vector.load %arg15[%c48_40, %c32_41] : memref<64x64xf32, #tpu.memory_space<vmem>>, vector<8x32xf32>
    tpu.vector_store %arg15[%c48_40, %c32_41], %98 {strides = array<i32>} : memref<64x64xf32, #tpu.memory_space<vmem>>, vector<8x32xf32>,
    %c16 = arith.constant 16 : index
    %c0_42 = arith.constant 0 : index
    %101 = vector.load %arg14[%c16, %c0_42] : memref<64x256xf32, #tpu.memory_space<vmem>>, vector<8x128xf32>
    %c40 = arith.constant 40 : index
    %c128_43 = arith.constant 128 : index
    %102 = vector.load %arg14[%c40, %c128_43] : memref<64x256xf32, #tpu.memory_space<vmem>>, vector<8x128xf32>
    %cst_44 = arith.constant dense<0.000000e+00> : vector<8x128xf32>
    %103 = tpu.matmul %93, %7, %cst_44 {dimension_numbers = #tpu.dot_dimension_numbers<[1], [0], [0], [1], [0, 0, 1, 1], [], []>} : vector<8x32xf32>, vector<32x128xf32>, vector<8x128xf32> -> vector<8x128xf32>
    %104 = arith.addf %101, %103 : vector<8x128xf32>
    %cst_45 = arith.constant dense<0.000000e+00> : vector<8x128xf32>
    %105 = tpu.matmul %98, %8, %cst_45 {dimension_numbers = #tpu.dot_dimension_numbers<[1], [0], [0], [1], [0, 0, 1, 1], [], []>} : vector<8x32xf32>, vector<32x128xf32>, vector<8x128xf32> -> vector<8x128xf32>
    %106 = arith.addf %102, %105 : vector<8x128xf32>
    %107 = arith.negf %104 : vector<8x128xf32>
    %108 = math.exp %107 : vector<8x128xf32>
    %cst_46 = arith.constant 1.000000e+00 : f32
    %109 = vector.broadcast %cst_46 : f32 to vector<8x128xf32>
    %110 = arith.addf %109, %108 : vector<8x128xf32>
    %111 = arith.divf %109, %110 : vector<8x128xf32>
    %112 = arith.negf %106 : vector<8x128xf32>
    %113 = math.exp %112 : vector<8x128xf32>
    %cst_47 = arith.constant 1.000000e+00 : f32
    %114 = vector.broadcast %cst_47 : f32 to vector<8x128xf32>
    %115 = arith.addf %114, %113 : vector<8x128xf32>
    %116 = arith.divf %114, %115 : vector<8x128xf32>
    %117 = vector.extract_strided_slice %111 {offsets = [0, 0], sizes = [8, 32], strides = [1, 1]} : vector<8x128xf32> to vector<8x32xf32>
    %118 = vector.extract_strided_slice %111 {offsets = [0, 32], sizes = [8, 32], strides = [1, 1]} : vector<8x128xf32> to vector<8x32xf32>
    %119 = vector.extract_strided_slice %111 {offsets = [0, 64], sizes = [8, 32], strides = [1, 1]} : vector<8x128xf32> to vector<8x32xf32>
    %cst_48 = arith.constant 2.000000e+00 : f32
    %120 = vector.broadcast %cst_48 : f32 to vector<8x32xf32>
    %121 = arith.mulf %120, %119 : vector<8x32xf32>
    %cst_49 = arith.constant 1.000000e+00 : f32
    %122 = vector.broadcast %cst_49 : f32 to vector<8x32xf32>
    %123 = arith.subf %121, %122 : vector<8x32xf32>
    %124 = vector.extract_strided_slice %111 {offsets = [0, 96], sizes = [8, 32], strides = [1, 1]} : vector<8x128xf32> to vector<8x32xf32>
    %125 = vector.extract_strided_slice %116 {offsets = [0, 0], sizes = [8, 32], strides = [1, 1]} : vector<8x128xf32> to vector<8x32xf32>
    %126 = vector.extract_strided_slice %116 {offsets = [0, 32], sizes = [8, 32], strides = [1, 1]} : vector<8x128xf32> to vector<8x32xf32>
    %127 = vector.extract_strided_slice %116 {offsets = [0, 64], sizes = [8, 32], strides = [1, 1]} : vector<8x128xf32> to vector<8x32xf32>
    %cst_50 = arith.constant 2.000000e+00 : f32
    %128 = vector.broadcast %cst_50 : f32 to vector<8x32xf32>
    %129 = arith.mulf %128, %127 : vector<8x32xf32>
    %cst_51 = arith.constant 1.000000e+00 : f32
    %130 = vector.broadcast %cst_51 : f32 to vector<8x32xf32>
    %131 = arith.subf %129, %130 : vector<8x32xf32>
    %132 = vector.extract_strided_slice %116 {offsets = [0, 96], sizes = [8, 32], strides = [1, 1]} : vector<8x128xf32> to vector<8x32xf32>
    %133 = arith.mulf %118, %91 : vector<8x32xf32>
    %134 = arith.mulf %117, %123 : vector<8x32xf32>
    %135 = arith.addf %133, %134 : vector<8x32xf32>
    %136 = math.tanh %135 : vector<8x32xf32>
    %137 = arith.mulf %124, %136 : vector<8x32xf32>
    %138 = arith.mulf %126, %96 : vector<8x32xf32>
    %139 = arith.mulf %125, %131 : vector<8x32xf32>
    %140 = arith.addf %138, %139 : vector<8x32xf32>
    %141 = math.tanh %140 : vector<8x32xf32>
    %142 = arith.mulf %132, %141 : vector<8x32xf32>
    %c16_52 = arith.constant 16 : index
    %c0_53 = arith.constant 0 : index
    %143 = vector.load %arg15[%c16_52, %c0_53] : memref<64x64xf32, #tpu.memory_space<vmem>>, vector<8x32xf32>
    tpu.vector_store %arg15[%c16_52, %c0_53], %137 {strides = array<i32>} : memref<64x64xf32, #tpu.memory_space<vmem>>, vector<8x32xf32>,
    %c40_54 = arith.constant 40 : index
    %c32_55 = arith.constant 32 : index
    %144 = vector.load %arg15[%c40_54, %c32_55] : memref<64x64xf32, #tpu.memory_space<vmem>>, vector<8x32xf32>
    tpu.vector_store %arg15[%c40_54, %c32_55], %142 {strides = array<i32>} : memref<64x64xf32, #tpu.memory_space<vmem>>, vector<8x32xf32>,
    %c24 = arith.constant 24 : index
    %c0_56 = arith.constant 0 : index
    %145 = vector.load %arg14[%c24, %c0_56] : memref<64x256xf32, #tpu.memory_space<vmem>>, vector<8x128xf32>
    %c32_57 = arith.constant 32 : index
    %c128_58 = arith.constant 128 : index
    %146 = vector.load %arg14[%c32_57, %c128_58] : memref<64x256xf32, #tpu.memory_space<vmem>>, vector<8x128xf32>
    %cst_59 = arith.constant dense<0.000000e+00> : vector<8x128xf32>
    %147 = tpu.matmul %137, %7, %cst_59 {dimension_numbers = #tpu.dot_dimension_numbers<[1], [0], [0], [1], [0, 0, 1, 1], [], []>} : vector<8x32xf32>, vector<32x128xf32>, vector<8x128xf32> -> vector<8x128xf32>
    %148 = arith.addf %145, %147 : vector<8x128xf32>
    %cst_60 = arith.constant dense<0.000000e+00> : vector<8x128xf32>
    %149 = tpu.matmul %142, %8, %cst_60 {dimension_numbers = #tpu.dot_dimension_numbers<[1], [0], [0], [1], [0, 0, 1, 1], [], []>} : vector<8x32xf32>, vector<32x128xf32>, vector<8x128xf32> -> vector<8x128xf32>
    %150 = arith.addf %146, %149 : vector<8x128xf32>
    %151 = arith.negf %148 : vector<8x128xf32>
    %152 = math.exp %151 : vector<8x128xf32>
    %cst_61 = arith.constant 1.000000e+00 : f32
    %153 = vector.broadcast %cst_61 : f32 to vector<8x128xf32>
    %154 = arith.addf %153, %152 : vector<8x128xf32>
    %155 = arith.divf %153, %154 : vector<8x128xf32>
    %156 = arith.negf %150 : vector<8x128xf32>
    %157 = math.exp %156 : vector<8x128xf32>
    %cst_62 = arith.constant 1.000000e+00 : f32
    %158 = vector.broadcast %cst_62 : f32 to vector<8x128xf32>
    %159 = arith.addf %158, %157 : vector<8x128xf32>
    %160 = arith.divf %158, %159 : vector<8x128xf32>
    %161 = vector.extract_strided_slice %155 {offsets = [0, 0], sizes = [8, 32], strides = [1, 1]} : vector<8x128xf32> to vector<8x32xf32>
    %162 = vector.extract_strided_slice %155 {offsets = [0, 32], sizes = [8, 32], strides = [1, 1]} : vector<8x128xf32> to vector<8x32xf32>
    %163 = vector.extract_strided_slice %155 {offsets = [0, 64], sizes = [8, 32], strides = [1, 1]} : vector<8x128xf32> to vector<8x32xf32>
    %cst_63 = arith.constant 2.000000e+00 : f32
    %164 = vector.broadcast %cst_63 : f32 to vector<8x32xf32>
    %165 = arith.mulf %164, %163 : vector<8x32xf32>
    %cst_64 = arith.constant 1.000000e+00 : f32
    %166 = vector.broadcast %cst_64 : f32 to vector<8x32xf32>
    %167 = arith.subf %165, %166 : vector<8x32xf32>
    %168 = vector.extract_strided_slice %155 {offsets = [0, 96], sizes = [8, 32], strides = [1, 1]} : vector<8x128xf32> to vector<8x32xf32>
    %169 = vector.extract_strided_slice %160 {offsets = [0, 0], sizes = [8, 32], strides = [1, 1]} : vector<8x128xf32> to vector<8x32xf32>
    %170 = vector.extract_strided_slice %160 {offsets = [0, 32], sizes = [8, 32], strides = [1, 1]} : vector<8x128xf32> to vector<8x32xf32>
    %171 = vector.extract_strided_slice %160 {offsets = [0, 64], sizes = [8, 32], strides = [1, 1]} : vector<8x128xf32> to vector<8x32xf32>
    %cst_65 = arith.constant 2.000000e+00 : f32
    %172 = vector.broadcast %cst_65 : f32 to vector<8x32xf32>
    %173 = arith.mulf %172, %171 : vector<8x32xf32>
    %cst_66 = arith.constant 1.000000e+00 : f32
    %174 = vector.broadcast %cst_66 : f32 to vector<8x32xf32>
    %175 = arith.subf %173, %174 : vector<8x32xf32>
    %176 = vector.extract_strided_slice %160 {offsets = [0, 96], sizes = [8, 32], strides = [1, 1]} : vector<8x128xf32> to vector<8x32xf32>
    %177 = arith.mulf %162, %135 : vector<8x32xf32>
    %178 = arith.mulf %161, %167 : vector<8x32xf32>
    %179 = arith.addf %177, %178 : vector<8x32xf32>
    %180 = math.tanh %179 : vector<8x32xf32>
    %181 = arith.mulf %168, %180 : vector<8x32xf32>
    %182 = arith.mulf %170, %140 : vector<8x32xf32>
    %183 = arith.mulf %169, %175 : vector<8x32xf32>
    %184 = arith.addf %182, %183 : vector<8x32xf32>
    %185 = math.tanh %184 : vector<8x32xf32>
    %186 = arith.mulf %176, %185 : vector<8x32xf32>
    %c24_67 = arith.constant 24 : index
    %c0_68 = arith.constant 0 : index
    %187 = vector.load %arg15[%c24_67, %c0_68] : memref<64x64xf32, #tpu.memory_space<vmem>>, vector<8x32xf32>
    tpu.vector_store %arg15[%c24_67, %c0_68], %181 {strides = array<i32>} : memref<64x64xf32, #tpu.memory_space<vmem>>, vector<8x32xf32>,
    %c32_69 = arith.constant 32 : index
    %c32_70 = arith.constant 32 : index
    %188 = vector.load %arg15[%c32_69, %c32_70] : memref<64x64xf32, #tpu.memory_space<vmem>>, vector<8x32xf32>
    tpu.vector_store %arg15[%c32_69, %c32_70], %186 {strides = array<i32>} : memref<64x64xf32, #tpu.memory_space<vmem>>, vector<8x32xf32>,
    %c32_71 = arith.constant 32 : index
    %c0_72 = arith.constant 0 : index
    %189 = vector.load %arg14[%c32_71, %c0_72] : memref<64x256xf32, #tpu.memory_space<vmem>>, vector<8x128xf32>
    %c24_73 = arith.constant 24 : index
    %c128_74 = arith.constant 128 : index
    %190 = vector.load %arg14[%c24_73, %c128_74] : memref<64x256xf32, #tpu.memory_space<vmem>>, vector<8x128xf32>
    %cst_75 = arith.constant dense<0.000000e+00> : vector<8x128xf32>
    %191 = tpu.matmul %181, %7, %cst_75 {dimension_numbers = #tpu.dot_dimension_numbers<[1], [0], [0], [1], [0, 0, 1, 1], [], []>} : vector<8x32xf32>, vector<32x128xf32>, vector<8x128xf32> -> vector<8x128xf32>
    %192 = arith.addf %189, %191 : vector<8x128xf32>
    %cst_76 = arith.constant dense<0.000000e+00> : vector<8x128xf32>
    %193 = tpu.matmul %186, %8, %cst_76 {dimension_numbers = #tpu.dot_dimension_numbers<[1], [0], [0], [1], [0, 0, 1, 1], [], []>} : vector<8x32xf32>, vector<32x128xf32>, vector<8x128xf32> -> vector<8x128xf32>
    %194 = arith.addf %190, %193 : vector<8x128xf32>
    %195 = arith.negf %192 : vector<8x128xf32>
    %196 = math.exp %195 : vector<8x128xf32>
    %cst_77 = arith.constant 1.000000e+00 : f32
    %197 = vector.broadcast %cst_77 : f32 to vector<8x128xf32>
    %198 = arith.addf %197, %196 : vector<8x128xf32>
    %199 = arith.divf %197, %198 : vector<8x128xf32>
    %200 = arith.negf %194 : vector<8x128xf32>
    %201 = math.exp %200 : vector<8x128xf32>
    %cst_78 = arith.constant 1.000000e+00 : f32
    %202 = vector.broadcast %cst_78 : f32 to vector<8x128xf32>
    %203 = arith.addf %202, %201 : vector<8x128xf32>
    %204 = arith.divf %202, %203 : vector<8x128xf32>
    %205 = vector.extract_strided_slice %199 {offsets = [0, 0], sizes = [8, 32], strides = [1, 1]} : vector<8x128xf32> to vector<8x32xf32>
    %206 = vector.extract_strided_slice %199 {offsets = [0, 32], sizes = [8, 32], strides = [1, 1]} : vector<8x128xf32> to vector<8x32xf32>
    %207 = vector.extract_strided_slice %199 {offsets = [0, 64], sizes = [8, 32], strides = [1, 1]} : vector<8x128xf32> to vector<8x32xf32>
    %cst_79 = arith.constant 2.000000e+00 : f32
    %208 = vector.broadcast %cst_79 : f32 to vector<8x32xf32>
    %209 = arith.mulf %208, %207 : vector<8x32xf32>
    %cst_80 = arith.constant 1.000000e+00 : f32
    %210 = vector.broadcast %cst_80 : f32 to vector<8x32xf32>
    %211 = arith.subf %209, %210 : vector<8x32xf32>
    %212 = vector.extract_strided_slice %199 {offsets = [0, 96], sizes = [8, 32], strides = [1, 1]} : vector<8x128xf32> to vector<8x32xf32>
    %213 = vector.extract_strided_slice %204 {offsets = [0, 0], sizes = [8, 32], strides = [1, 1]} : vector<8x128xf32> to vector<8x32xf32>
    %214 = vector.extract_strided_slice %204 {offsets = [0, 32], sizes = [8, 32], strides = [1, 1]} : vector<8x128xf32> to vector<8x32xf32>
    %215 = vector.extract_strided_slice %204 {offsets = [0, 64], sizes = [8, 32], strides = [1, 1]} : vector<8x128xf32> to vector<8x32xf32>
    %cst_81 = arith.constant 2.000000e+00 : f32
    %216 = vector.broadcast %cst_81 : f32 to vector<8x32xf32>
    %217 = arith.mulf %216, %215 : vector<8x32xf32>
    %cst_82 = arith.constant 1.000000e+00 : f32
    %218 = vector.broadcast %cst_82 : f32 to vector<8x32xf32>
    %219 = arith.subf %217, %218 : vector<8x32xf32>
    %220 = vector.extract_strided_slice %204 {offsets = [0, 96], sizes = [8, 32], strides = [1, 1]} : vector<8x128xf32> to vector<8x32xf32>
    %221 = arith.mulf %206, %179 : vector<8x32xf32>
    %222 = arith.mulf %205, %211 : vector<8x32xf32>
    %223 = arith.addf %221, %222 : vector<8x32xf32>
    %224 = math.tanh %223 : vector<8x32xf32>
    %225 = arith.mulf %212, %224 : vector<8x32xf32>
    %226 = arith.mulf %214, %184 : vector<8x32xf32>
    %227 = arith.mulf %213, %219 : vector<8x32xf32>
    %228 = arith.addf %226, %227 : vector<8x32xf32>
    %229 = math.tanh %228 : vector<8x32xf32>
    %230 = arith.mulf %220, %229 : vector<8x32xf32>
    %c32_83 = arith.constant 32 : index
    %c0_84 = arith.constant 0 : index
    %231 = vector.load %arg15[%c32_83, %c0_84] : memref<64x64xf32, #tpu.memory_space<vmem>>, vector<8x32xf32>
    tpu.vector_store %arg15[%c32_83, %c0_84], %225 {strides = array<i32>} : memref<64x64xf32, #tpu.memory_space<vmem>>, vector<8x32xf32>,
    %c24_85 = arith.constant 24 : index
    %c32_86 = arith.constant 32 : index
    %232 = vector.load %arg15[%c24_85, %c32_86] : memref<64x64xf32, #tpu.memory_space<vmem>>, vector<8x32xf32>
    tpu.vector_store %arg15[%c24_85, %c32_86], %230 {strides = array<i32>} : memref<64x64xf32, #tpu.memory_space<vmem>>, vector<8x32xf32>,
    %c40_87 = arith.constant 40 : index
    %c0_88 = arith.constant 0 : index
    %233 = vector.load %arg14[%c40_87, %c0_88] : memref<64x256xf32, #tpu.memory_space<vmem>>, vector<8x128xf32>
    %c16_89 = arith.constant 16 : index
    %c128_90 = arith.constant 128 : index
    %234 = vector.load %arg14[%c16_89, %c128_90] : memref<64x256xf32, #tpu.memory_space<vmem>>, vector<8x128xf32>
    %cst_91 = arith.constant dense<0.000000e+00> : vector<8x128xf32>
    %235 = tpu.matmul %225, %7, %cst_91 {dimension_numbers = #tpu.dot_dimension_numbers<[1], [0], [0], [1], [0, 0, 1, 1], [], []>} : vector<8x32xf32>, vector<32x128xf32>, vector<8x128xf32> -> vector<8x128xf32>
    %236 = arith.addf %233, %235 : vector<8x128xf32>
    %cst_92 = arith.constant dense<0.000000e+00> : vector<8x128xf32>
    %237 = tpu.matmul %230, %8, %cst_92 {dimension_numbers = #tpu.dot_dimension_numbers<[1], [0], [0], [1], [0, 0, 1, 1], [], []>} : vector<8x32xf32>, vector<32x128xf32>, vector<8x128xf32> -> vector<8x128xf32>
    %238 = arith.addf %234, %237 : vector<8x128xf32>
    %239 = arith.negf %236 : vector<8x128xf32>
    %240 = math.exp %239 : vector<8x128xf32>
    %cst_93 = arith.constant 1.000000e+00 : f32
    %241 = vector.broadcast %cst_93 : f32 to vector<8x128xf32>
    %242 = arith.addf %241, %240 : vector<8x128xf32>
    %243 = arith.divf %241, %242 : vector<8x128xf32>
    %244 = arith.negf %238 : vector<8x128xf32>
    %245 = math.exp %244 : vector<8x128xf32>
    %cst_94 = arith.constant 1.000000e+00 : f32
    %246 = vector.broadcast %cst_94 : f32 to vector<8x128xf32>
    %247 = arith.addf %246, %245 : vector<8x128xf32>
    %248 = arith.divf %246, %247 : vector<8x128xf32>
    %249 = vector.extract_strided_slice %243 {offsets = [0, 0], sizes = [8, 32], strides = [1, 1]} : vector<8x128xf32> to vector<8x32xf32>
    %250 = vector.extract_strided_slice %243 {offsets = [0, 32], sizes = [8, 32], strides = [1, 1]} : vector<8x128xf32> to vector<8x32xf32>
    %251 = vector.extract_strided_slice %243 {offsets = [0, 64], sizes = [8, 32], strides = [1, 1]} : vector<8x128xf32> to vector<8x32xf32>
    %cst_95 = arith.constant 2.000000e+00 : f32
    %252 = vector.broadcast %cst_95 : f32 to vector<8x32xf32>
    %253 = arith.mulf %252, %251 : vector<8x32xf32>
    %cst_96 = arith.constant 1.000000e+00 : f32
    %254 = vector.broadcast %cst_96 : f32 to vector<8x32xf32>
    %255 = arith.subf %253, %254 : vector<8x32xf32>
    %256 = vector.extract_strided_slice %243 {offsets = [0, 96], sizes = [8, 32], strides = [1, 1]} : vector<8x128xf32> to vector<8x32xf32>
    %257 = vector.extract_strided_slice %248 {offsets = [0, 0], sizes = [8, 32], strides = [1, 1]} : vector<8x128xf32> to vector<8x32xf32>
    %258 = vector.extract_strided_slice %248 {offsets = [0, 32], sizes = [8, 32], strides = [1, 1]} : vector<8x128xf32> to vector<8x32xf32>
    %259 = vector.extract_strided_slice %248 {offsets = [0, 64], sizes = [8, 32], strides = [1, 1]} : vector<8x128xf32> to vector<8x32xf32>
    %cst_97 = arith.constant 2.000000e+00 : f32
    %260 = vector.broadcast %cst_97 : f32 to vector<8x32xf32>
    %261 = arith.mulf %260, %259 : vector<8x32xf32>
    %cst_98 = arith.constant 1.000000e+00 : f32
    %262 = vector.broadcast %cst_98 : f32 to vector<8x32xf32>
    %263 = arith.subf %261, %262 : vector<8x32xf32>
    %264 = vector.extract_strided_slice %248 {offsets = [0, 96], sizes = [8, 32], strides = [1, 1]} : vector<8x128xf32> to vector<8x32xf32>
    %265 = arith.mulf %250, %223 : vector<8x32xf32>
    %266 = arith.mulf %249, %255 : vector<8x32xf32>
    %267 = arith.addf %265, %266 : vector<8x32xf32>
    %268 = math.tanh %267 : vector<8x32xf32>
    %269 = arith.mulf %256, %268 : vector<8x32xf32>
    %270 = arith.mulf %258, %228 : vector<8x32xf32>
    %271 = arith.mulf %257, %263 : vector<8x32xf32>
    %272 = arith.addf %270, %271 : vector<8x32xf32>
    %273 = math.tanh %272 : vector<8x32xf32>
    %274 = arith.mulf %264, %273 : vector<8x32xf32>
    %c40_99 = arith.constant 40 : index
    %c0_100 = arith.constant 0 : index
    %275 = vector.load %arg15[%c40_99, %c0_100] : memref<64x64xf32, #tpu.memory_space<vmem>>, vector<8x32xf32>
    tpu.vector_store %arg15[%c40_99, %c0_100], %269 {strides = array<i32>} : memref<64x64xf32, #tpu.memory_space<vmem>>, vector<8x32xf32>,
    %c16_101 = arith.constant 16 : index
    %c32_102 = arith.constant 32 : index
    %276 = vector.load %arg15[%c16_101, %c32_102] : memref<64x64xf32, #tpu.memory_space<vmem>>, vector<8x32xf32>
    tpu.vector_store %arg15[%c16_101, %c32_102], %274 {strides = array<i32>} : memref<64x64xf32, #tpu.memory_space<vmem>>, vector<8x32xf32>,
    %c48_103 = arith.constant 48 : index
    %c0_104 = arith.constant 0 : index
    %277 = vector.load %arg14[%c48_103, %c0_104] : memref<64x256xf32, #tpu.memory_space<vmem>>, vector<8x128xf32>
    %c8_105 = arith.constant 8 : index
    %c128_106 = arith.constant 128 : index
    %278 = vector.load %arg14[%c8_105, %c128_106] : memref<64x256xf32, #tpu.memory_space<vmem>>, vector<8x128xf32>
    %cst_107 = arith.constant dense<0.000000e+00> : vector<8x128xf32>
    %279 = tpu.matmul %269, %7, %cst_107 {dimension_numbers = #tpu.dot_dimension_numbers<[1], [0], [0], [1], [0, 0, 1, 1], [], []>} : vector<8x32xf32>, vector<32x128xf32>, vector<8x128xf32> -> vector<8x128xf32>
    %280 = arith.addf %277, %279 : vector<8x128xf32>
    %cst_108 = arith.constant dense<0.000000e+00> : vector<8x128xf32>
    %281 = tpu.matmul %274, %8, %cst_108 {dimension_numbers = #tpu.dot_dimension_numbers<[1], [0], [0], [1], [0, 0, 1, 1], [], []>} : vector<8x32xf32>, vector<32x128xf32>, vector<8x128xf32> -> vector<8x128xf32>
    %282 = arith.addf %278, %281 : vector<8x128xf32>
    %283 = arith.negf %280 : vector<8x128xf32>
    %284 = math.exp %283 : vector<8x128xf32>
    %cst_109 = arith.constant 1.000000e+00 : f32
    %285 = vector.broadcast %cst_109 : f32 to vector<8x128xf32>
    %286 = arith.addf %285, %284 : vector<8x128xf32>
    %287 = arith.divf %285, %286 : vector<8x128xf32>
    %288 = arith.negf %282 : vector<8x128xf32>
    %289 = math.exp %288 : vector<8x128xf32>
    %cst_110 = arith.constant 1.000000e+00 : f32
    %290 = vector.broadcast %cst_110 : f32 to vector<8x128xf32>
    %291 = arith.addf %290, %289 : vector<8x128xf32>
    %292 = arith.divf %290, %291 : vector<8x128xf32>
    %293 = vector.extract_strided_slice %287 {offsets = [0, 0], sizes = [8, 32], strides = [1, 1]} : vector<8x128xf32> to vector<8x32xf32>
    %294 = vector.extract_strided_slice %287 {offsets = [0, 32], sizes = [8, 32], strides = [1, 1]} : vector<8x128xf32> to vector<8x32xf32>
    %295 = vector.extract_strided_slice %287 {offsets = [0, 64], sizes = [8, 32], strides = [1, 1]} : vector<8x128xf32> to vector<8x32xf32>
    %cst_111 = arith.constant 2.000000e+00 : f32
    %296 = vector.broadcast %cst_111 : f32 to vector<8x32xf32>
    %297 = arith.mulf %296, %295 : vector<8x32xf32>
    %cst_112 = arith.constant 1.000000e+00 : f32
    %298 = vector.broadcast %cst_112 : f32 to vector<8x32xf32>
    %299 = arith.subf %297, %298 : vector<8x32xf32>
    %300 = vector.extract_strided_slice %287 {offsets = [0, 96], sizes = [8, 32], strides = [1, 1]} : vector<8x128xf32> to vector<8x32xf32>
    %301 = vector.extract_strided_slice %292 {offsets = [0, 0], sizes = [8, 32], strides = [1, 1]} : vector<8x128xf32> to vector<8x32xf32>
    %302 = vector.extract_strided_slice %292 {offsets = [0, 32], sizes = [8, 32], strides = [1, 1]} : vector<8x128xf32> to vector<8x32xf32>
    %303 = vector.extract_strided_slice %292 {offsets = [0, 64], sizes = [8, 32], strides = [1, 1]} : vector<8x128xf32> to vector<8x32xf32>
    %cst_113 = arith.constant 2.000000e+00 : f32
    %304 = vector.broadcast %cst_113 : f32 to vector<8x32xf32>
    %305 = arith.mulf %304, %303 : vector<8x32xf32>
    %cst_114 = arith.constant 1.000000e+00 : f32
    %306 = vector.broadcast %cst_114 : f32 to vector<8x32xf32>
    %307 = arith.subf %305, %306 : vector<8x32xf32>
    %308 = vector.extract_strided_slice %292 {offsets = [0, 96], sizes = [8, 32], strides = [1, 1]} : vector<8x128xf32> to vector<8x32xf32>
    %309 = arith.mulf %294, %267 : vector<8x32xf32>
    %310 = arith.mulf %293, %299 : vector<8x32xf32>
    %311 = arith.addf %309, %310 : vector<8x32xf32>
    %312 = math.tanh %311 : vector<8x32xf32>
    %313 = arith.mulf %300, %312 : vector<8x32xf32>
    %314 = arith.mulf %302, %272 : vector<8x32xf32>
    %315 = arith.mulf %301, %307 : vector<8x32xf32>
    %316 = arith.addf %314, %315 : vector<8x32xf32>
    %317 = math.tanh %316 : vector<8x32xf32>
    %318 = arith.mulf %308, %317 : vector<8x32xf32>
    %c48_115 = arith.constant 48 : index
    %c0_116 = arith.constant 0 : index
    %319 = vector.load %arg15[%c48_115, %c0_116] : memref<64x64xf32, #tpu.memory_space<vmem>>, vector<8x32xf32>
    tpu.vector_store %arg15[%c48_115, %c0_116], %313 {strides = array<i32>} : memref<64x64xf32, #tpu.memory_space<vmem>>, vector<8x32xf32>,
    %c8_117 = arith.constant 8 : index
    %c32_118 = arith.constant 32 : index
    %320 = vector.load %arg15[%c8_117, %c32_118] : memref<64x64xf32, #tpu.memory_space<vmem>>, vector<8x32xf32>
    tpu.vector_store %arg15[%c8_117, %c32_118], %318 {strides = array<i32>} : memref<64x64xf32, #tpu.memory_space<vmem>>, vector<8x32xf32>,
    %c56_119 = arith.constant 56 : index
    %c0_120 = arith.constant 0 : index
    %321 = vector.load %arg14[%c56_119, %c0_120] : memref<64x256xf32, #tpu.memory_space<vmem>>, vector<8x128xf32>
    %c0_121 = arith.constant 0 : index
    %c128_122 = arith.constant 128 : index
    %322 = vector.load %arg14[%c0_121, %c128_122] : memref<64x256xf32, #tpu.memory_space<vmem>>, vector<8x128xf32>
    %cst_123 = arith.constant dense<0.000000e+00> : vector<8x128xf32>
    %323 = tpu.matmul %313, %7, %cst_123 {dimension_numbers = #tpu.dot_dimension_numbers<[1], [0], [0], [1], [0, 0, 1, 1], [], []>} : vector<8x32xf32>, vector<32x128xf32>, vector<8x128xf32> -> vector<8x128xf32>
    %324 = arith.addf %321, %323 : vector<8x128xf32>
    %cst_124 = arith.constant dense<0.000000e+00> : vector<8x128xf32>
    %325 = tpu.matmul %318, %8, %cst_124 {dimension_numbers = #tpu.dot_dimension_numbers<[1], [0], [0], [1], [0, 0, 1, 1], [], []>} : vector<8x32xf32>, vector<32x128xf32>, vector<8x128xf32> -> vector<8x128xf32>
    %326 = arith.addf %322, %325 : vector<8x128xf32>
    %327 = arith.negf %324 : vector<8x128xf32>
    %328 = math.exp %327 : vector<8x128xf32>
    %cst_125 = arith.constant 1.000000e+00 : f32
    %329 = vector.broadcast %cst_125 : f32 to vector<8x128xf32>
    %330 = arith.addf %329, %328 : vector<8x128xf32>
    %331 = arith.divf %329, %330 : vector<8x128xf32>
    %332 = arith.negf %326 : vector<8x128xf32>
    %333 = math.exp %332 : vector<8x128xf32>
    %cst_126 = arith.constant 1.000000e+00 : f32
    %334 = vector.broadcast %cst_126 : f32 to vector<8x128xf32>
    %335 = arith.addf %334, %333 : vector<8x128xf32>
    %336 = arith.divf %334, %335 : vector<8x128xf32>
    %337 = vector.extract_strided_slice %331 {offsets = [0, 0], sizes = [8, 32], strides = [1, 1]} : vector<8x128xf32> to vector<8x32xf32>
    %338 = vector.extract_strided_slice %331 {offsets = [0, 32], sizes = [8, 32], strides = [1, 1]} : vector<8x128xf32> to vector<8x32xf32>
    %339 = vector.extract_strided_slice %331 {offsets = [0, 64], sizes = [8, 32], strides = [1, 1]} : vector<8x128xf32> to vector<8x32xf32>
    %cst_127 = arith.constant 2.000000e+00 : f32
    %340 = vector.broadcast %cst_127 : f32 to vector<8x32xf32>
    %341 = arith.mulf %340, %339 : vector<8x32xf32>
    %cst_128 = arith.constant 1.000000e+00 : f32
    %342 = vector.broadcast %cst_128 : f32 to vector<8x32xf32>
    %343 = arith.subf %341, %342 : vector<8x32xf32>
    %344 = vector.extract_strided_slice %331 {offsets = [0, 96], sizes = [8, 32], strides = [1, 1]} : vector<8x128xf32> to vector<8x32xf32>
    %345 = vector.extract_strided_slice %336 {offsets = [0, 0], sizes = [8, 32], strides = [1, 1]} : vector<8x128xf32> to vector<8x32xf32>
    %346 = vector.extract_strided_slice %336 {offsets = [0, 32], sizes = [8, 32], strides = [1, 1]} : vector<8x128xf32> to vector<8x32xf32>
    %347 = vector.extract_strided_slice %336 {offsets = [0, 64], sizes = [8, 32], strides = [1, 1]} : vector<8x128xf32> to vector<8x32xf32>
    %cst_129 = arith.constant 2.000000e+00 : f32
    %348 = vector.broadcast %cst_129 : f32 to vector<8x32xf32>
    %349 = arith.mulf %348, %347 : vector<8x32xf32>
    %cst_130 = arith.constant 1.000000e+00 : f32
    %350 = vector.broadcast %cst_130 : f32 to vector<8x32xf32>
    %351 = arith.subf %349, %350 : vector<8x32xf32>
    %352 = vector.extract_strided_slice %336 {offsets = [0, 96], sizes = [8, 32], strides = [1, 1]} : vector<8x128xf32> to vector<8x32xf32>
    %353 = arith.mulf %338, %311 : vector<8x32xf32>
    %354 = arith.mulf %337, %343 : vector<8x32xf32>
    %355 = arith.addf %353, %354 : vector<8x32xf32>
    %356 = math.tanh %355 : vector<8x32xf32>
    %357 = arith.mulf %344, %356 : vector<8x32xf32>
    %358 = arith.mulf %346, %316 : vector<8x32xf32>
    %359 = arith.mulf %345, %351 : vector<8x32xf32>
    %360 = arith.addf %358, %359 : vector<8x32xf32>
    %361 = math.tanh %360 : vector<8x32xf32>
    %362 = arith.mulf %352, %361 : vector<8x32xf32>
    %c56_131 = arith.constant 56 : index
    %c0_132 = arith.constant 0 : index
    %363 = vector.load %arg15[%c56_131, %c0_132] : memref<64x64xf32, #tpu.memory_space<vmem>>, vector<8x32xf32>
    tpu.vector_store %arg15[%c56_131, %c0_132], %357 {strides = array<i32>} : memref<64x64xf32, #tpu.memory_space<vmem>>, vector<8x32xf32>,
    %c0_133 = arith.constant 0 : index
    %c32_134 = arith.constant 32 : index
    %364 = vector.load %arg15[%c0_133, %c32_134] : memref<64x64xf32, #tpu.memory_space<vmem>>, vector<8x32xf32>
    tpu.vector_store %arg15[%c0_133, %c32_134], %362 {strides = array<i32>} : memref<64x64xf32, #tpu.memory_space<vmem>>, vector<8x32xf32>,
    %c0_135 = arith.constant 0 : index
    %c0_136 = arith.constant 0 : index
    %365 = vector.load %arg15[%c0_135, %c0_136] : memref<64x64xf32, #tpu.memory_space<vmem>>, vector<64x64xf32>
    %c0_137 = arith.constant 0 : index
    %c0_138 = arith.constant 0 : index
    %366 = vector.load %arg6[%c0_137, %c0_138] : memref<64x256xf32, #tpu.memory_space<vmem>>, vector<64x256xf32>
    %cst_139 = arith.constant dense<0.000000e+00> : vector<64x256xf32>
    %367 = tpu.matmul %365, %366, %cst_139 {dimension_numbers = #tpu.dot_dimension_numbers<[1], [0], [0], [1], [0, 0, 1, 1], [], []>} : vector<64x64xf32>, vector<64x256xf32>, vector<64x256xf32> -> vector<64x256xf32>
    %c0_140 = arith.constant 0 : index
    %c0_141 = arith.constant 0 : index
    %368 = vector.load %arg9[%c0_140, %c0_141] : memref<1x256xf32, #tpu.memory_space<vmem>>, vector<1x256xf32>
    %369 = vector.broadcast %368 : vector<1x256xf32> to vector<64x256xf32>
    %370 = arith.addf %367, %369 : vector<64x256xf32>
    %c0_142 = arith.constant 0 : index
    %c0_143 = arith.constant 0 : index
    %371 = vector.load %arg14[%c0_142, %c0_143] : memref<64x256xf32, #tpu.memory_space<vmem>>, vector<64x256xf32>
    tpu.vector_store %arg14[%c0_142, %c0_143], %370 {strides = array<i32>} : memref<64x256xf32, #tpu.memory_space<vmem>>, vector<64x256xf32>,
    %c0_144 = arith.constant 0 : index
    %c0_145 = arith.constant 0 : index
    %372 = vector.load %arg7[%c0_144, %c0_145] : memref<32x128xf32, #tpu.memory_space<vmem>>, vector<32x128xf32>
    %c0_146 = arith.constant 0 : index
    %c0_147 = arith.constant 0 : index
    %373 = vector.load %arg8[%c0_146, %c0_147] : memref<32x128xf32, #tpu.memory_space<vmem>>, vector<32x128xf32>
    %cst_148 = arith.constant 0.000000e+00 : f32
    %374 = vector.broadcast %cst_148 : f32 to vector<8x32xf32>
    %cst_149 = arith.constant 0.000000e+00 : f32
    %375 = vector.broadcast %cst_149 : f32 to vector<8x32xf32>
    %cst_150 = arith.constant 0.000000e+00 : f32
    %376 = vector.broadcast %cst_150 : f32 to vector<8x32xf32>
    %cst_151 = arith.constant 0.000000e+00 : f32
    %377 = vector.broadcast %cst_151 : f32 to vector<8x32xf32>
    %c0_152 = arith.constant 0 : index
    %c0_153 = arith.constant 0 : index
    %378 = vector.load %arg14[%c0_152, %c0_153] : memref<64x256xf32, #tpu.memory_space<vmem>>, vector<8x128xf32>
    %c56_154 = arith.constant 56 : index
    %c128_155 = arith.constant 128 : index
    %379 = vector.load %arg14[%c56_154, %c128_155] : memref<64x256xf32, #tpu.memory_space<vmem>>, vector<8x128xf32>
    %cst_156 = arith.constant dense<0.000000e+00> : vector<8x128xf32>
    %380 = tpu.matmul %374, %372, %cst_156 {dimension_numbers = #tpu.dot_dimension_numbers<[1], [0], [0], [1], [0, 0, 1, 1], [], []>} : vector<8x32xf32>, vector<32x128xf32>, vector<8x128xf32> -> vector<8x128xf32>
    %381 = arith.addf %378, %380 : vector<8x128xf32>
    %cst_157 = arith.constant dense<0.000000e+00> : vector<8x128xf32>
    %382 = tpu.matmul %376, %373, %cst_157 {dimension_numbers = #tpu.dot_dimension_numbers<[1], [0], [0], [1], [0, 0, 1, 1], [], []>} : vector<8x32xf32>, vector<32x128xf32>, vector<8x128xf32> -> vector<8x128xf32>
    %383 = arith.addf %379, %382 : vector<8x128xf32>
    %384 = arith.negf %381 : vector<8x128xf32>
    %385 = math.exp %384 : vector<8x128xf32>
    %cst_158 = arith.constant 1.000000e+00 : f32
    %386 = vector.broadcast %cst_158 : f32 to vector<8x128xf32>
    %387 = arith.addf %386, %385 : vector<8x128xf32>
    %388 = arith.divf %386, %387 : vector<8x128xf32>
    %389 = arith.negf %383 : vector<8x128xf32>
    %390 = math.exp %389 : vector<8x128xf32>
    %cst_159 = arith.constant 1.000000e+00 : f32
    %391 = vector.broadcast %cst_159 : f32 to vector<8x128xf32>
    %392 = arith.addf %391, %390 : vector<8x128xf32>
    %393 = arith.divf %391, %392 : vector<8x128xf32>
    %394 = vector.extract_strided_slice %388 {offsets = [0, 0], sizes = [8, 32], strides = [1, 1]} : vector<8x128xf32> to vector<8x32xf32>
    %395 = vector.extract_strided_slice %388 {offsets = [0, 32], sizes = [8, 32], strides = [1, 1]} : vector<8x128xf32> to vector<8x32xf32>
    %396 = vector.extract_strided_slice %388 {offsets = [0, 64], sizes = [8, 32], strides = [1, 1]} : vector<8x128xf32> to vector<8x32xf32>
    %cst_160 = arith.constant 2.000000e+00 : f32
    %397 = vector.broadcast %cst_160 : f32 to vector<8x32xf32>
    %398 = arith.mulf %397, %396 : vector<8x32xf32>
    %cst_161 = arith.constant 1.000000e+00 : f32
    %399 = vector.broadcast %cst_161 : f32 to vector<8x32xf32>
    %400 = arith.subf %398, %399 : vector<8x32xf32>
    %401 = vector.extract_strided_slice %388 {offsets = [0, 96], sizes = [8, 32], strides = [1, 1]} : vector<8x128xf32> to vector<8x32xf32>
    %402 = vector.extract_strided_slice %393 {offsets = [0, 0], sizes = [8, 32], strides = [1, 1]} : vector<8x128xf32> to vector<8x32xf32>
    %403 = vector.extract_strided_slice %393 {offsets = [0, 32], sizes = [8, 32], strides = [1, 1]} : vector<8x128xf32> to vector<8x32xf32>
    %404 = vector.extract_strided_slice %393 {offsets = [0, 64], sizes = [8, 32], strides = [1, 1]} : vector<8x128xf32> to vector<8x32xf32>
    %cst_162 = arith.constant 2.000000e+00 : f32
    %405 = vector.broadcast %cst_162 : f32 to vector<8x32xf32>
    %406 = arith.mulf %405, %404 : vector<8x32xf32>
    %cst_163 = arith.constant 1.000000e+00 : f32
    %407 = vector.broadcast %cst_163 : f32 to vector<8x32xf32>
    %408 = arith.subf %406, %407 : vector<8x32xf32>
    %409 = vector.extract_strided_slice %393 {offsets = [0, 96], sizes = [8, 32], strides = [1, 1]} : vector<8x128xf32> to vector<8x32xf32>
    %410 = arith.mulf %395, %375 : vector<8x32xf32>
    %411 = arith.mulf %394, %400 : vector<8x32xf32>
    %412 = arith.addf %410, %411 : vector<8x32xf32>
    %413 = math.tanh %412 : vector<8x32xf32>
    %414 = arith.mulf %401, %413 : vector<8x32xf32>
    %415 = arith.mulf %403, %377 : vector<8x32xf32>
    %416 = arith.mulf %402, %408 : vector<8x32xf32>
    %417 = arith.addf %415, %416 : vector<8x32xf32>
    %418 = math.tanh %417 : vector<8x32xf32>
    %419 = arith.mulf %409, %418 : vector<8x32xf32>
    %c8_164 = arith.constant 8 : index
    %c0_165 = arith.constant 0 : index
    %420 = vector.load %arg14[%c8_164, %c0_165] : memref<64x256xf32, #tpu.memory_space<vmem>>, vector<8x128xf32>
    %cst_166 = arith.constant dense<0.000000e+00> : vector<8x128xf32>
    %421 = tpu.matmul %414, %372, %cst_166 {dimension_numbers = #tpu.dot_dimension_numbers<[1], [0], [0], [1], [0, 0, 1, 1], [], []>} : vector<8x32xf32>, vector<32x128xf32>, vector<8x128xf32> -> vector<8x128xf32>
    %422 = arith.addf %420, %421 : vector<8x128xf32>
    %423 = arith.negf %422 : vector<8x128xf32>
    %424 = math.exp %423 : vector<8x128xf32>
    %cst_167 = arith.constant 1.000000e+00 : f32
    %425 = vector.broadcast %cst_167 : f32 to vector<8x128xf32>
    %426 = arith.addf %425, %424 : vector<8x128xf32>
    %427 = arith.divf %425, %426 : vector<8x128xf32>
    %428 = vector.extract_strided_slice %427 {offsets = [0, 0], sizes = [8, 32], strides = [1, 1]} : vector<8x128xf32> to vector<8x32xf32>
    %429 = vector.extract_strided_slice %427 {offsets = [0, 32], sizes = [8, 32], strides = [1, 1]} : vector<8x128xf32> to vector<8x32xf32>
    %430 = vector.extract_strided_slice %427 {offsets = [0, 64], sizes = [8, 32], strides = [1, 1]} : vector<8x128xf32> to vector<8x32xf32>
    %cst_168 = arith.constant 2.000000e+00 : f32
    %431 = vector.broadcast %cst_168 : f32 to vector<8x32xf32>
    %432 = arith.mulf %431, %430 : vector<8x32xf32>
    %cst_169 = arith.constant 1.000000e+00 : f32
    %433 = vector.broadcast %cst_169 : f32 to vector<8x32xf32>
    %434 = arith.subf %432, %433 : vector<8x32xf32>
    %435 = vector.extract_strided_slice %427 {offsets = [0, 96], sizes = [8, 32], strides = [1, 1]} : vector<8x128xf32> to vector<8x32xf32>
    %436 = arith.mulf %429, %412 : vector<8x32xf32>
    %437 = arith.mulf %428, %434 : vector<8x32xf32>
    %438 = arith.addf %436, %437 : vector<8x32xf32>
    %439 = math.tanh %438 : vector<8x32xf32>
    %440 = arith.mulf %435, %439 : vector<8x32xf32>
    %c16_170 = arith.constant 16 : index
    %c0_171 = arith.constant 0 : index
    %441 = vector.load %arg14[%c16_170, %c0_171] : memref<64x256xf32, #tpu.memory_space<vmem>>, vector<8x128xf32>
    %cst_172 = arith.constant dense<0.000000e+00> : vector<8x128xf32>
    %442 = tpu.matmul %440, %372, %cst_172 {dimension_numbers = #tpu.dot_dimension_numbers<[1], [0], [0], [1], [0, 0, 1, 1], [], []>} : vector<8x32xf32>, vector<32x128xf32>, vector<8x128xf32> -> vector<8x128xf32>
    %443 = arith.addf %441, %442 : vector<8x128xf32>
    %444 = arith.negf %443 : vector<8x128xf32>
    %445 = math.exp %444 : vector<8x128xf32>
    %cst_173 = arith.constant 1.000000e+00 : f32
    %446 = vector.broadcast %cst_173 : f32 to vector<8x128xf32>
    %447 = arith.addf %446, %445 : vector<8x128xf32>
    %448 = arith.divf %446, %447 : vector<8x128xf32>
    %449 = vector.extract_strided_slice %448 {offsets = [0, 0], sizes = [8, 32], strides = [1, 1]} : vector<8x128xf32> to vector<8x32xf32>
    %450 = vector.extract_strided_slice %448 {offsets = [0, 32], sizes = [8, 32], strides = [1, 1]} : vector<8x128xf32> to vector<8x32xf32>
    %451 = vector.extract_strided_slice %448 {offsets = [0, 64], sizes = [8, 32], strides = [1, 1]} : vector<8x128xf32> to vector<8x32xf32>
    %cst_174 = arith.constant 2.000000e+00 : f32
    %452 = vector.broadcast %cst_174 : f32 to vector<8x32xf32>
    %453 = arith.mulf %452, %451 : vector<8x32xf32>
    %cst_175 = arith.constant 1.000000e+00 : f32
    %454 = vector.broadcast %cst_175 : f32 to vector<8x32xf32>
    %455 = arith.subf %453, %454 : vector<8x32xf32>
    %456 = vector.extract_strided_slice %448 {offsets = [0, 96], sizes = [8, 32], strides = [1, 1]} : vector<8x128xf32> to vector<8x32xf32>
    %457 = arith.mulf %450, %438 : vector<8x32xf32>
    %458 = arith.mulf %449, %455 : vector<8x32xf32>
    %459 = arith.addf %457, %458 : vector<8x32xf32>
    %460 = math.tanh %459 : vector<8x32xf32>
    %461 = arith.mulf %456, %460 : vector<8x32xf32>
    %c24_176 = arith.constant 24 : index
    %c0_177 = arith.constant 0 : index
    %462 = vector.load %arg14[%c24_176, %c0_177] : memref<64x256xf32, #tpu.memory_space<vmem>>, vector<8x128xf32>
    %cst_178 = arith.constant dense<0.000000e+00> : vector<8x128xf32>
    %463 = tpu.matmul %461, %372, %cst_178 {dimension_numbers = #tpu.dot_dimension_numbers<[1], [0], [0], [1], [0, 0, 1, 1], [], []>} : vector<8x32xf32>, vector<32x128xf32>, vector<8x128xf32> -> vector<8x128xf32>
    %464 = arith.addf %462, %463 : vector<8x128xf32>
    %465 = arith.negf %464 : vector<8x128xf32>
    %466 = math.exp %465 : vector<8x128xf32>
    %cst_179 = arith.constant 1.000000e+00 : f32
    %467 = vector.broadcast %cst_179 : f32 to vector<8x128xf32>
    %468 = arith.addf %467, %466 : vector<8x128xf32>
    %469 = arith.divf %467, %468 : vector<8x128xf32>
    %470 = vector.extract_strided_slice %469 {offsets = [0, 0], sizes = [8, 32], strides = [1, 1]} : vector<8x128xf32> to vector<8x32xf32>
    %471 = vector.extract_strided_slice %469 {offsets = [0, 32], sizes = [8, 32], strides = [1, 1]} : vector<8x128xf32> to vector<8x32xf32>
    %472 = vector.extract_strided_slice %469 {offsets = [0, 64], sizes = [8, 32], strides = [1, 1]} : vector<8x128xf32> to vector<8x32xf32>
    %cst_180 = arith.constant 2.000000e+00 : f32
    %473 = vector.broadcast %cst_180 : f32 to vector<8x32xf32>
    %474 = arith.mulf %473, %472 : vector<8x32xf32>
    %cst_181 = arith.constant 1.000000e+00 : f32
    %475 = vector.broadcast %cst_181 : f32 to vector<8x32xf32>
    %476 = arith.subf %474, %475 : vector<8x32xf32>
    %477 = vector.extract_strided_slice %469 {offsets = [0, 96], sizes = [8, 32], strides = [1, 1]} : vector<8x128xf32> to vector<8x32xf32>
    %478 = arith.mulf %471, %459 : vector<8x32xf32>
    %479 = arith.mulf %470, %476 : vector<8x32xf32>
    %480 = arith.addf %478, %479 : vector<8x32xf32>
    %481 = math.tanh %480 : vector<8x32xf32>
    %482 = arith.mulf %477, %481 : vector<8x32xf32>
    %c32_182 = arith.constant 32 : index
    %c0_183 = arith.constant 0 : index
    %483 = vector.load %arg14[%c32_182, %c0_183] : memref<64x256xf32, #tpu.memory_space<vmem>>, vector<8x128xf32>
    %cst_184 = arith.constant dense<0.000000e+00> : vector<8x128xf32>
    %484 = tpu.matmul %482, %372, %cst_184 {dimension_numbers = #tpu.dot_dimension_numbers<[1], [0], [0], [1], [0, 0, 1, 1], [], []>} : vector<8x32xf32>, vector<32x128xf32>, vector<8x128xf32> -> vector<8x128xf32>
    %485 = arith.addf %483, %484 : vector<8x128xf32>
    %486 = arith.negf %485 : vector<8x128xf32>
    %487 = math.exp %486 : vector<8x128xf32>
    %cst_185 = arith.constant 1.000000e+00 : f32
    %488 = vector.broadcast %cst_185 : f32 to vector<8x128xf32>
    %489 = arith.addf %488, %487 : vector<8x128xf32>
    %490 = arith.divf %488, %489 : vector<8x128xf32>
    %491 = vector.extract_strided_slice %490 {offsets = [0, 0], sizes = [8, 32], strides = [1, 1]} : vector<8x128xf32> to vector<8x32xf32>
    %492 = vector.extract_strided_slice %490 {offsets = [0, 32], sizes = [8, 32], strides = [1, 1]} : vector<8x128xf32> to vector<8x32xf32>
    %493 = vector.extract_strided_slice %490 {offsets = [0, 64], sizes = [8, 32], strides = [1, 1]} : vector<8x128xf32> to vector<8x32xf32>
    %cst_186 = arith.constant 2.000000e+00 : f32
    %494 = vector.broadcast %cst_186 : f32 to vector<8x32xf32>
    %495 = arith.mulf %494, %493 : vector<8x32xf32>
    %cst_187 = arith.constant 1.000000e+00 : f32
    %496 = vector.broadcast %cst_187 : f32 to vector<8x32xf32>
    %497 = arith.subf %495, %496 : vector<8x32xf32>
    %498 = vector.extract_strided_slice %490 {offsets = [0, 96], sizes = [8, 32], strides = [1, 1]} : vector<8x128xf32> to vector<8x32xf32>
    %499 = arith.mulf %492, %480 : vector<8x32xf32>
    %500 = arith.mulf %491, %497 : vector<8x32xf32>
    %501 = arith.addf %499, %500 : vector<8x32xf32>
    %502 = math.tanh %501 : vector<8x32xf32>
    %503 = arith.mulf %498, %502 : vector<8x32xf32>
    %c40_188 = arith.constant 40 : index
    %c0_189 = arith.constant 0 : index
    %504 = vector.load %arg14[%c40_188, %c0_189] : memref<64x256xf32, #tpu.memory_space<vmem>>, vector<8x128xf32>
    %cst_190 = arith.constant dense<0.000000e+00> : vector<8x128xf32>
    %505 = tpu.matmul %503, %372, %cst_190 {dimension_numbers = #tpu.dot_dimension_numbers<[1], [0], [0], [1], [0, 0, 1, 1], [], []>} : vector<8x32xf32>, vector<32x128xf32>, vector<8x128xf32> -> vector<8x128xf32>
    %506 = arith.addf %504, %505 : vector<8x128xf32>
    %507 = arith.negf %506 : vector<8x128xf32>
    %508 = math.exp %507 : vector<8x128xf32>
    %cst_191 = arith.constant 1.000000e+00 : f32
    %509 = vector.broadcast %cst_191 : f32 to vector<8x128xf32>
    %510 = arith.addf %509, %508 : vector<8x128xf32>
    %511 = arith.divf %509, %510 : vector<8x128xf32>
    %512 = vector.extract_strided_slice %511 {offsets = [0, 0], sizes = [8, 32], strides = [1, 1]} : vector<8x128xf32> to vector<8x32xf32>
    %513 = vector.extract_strided_slice %511 {offsets = [0, 32], sizes = [8, 32], strides = [1, 1]} : vector<8x128xf32> to vector<8x32xf32>
    %514 = vector.extract_strided_slice %511 {offsets = [0, 64], sizes = [8, 32], strides = [1, 1]} : vector<8x128xf32> to vector<8x32xf32>
    %cst_192 = arith.constant 2.000000e+00 : f32
    %515 = vector.broadcast %cst_192 : f32 to vector<8x32xf32>
    %516 = arith.mulf %515, %514 : vector<8x32xf32>
    %cst_193 = arith.constant 1.000000e+00 : f32
    %517 = vector.broadcast %cst_193 : f32 to vector<8x32xf32>
    %518 = arith.subf %516, %517 : vector<8x32xf32>
    %519 = vector.extract_strided_slice %511 {offsets = [0, 96], sizes = [8, 32], strides = [1, 1]} : vector<8x128xf32> to vector<8x32xf32>
    %520 = arith.mulf %513, %501 : vector<8x32xf32>
    %521 = arith.mulf %512, %518 : vector<8x32xf32>
    %522 = arith.addf %520, %521 : vector<8x32xf32>
    %523 = math.tanh %522 : vector<8x32xf32>
    %524 = arith.mulf %519, %523 : vector<8x32xf32>
    %c48_194 = arith.constant 48 : index
    %c0_195 = arith.constant 0 : index
    %525 = vector.load %arg14[%c48_194, %c0_195] : memref<64x256xf32, #tpu.memory_space<vmem>>, vector<8x128xf32>
    %cst_196 = arith.constant dense<0.000000e+00> : vector<8x128xf32>
    %526 = tpu.matmul %524, %372, %cst_196 {dimension_numbers = #tpu.dot_dimension_numbers<[1], [0], [0], [1], [0, 0, 1, 1], [], []>} : vector<8x32xf32>, vector<32x128xf32>, vector<8x128xf32> -> vector<8x128xf32>
    %527 = arith.addf %525, %526 : vector<8x128xf32>
    %528 = arith.negf %527 : vector<8x128xf32>
    %529 = math.exp %528 : vector<8x128xf32>
    %cst_197 = arith.constant 1.000000e+00 : f32
    %530 = vector.broadcast %cst_197 : f32 to vector<8x128xf32>
    %531 = arith.addf %530, %529 : vector<8x128xf32>
    %532 = arith.divf %530, %531 : vector<8x128xf32>
    %533 = vector.extract_strided_slice %532 {offsets = [0, 0], sizes = [8, 32], strides = [1, 1]} : vector<8x128xf32> to vector<8x32xf32>
    %534 = vector.extract_strided_slice %532 {offsets = [0, 32], sizes = [8, 32], strides = [1, 1]} : vector<8x128xf32> to vector<8x32xf32>
    %535 = vector.extract_strided_slice %532 {offsets = [0, 64], sizes = [8, 32], strides = [1, 1]} : vector<8x128xf32> to vector<8x32xf32>
    %cst_198 = arith.constant 2.000000e+00 : f32
    %536 = vector.broadcast %cst_198 : f32 to vector<8x32xf32>
    %537 = arith.mulf %536, %535 : vector<8x32xf32>
    %cst_199 = arith.constant 1.000000e+00 : f32
    %538 = vector.broadcast %cst_199 : f32 to vector<8x32xf32>
    %539 = arith.subf %537, %538 : vector<8x32xf32>
    %540 = vector.extract_strided_slice %532 {offsets = [0, 96], sizes = [8, 32], strides = [1, 1]} : vector<8x128xf32> to vector<8x32xf32>
    %541 = arith.mulf %534, %522 : vector<8x32xf32>
    %542 = arith.mulf %533, %539 : vector<8x32xf32>
    %543 = arith.addf %541, %542 : vector<8x32xf32>
    %544 = math.tanh %543 : vector<8x32xf32>
    %545 = arith.mulf %540, %544 : vector<8x32xf32>
    %c56_200 = arith.constant 56 : index
    %c0_201 = arith.constant 0 : index
    %546 = vector.load %arg14[%c56_200, %c0_201] : memref<64x256xf32, #tpu.memory_space<vmem>>, vector<8x128xf32>
    %cst_202 = arith.constant dense<0.000000e+00> : vector<8x128xf32>
    %547 = tpu.matmul %545, %372, %cst_202 {dimension_numbers = #tpu.dot_dimension_numbers<[1], [0], [0], [1], [0, 0, 1, 1], [], []>} : vector<8x32xf32>, vector<32x128xf32>, vector<8x128xf32> -> vector<8x128xf32>
    %548 = arith.addf %546, %547 : vector<8x128xf32>
    %549 = arith.negf %548 : vector<8x128xf32>
    %550 = math.exp %549 : vector<8x128xf32>
    %cst_203 = arith.constant 1.000000e+00 : f32
    %551 = vector.broadcast %cst_203 : f32 to vector<8x128xf32>
    %552 = arith.addf %551, %550 : vector<8x128xf32>
    %553 = arith.divf %551, %552 : vector<8x128xf32>
    %554 = vector.extract_strided_slice %553 {offsets = [0, 0], sizes = [8, 32], strides = [1, 1]} : vector<8x128xf32> to vector<8x32xf32>
    %555 = vector.extract_strided_slice %553 {offsets = [0, 32], sizes = [8, 32], strides = [1, 1]} : vector<8x128xf32> to vector<8x32xf32>
    %556 = vector.extract_strided_slice %553 {offsets = [0, 64], sizes = [8, 32], strides = [1, 1]} : vector<8x128xf32> to vector<8x32xf32>
    %cst_204 = arith.constant 2.000000e+00 : f32
    %557 = vector.broadcast %cst_204 : f32 to vector<8x32xf32>
    %558 = arith.mulf %557, %556 : vector<8x32xf32>
    %cst_205 = arith.constant 1.000000e+00 : f32
    %559 = vector.broadcast %cst_205 : f32 to vector<8x32xf32>
    %560 = arith.subf %558, %559 : vector<8x32xf32>
    %561 = vector.extract_strided_slice %553 {offsets = [0, 96], sizes = [8, 32], strides = [1, 1]} : vector<8x128xf32> to vector<8x32xf32>
    %562 = arith.mulf %555, %543 : vector<8x32xf32>
    %563 = arith.mulf %554, %560 : vector<8x32xf32>
    %564 = arith.addf %562, %563 : vector<8x32xf32>
    %565 = math.tanh %564 : vector<8x32xf32>
    %566 = arith.mulf %561, %565 : vector<8x32xf32>
    %c0_206 = arith.constant 0 : index
    %c0_207 = arith.constant 0 : index
    %567 = vector.load %arg10[%c0_206, %c0_207] : memref<32x8xf32, #tpu.memory_space<vmem>>, vector<32x8xf32>
    %cst_208 = arith.constant dense<0.000000e+00> : vector<8x8xf32>
    %568 = tpu.matmul %566, %567, %cst_208 {dimension_numbers = #tpu.dot_dimension_numbers<[1], [0], [0], [1], [0, 0, 1, 1], [], []>} : vector<8x32xf32>, vector<32x8xf32>, vector<8x8xf32> -> vector<8x8xf32>
    %c0_209 = arith.constant 0 : index
    %c0_210 = arith.constant 0 : index
    %569 = vector.load %arg11[%c0_209, %c0_210] : memref<32x8xf32, #tpu.memory_space<vmem>>, vector<32x8xf32>
    %cst_211 = arith.constant dense<0.000000e+00> : vector<8x8xf32>
    %570 = tpu.matmul %419, %569, %cst_211 {dimension_numbers = #tpu.dot_dimension_numbers<[1], [0], [0], [1], [0, 0, 1, 1], [], []>} : vector<8x32xf32>, vector<32x8xf32>, vector<8x8xf32> -> vector<8x8xf32>
    %571 = arith.addf %568, %570 : vector<8x8xf32>
    %c0_212 = arith.constant 0 : index
    %c0_213 = arith.constant 0 : index
    %572 = vector.load %arg12[%c0_212, %c0_213] : memref<1x8xf32, #tpu.memory_space<vmem>>, vector<1x8xf32>
    %573 = vector.broadcast %572 : vector<1x8xf32> to vector<8x8xf32>
    %574 = arith.addf %571, %573 : vector<8x8xf32>
    %c0_214 = arith.constant 0 : index
    %c0_215 = arith.constant 0 : index
    %575 = vector.load %arg13[%c0_214, %c0_215] : memref<8x8xf32, #tpu.memory_space<vmem>>, vector<8x8xf32>
    tpu.vector_store %arg13[%c0_214, %c0_215], %574 {strides = array<i32>} : memref<8x8xf32, #tpu.memory_space<vmem>>, vector<8x8xf32>,
    return
  }
  func.func @transform_0(%arg0: i32) -> (i32, i32) {
    %c0_i32 = arith.constant 0 : i32
    %c0_i32_0 = arith.constant 0 : i32
    %c0_i32_1 = arith.constant 0 : i32
    return %c0_i32, %c0_i32_0 : i32, i32
  }
  func.func @transform_1(%arg0: i32) -> (i32, i32) {
    %c0_i32 = arith.constant 0 : i32
    %c0_i32_0 = arith.constant 0 : i32
    %c0_i32_1 = arith.constant 0 : i32
    return %c0_i32, %c0_i32_0 : i32, i32
  }
  func.func @transform_2(%arg0: i32) -> (i32, i32) {
    %c0_i32 = arith.constant 0 : i32
    %c0_i32_0 = arith.constant 0 : i32
    %c0_i32_1 = arith.constant 0 : i32
    return %c0_i32, %c0_i32_0 : i32, i32
  }
  func.func @transform_3(%arg0: i32) -> (i32, i32) {
    %c0_i32 = arith.constant 0 : i32
    %c0_i32_0 = arith.constant 0 : i32
    %c0_i32_1 = arith.constant 0 : i32
    return %c0_i32, %c0_i32_0 : i32, i32
  }
  func.func @transform_4(%arg0: i32) -> (i32, i32) {
    %c0_i32 = arith.constant 0 : i32
    %c0_i32_0 = arith.constant 0 : i32
    %c0_i32_1 = arith.constant 0 : i32
    return %c0_i32, %c0_i32_0 : i32, i32
  }
  func.func @transform_5(%arg0: i32) -> (i32, i32) {
    %c0_i32 = arith.constant 0 : i32
    %c0_i32_0 = arith.constant 0 : i32
    %c0_i32_1 = arith.constant 0 : i32
    return %c0_i32, %c0_i32_0 : i32, i32
  }
  func.func @transform_6(%arg0: i32) -> (i32, i32) {
    %c0_i32 = arith.constant 0 : i32
    %c0_i32_0 = arith.constant 0 : i32
    %c0_i32_1 = arith.constant 0 : i32
    return %c0_i32, %c0_i32_0 : i32, i32
  }
  func.func @transform_7(%arg0: i32) -> (i32, i32) {
    %c0_i32 = arith.constant 0 : i32
    %c0_i32_0 = arith.constant 0 : i32
    %c0_i32_1 = arith.constant 0 : i32
    return %c0_i32, %c0_i32_0 : i32, i32
  }
  func.func @transform_8(%arg0: i32) -> (i32, i32) {
    %c0_i32 = arith.constant 0 : i32
    %c0_i32_0 = arith.constant 0 : i32
    %c0_i32_1 = arith.constant 0 : i32
    return %c0_i32, %c0_i32_0 : i32, i32
  }
  func.func @transform_9(%arg0: i32) -> (i32, i32) {
    %c0_i32 = arith.constant 0 : i32
    %c0_i32_0 = arith.constant 0 : i32
    %c0_i32_1 = arith.constant 0 : i32
    return %c0_i32, %c0_i32_0 : i32, i32
  }
  func.func @transform_10(%arg0: i32) -> (i32, i32) {
    %c0_i32 = arith.constant 0 : i32
    %c0_i32_0 = arith.constant 0 : i32
    %c0_i32_1 = arith.constant 0 : i32
    return %c0_i32, %c0_i32_0 : i32, i32
  }
  func.func @transform_11(%arg0: i32) -> (i32, i32) {
    %c0_i32 = arith.constant 0 : i32
    %c0_i32_0 = arith.constant 0 : i32
    %c0_i32_1 = arith.constant 0 : i32
    return %c0_i32, %c0_i32_0 : i32, i32
  }
  func.func @transform_12(%arg0: i32) -> (i32, i32) {
    %c0_i32 = arith.constant 0 : i32
    %c0_i32_0 = arith.constant 0 : i32
    %c0_i32_1 = arith.constant 0 : i32
    return %c0_i32, %c0_i32_0 : i32, i32
  }
}

</mosaic_0001>

<bundles_post_ra>
// kernel: lstm_model_forward.1
= control target key start
LH: loop header
LB: loop body
LE: loop exit
PB: predicated region body
PF: predicated region fallthrough
CT: control target
= control target key end

     0   :  { %17 = vsyncpa [#allocation5], 0  ;;  %s5001_s0 = inlined_call_operand.vmem [shape: f32[64,16], index: 0, kind: input, shape index: {}]   ;;  %s5002_s1 = inlined_call_operand.vmem [shape: f32[16,256], index: 1, kind: input, shape index: {}]   ;;  %s5003_s2 = inlined_call_operand.vmem [shape: f32[32,128], index: 2, kind: input, shape index: {}]   ;;  %s5004_s3 = inlined_call_operand.hbm [shape: f32[32,128], index: 3, kind: input, shape index: {}]   ;;  %s5005_s4 = inlined_call_operand.vmem [shape: f32[1,256], index: 4, kind: input, shape index: {}]   ;;  %s5006_s5 = inlined_call_operand.vmem [shape: f32[64,256], index: 5, kind: input, shape index: {}]   ;;  %s5007_s6 = inlined_call_operand.hbm [shape: f32[32,128], index: 6, kind: input, shape index: {}]   ;;  %s5008_s7 = inlined_call_operand.hbm [shape: f32[32,128], index: 7, kind: input, shape index: {}]   ;;  %s5009_s8 = inlined_call_operand.hbm [shape: f32[1,256], index: 8, kind: input, shape index: {}]   ;;  %s5010_s9 = inlined_call_operand.vmem [shape: f32[32,8], index: 9, kind: input, shape index: {}]   ;;  %s5011_s10 = inlined_call_operand.vmem [shape: f32[32,8], index: 10, kind: input, shape index: {}]   ;;  %s5012_s11 = inlined_call_operand.hbm [shape: f32[1,8], index: 11, kind: input, shape index: {}]   ;;  %s5013_s12 = inlined_call_operand.vmem [shape: f32[8,8], index: 12, kind: output, shape index: {}]  }
   0x1   :  { %18 = vsyncpa [#allocation7], 0 }
   0x2   :  { %19 = vsyncpa [#allocation10], 0  ;;  %s4254_s21 = smov [#allocation6]   ;;  %s4255_s23 = smov [#allocation9]  }
   0x3   :  { %s47_s22 = sshll.u32 %s4254_s21, 4  ;;  %s72_s24 = sshll.u32 %s4255_s23, 4  ;;  %s48_s22 = int_to_ptr.vmem [resolvable:$true] %s47_s22  ;;  %s73_s24 = int_to_ptr.vmem [resolvable:$true] %s72_s24 }
   0x4   :  { %s4138_s27 = scalar_lea.hbm %s5007_s6, 512 }
   0x5   :  { %p4139_p0 = scmp.ne.s32.totalorder %s5007_s6, %s4138_s27  ;;  %p4142_p1 = scmp.lt.u32.totalorder %s4138_s27, %s5007_s6 }
   0x7   :  { %p4144_p2 = pnand %p4142_p1, %p4139_p0 }
   0x9   :  { %4147 = shalt.err (!%p4144_p2)
}
   0xa   :  { %s4148_s14 = scalar_lea.vmem %s48_s22, 512  ;;  %p4153_p4 = scmp.lt.s32.totalorder %s48_s22, %s48_s22 }
   0xb   :  { %p4149_p3 = scmp.ne.s32.totalorder %s48_s22, %s4148_s14  ;;  %p4154_p5 = scmp.lt.s32.totalorder %s4148_s14, %s4148_s14 }
   0xd   :  { %p4155_p6 = por %p4154_p5, %p4153_p4 }
   0xf   :  { %p4156_p7 = pnand %p4155_p6, %p4149_p3 }
  0x11   :  { %4159 = shalt.err (!%p4156_p7)
}
  0x12   :  { %s4256_s15 = smov 128   ;;  %s4257_s16 = smov 8  }
  0x13   :  { %53 = dma.hbm_to_vmem [thread:$0]  %s5007_s6, 512, %s48_s22, [#allocation7], %s4256_s15, %s4256_s15, %s4257_s16  }
  0x14   :  { %s4160_s21 = scalar_lea.hbm %s5009_s8, 32 }
  0x15   :  { %p4161_p8 = scmp.ne.s32.totalorder %s5009_s8, %s4160_s21  ;;  %p4164_p9 = scmp.lt.u32.totalorder %s4160_s21, %s5009_s8 }
  0x17   :  { %p4166_p10 = pnand %p4164_p9, %p4161_p8 }
  0x19   :  { %4169 = shalt.err (!%p4166_p10)
}
  0x1a   :  { %s4170_s28 = scalar_lea.vmem %s73_s24, 32  ;;  %p4175_p12 = scmp.lt.s32.totalorder %s73_s24, %s73_s24 }
  0x1b   :  { %p4171_p11 = scmp.ne.s32.totalorder %s73_s24, %s4170_s28  ;;  %p4176_p13 = scmp.lt.s32.totalorder %s4170_s28, %s4170_s28 }
  0x1d   :  { %p4177_p0 = por %p4176_p13, %p4175_p12 }
  0x1f   :  { %p4178_p1 = pnand %p4177_p0, %p4171_p11 }
  0x21   :  { %4181 = shalt.err (!%p4178_p1)
}
  0x22   :  { %75 = dma.hbm_to_vmem [thread:$0]  %s5009_s8, 32, %s73_s24, [#allocation10]  }
  0x23   :  { %s4258_s29 = smov [#allocation4]   ;;  %s4259_s13 = smov [#allocation8]  }
  0x24   :  { %s31_s30 = sshll.u32 %s4258_s29, 4  ;;  %s59_s14 = sshll.u32 %s4259_s13, 4  ;;  %s32_s30 = int_to_ptr.vmem [resolvable:$true] %s31_s30  ;;  %s4358_s14 = int_to_ptr.vmem [resolvable:$true] %s59_s14 }
  0x25   :  { %s4182_s19 = scalar_lea.hbm %s5004_s3, 512 }
  0x26   :  { %p4183_p2 = scmp.ne.s32.totalorder %s5004_s3, %s4182_s19  ;;  %p4186_p3 = scmp.lt.u32.totalorder %s4182_s19, %s5004_s3 }
  0x28   :  { %p4188_p4 = pnand %p4186_p3, %p4183_p2 }
  0x2a   :  { %4191 = shalt.err (!%p4188_p4)
}
  0x2b   :  { %s4192_s8 = scalar_lea.vmem %s32_s30, 512  ;;  %p4197_p6 = scmp.lt.s32.totalorder %s32_s30, %s32_s30 }
  0x2c   :  { %p4193_p5 = scmp.ne.s32.totalorder %s32_s30, %s4192_s8  ;;  %p4198_p7 = scmp.lt.s32.totalorder %s4192_s8, %s4192_s8 }
  0x2e   :  { %p4199_p8 = por %p4198_p7, %p4197_p6 }
  0x30   :  { %p4200_p9 = pnand %p4199_p8, %p4193_p5 }
  0x32   :  { %4203 = shalt.err (!%p4200_p9)
}
  0x33   :  { %37 = dma.hbm_to_vmem [thread:$0]  %s5004_s3, 512, %s32_s30, [#allocation5], %s4256_s15, %s4256_s15, %s4257_s16  }
  0x34   :  { %s4204_s6 = scalar_lea.hbm %s5008_s7, 512 }
  0x35   :  { %p4205_p10 = scmp.ne.s32.totalorder %s5008_s7, %s4204_s6  ;;  %p4208_p11 = scmp.lt.u32.totalorder %s4204_s6, %s5008_s7 }
  0x37   :  { %p4210_p12 = pnand %p4208_p11, %p4205_p10 }
  0x39   :  { %4213 = shalt.err (!%p4210_p12)
}
  0x3a   :  { %s4214_s18 = scalar_lea.vmem %s4358_s14, 512  ;;  %p4219_p0 = scmp.lt.s32.totalorder %s4358_s14, %s4358_s14 }
  0x3b   :  { %p4215_p13 = scmp.ne.s32.totalorder %s4358_s14, %s4214_s18  ;;  %p4220_p1 = scmp.lt.s32.totalorder %s4214_s18, %s4214_s18 }
  0x3d   :  { %p4221_p2 = por %p4220_p1, %p4219_p0 }
  0x3f   :  { %p4222_p3 = pnand %p4221_p2, %p4215_p13 }
  0x41   :  { %4225 = shalt.err (!%p4222_p3)
}
  0x42   :  { %65 = dma.hbm_to_vmem [thread:$0]  %s5008_s7, 512, %s4358_s14, [#allocation7], %s4256_s15, %s4256_s15, %s4257_s16  }
  0x43   :  { %s4260_s19 = smov [#allocation11]   ;;  %s4226_s25 = scalar_lea.hbm %s5012_s11, 16 }
  0x44   :  { %s86_s20 = sshll.u32 %s4260_s19, 4  ;;  %p4227_p4 = scmp.ne.s32.totalorder %s5012_s11, %s4226_s25  ;;  %s87_s20 = int_to_ptr.vmem [resolvable:$true] %s86_s20 }
  0x45   :  { %p4230_p5 = scmp.lt.u32.totalorder %s4226_s25, %s5012_s11 }
  0x47   :  { %p4232_p6 = pnand %p4230_p5, %p4227_p4 }
  0x49   :  { %4235 = shalt.err (!%p4232_p6)
}
  0x4a   :  { %s4236_s28 = scalar_lea.vmem %s87_s20, 16  ;;  %s4240_s7 = scalar_lea.vmem %s87_s20, 32 }
  0x4b   :  { %p4237_p7 = scmp.ne.s32.totalorder %s87_s20, %s4236_s28  ;;  %p4241_p8 = scmp.lt.s32.totalorder %s87_s20, %s87_s20 }
  0x4c   :  { %p4242_p9 = scmp.lt.s32.totalorder %s4240_s7, %s4236_s28 }
  0x4e   :  { %p4243_p10 = por %p4242_p9, %p4241_p8 }
  0x50   :  { %p4244_p11 = pnand %p4243_p10, %p4237_p7 }
  0x52   :  { %4247 = shalt.err (!%p4244_p11)
}
  0x53   :  { %89 = dma.hbm_to_vmem [thread:$0]  %s5012_s11, 16, %s87_s20, [#allocation10]  }
  0x54   :  { %4248 = dma.done.wait [#allocation5], 512  }
  0x55   :  { %4249 = vsyncadd [#allocation5], 4294966784 }
  0x56   :  { %4250 = dma.done.wait [#allocation7], 1024  }
  0x57   :  { %4251 = vsyncadd [#allocation7], 4294966272 }
  0x58   :  { %4252 = dma.done.wait [#allocation10], 48  }
  0x59   :  { %4253 = vsyncadd [#allocation10], 4294967248  ;;  %v4261_v0 = vmov 0.0   ;;  %v4262_v1 = vmov 0.0|0.0   ;;  %vm4263_vm0 = vmmov 0   ;;  %v114_v2 = vld [vmem:[%s5002_s1 + $0x8] sm:$0xff]  ;;  %v119_v28 = vlaneseq }
  0x5a   :  { %218 = vmatprep.mubr.f32.mxu1 %v4261_v0  ;;  %3801 = vmatprep.subr.bf16.mxu0 %v4262_v1  ;;  %v116_v3 = vld [vmem:[%s5002_s1 + $0x18] sm:$0xff]  ;;  %v113_v4 = vld [vmem:[%s5002_s1] sm:$0xff]  ;;  %v115_v6 = vld [vmem:[%s5002_s1 + $0x10] sm:$0xff]  ;;  %vm129_vm1 = vcmask 130048   ;;  %s4265_s3 = smov 32   ;;  %vm293_vm2 = vcmask 261120  }
  0x5b   :  { %3528 = vmatprep.mubr.msk.f32.mxu0 %vm4263_vm0, %v4261_v0  ;;  %v3773_v5 = vpack.c.bf16 %v116_v3, %v114_v2  ;;  %v283_v7 = vld [vmem:[%s5003_s2] sm:$0xff]  ;;  %v3775_v8 = vpack.c.bf16 %v115_v6, %v113_v4  ;;  %v284_v9 = vld [vmem:[%s5003_s2 + $0x8] sm:$0xff]  ;;  %v285_v12 = vld [vmem:[%s5003_s2 + $0x10] sm:$0xff]  ;;  %v4507_v29 = vshrl.u32 %v119_v28, 7  ;;  %vm498_vm3 = vcmask 523520  }
  0x5c   :  { %v4429_v10 = vpack.c.bf16 %v284_v9, %v283_v7  ;;  %v105_v11 = vld [vmem:[%s5001_s0] sm:$0xff]  ;;  %v286_v13 = vld [vmem:[%s5003_s2 + $0x18] sm:$0xff]  ;;  %v106_v15 = vld [vmem:[%s5001_s0 + $0x8] sm:$0xff]  ;;  %vm2006_vm4 = vcmask 523264   ;;  %vm3242_vm5 = vcmask 64512  }
  0x5d   :  { %3774 = vmatprep.subr.bf16.mxu1 %v3773_v5  ;;  %v4444_v14 = vpack.c.bf16 %v286_v13, %v285_v12  ;;  %v107_v16 = vld [vmem:[%s5001_s0 + $0x10] sm:$0xff]  ;;  %v108_v17 = vld [vmem:[%s5001_s0 + $0x18] sm:$0xff]  ;;  %v109_v18 = vld [vmem:[%s5001_s0 + $0x20] sm:$0xff]  ;;  %v125_v30 = vsub.s32 1, %v4507_v29  ;;  %v121_v33 = vsub.s32 0, %v4507_v29 }
  0x5e   :  { %3776 = vmatpush1.bf16.msra.mxu1 %v3775_v8  ;;  %3803 = vmatpush3.bf16.msra.mxu0 %v4429_v10  ;;  %v110_v19 = vld [vmem:[%s5001_s0 + $0x28] sm:$0xff]  ;;  %v111_v20 = vld [vmem:[%s5001_s0 + $0x30] sm:$0xff]  ;;  %v112_v21 = vld [vmem:[%s5001_s0 + $0x38] sm:$0xff] }
  0x5f   :  { %3777 = vmatprep.subr.bf16.mxu1 %v4262_v1  ;;  %3804 = vmatprep.subr.bf16.mxu0 %v4262_v1  ;;  %v287_v22 = vld [vmem:[#allocation4] sm:$0xff]  ;;  %v288_v23 = vld [vmem:[#allocation4 + $0x8] sm:$0xff]  ;;  %v289_v25 = vld [vmem:[#allocation4 + $0x10] sm:$0xff] }
  0x60   :  { %v4489_v24 = vpack.c.bf16 %v288_v23, %v287_v22  ;;  %v290_v26 = vld [vmem:[#allocation4 + $0x18] sm:$0xff]  ;;  %v117_v31 = vld [vmem:[%s5005_s4] sm:$0x3]  ;;  %s4264_s4 = smov 64  }
  0x61   :  { %3251 = vmatmul.mubr.msk.f32.vlgmr.msra.gmra.mrb[0].mxu1 %vm129_vm1, %v105_v11  ;;  %v4493_v27 = vpack.c.bf16 %v290_v26, %v289_v25  ;;  %v126_v32 = vrot.slane %v117_v31, %v125_v30  ;;  %v122_v37 = vrot.slane %v117_v31, %v121_v33 }
  0x62   :  { %3779 = vmatpush3.bf16.msra.mxu1 %v4429_v10  ;;  %224 = vmatprep.mubr.f32.mxu1 %v4261_v0 }
  0x63   :  { %3780 = vmatprep.subr.bf16.mxu1 %v4262_v1  ;;  %3806 = vmatpush3.bf16.msra.mxu0 %v4444_v14 }
  0x64   :  { %3813 = vmatprep.subr.bf16.mxu0 %v4262_v1 }
  0x65   :  { %3252 = vmatmul.mubr.msk.f32.gmra.mrb[2].mxu1 %vm129_vm1, %v106_v15 }
  0x66   :  { %230 = vmatprep.mubr.f32.mxu1 %v4261_v0  ;;  %3782 = vmatpush3.bf16.msra.mxu1 %v4444_v14 }
  0x67   :  { %3783 = vmatprep.subr.bf16.mxu1 %v4262_v1 }
  0x69   :  { %3253 = vmatmul.mubr.msk.f32.gmra.mrb[4].mxu1 %vm129_vm1, %v107_v16 }
  0x6a   :  { %236 = vmatprep.mubr.f32.mxu1 %v4261_v0 }
  0x6d   :  { %3254 = vmatmul.mubr.msk.f32.gmra.mrb[6].mxu1 %vm129_vm1, %v108_v17 }
  0x6e   :  { %242 = vmatprep.mubr.f32.mxu1 %v4261_v0 }
  0x71   :  { %3255 = vmatmul.mubr.msk.f32.gmra.mrb[8].mxu1 %vm129_vm1, %v109_v18 }
  0x72   :  { %248 = vmatprep.mubr.f32.mxu1 %v4261_v0 }
  0x75   :  { %3256 = vmatmul.mubr.msk.f32.gmra.mrb[10].mxu1 %vm129_vm1, %v110_v19 }
  0x76   :  { %254 = vmatprep.mubr.f32.mxu1 %v4261_v0 }
  0x79   :  { %3257 = vmatmul.mubr.msk.f32.gmra.mrb[12].mxu1 %vm129_vm1, %v111_v20 }
  0x7a   :  { %260 = vmatprep.mubr.f32.mxu1 %v4261_v0 }
  0x7d   :  { %3258 = vmatmul.mubr.msk.f32.gmra.mrb[14].mxu1 %vm129_vm1, %v112_v21 }
  0x7e   :  { %3484 = vmatprep.mubr.msk.f32.mxu1 %vm4263_vm0, %v4261_v0 }
  0x81   :  { %3485 = vmatmul.mubr.f32.vlgmr.msra.gmra.mrb[16].mxu1 %v4261_v0 }
  0x82   :  { %3785 = vmatpush3.bf16.msra.mxu1 %v4489_v24  ;;  %3495 = vmatprep.mubr.msk.f32.mxu1 %vm4263_vm0, %v4261_v0 }
  0x83   :  { %3786 = vmatprep.subr.bf16.mxu1 %v4262_v1 }
  0x86   :  { %3788 = vmatpush3.bf16.msra.mxu1 %v4493_v27 }
  0x87   :  { %3789 = vmatprep.subr.bf16.mxu1 %v4262_v1 }
  0x89   :  { %3496 = vmatmul.mubr.f32.vlgmr.msra.gmra.mrb[18].mxu1 %v4261_v0 }
  0x8a   :  { %3791 = vmatpush3.bf16.msra.mxu1 %v4429_v10  ;;  %3506 = vmatprep.mubr.msk.f32.mxu1 %vm4263_vm0, %v4261_v0 }
  0x8b   :  { %3792 = vmatprep.subr.bf16.mxu1 %v4262_v1 }
  0x8e   :  { %3794 = vmatpush3.bf16.msra.mxu1 %v4444_v14 }
  0x8f   :  { %3795 = vmatprep.subr.bf16.mxu1 %v4262_v1 }
 0x134   :  { %v220_v34 = vpop.f32.mrb[0].mxu1 }
 0x135   :  { %v222_v35 = vpop.f32.mrb[1].mxu1  ;;  %v221_v3 = vadd.f32 %v220_v34, %v122_v37 }
 0x136   :  { %v4516_v36 = vadd.f32 %v222_v35, %v126_v32 }
 0x138   :  { %v226_v38 = vpop.f32.mrb[2].mxu1 }
 0x139   :  { %v4520_v39 = vadd.f32 %v226_v38, %v122_v37  ;;  %v228_v40 = vpop.f32.mrb[3].mxu1 }
 0x13a   :  { %v4522_v41 = vadd.f32 %v228_v40, %v126_v32 }
 0x13c   :  { %v232_v42 = vpop.f32.mrb[4].mxu1 }
 0x13d   :  { %v4524_v43 = vadd.f32 %v232_v42, %v122_v37  ;;  %v234_v44 = vpop.f32.mrb[5].mxu1 }
 0x13e   :  { %v4526_v45 = vadd.f32 %v234_v44, %v126_v32 }
 0x140   :  { %v238_v46 = vpop.f32.mrb[6].mxu1 }
 0x141   :  { %v4528_v47 = vadd.f32 %v238_v46, %v122_v37  ;;  %v240_v48 = vpop.f32.mrb[7].mxu1 }
 0x142   :  { %v4530_v49 = vadd.f32 %v240_v48, %v126_v32 }
 0x144   :  { %v244_v50 = vpop.f32.mrb[8].mxu1 }
 0x145   :  { %v4532_v51 = vadd.f32 %v244_v50, %v122_v37  ;;  %v246_v52 = vpop.f32.mrb[9].mxu1 }
 0x146   :  { %v4534_v53 = vadd.f32 %v246_v52, %v126_v32 }
 0x148   :  { %v250_v54 = vpop.f32.mrb[10].mxu1 }
 0x149   :  { %v4536_v55 = vadd.f32 %v250_v54, %v122_v37  ;;  %v252_v56 = vpop.f32.mrb[11].mxu1 }
 0x14a   :  { %v4538_v57 = vadd.f32 %v252_v56, %v126_v32 }
 0x14c   :  { %v256_v58 = vpop.f32.mrb[12].mxu1 }
 0x14d   :  { %v4540_v59 = vadd.f32 %v256_v58, %v122_v37  ;;  %v258_v60 = vpop.f32.mrb[13].mxu1 }
 0x14e   :  { %v4542_v61 = vadd.f32 %v258_v60, %v126_v32 }
 0x150   :  { %v262_v62 = vpop.f32.mrb[14].mxu1 }
 0x151   :  { %v4544_v63 = vadd.f32 %v262_v62, %v122_v37  ;;  %v264_v2 = vpop.f32.mrb[15].mxu1 }
 0x152   :  { %v265_v8 = vadd.f32 %v264_v2, %v126_v32 }
 0x154   :  { %v363_v4 = vpop.f32.mrb[16].mxu1 }
 0x155   :  { %v367_v5 = vadd.f32 %v363_v4, %v221_v3  ;;  %v3486_v6 = vpop.f32.mrb[17].mxu1 }
 0x157   :  { %v3259_v7 = vmul.f32 -1.442695, %v367_v5 }
 0x159   :  { %3988 = vpow2.f32 %v3259_v7 }
 0x15c   :  { %v434_v9 = vpop.f32.mrb[18].mxu1 }
 0x15d   :  { %v438_v11 = vadd.f32 %v434_v9, %v265_v8  ;;  %v3497_v12 = vpop.f32.mrb[19].mxu1 }
 0x15f   :  { %v3260_v13 = vmul.f32 -1.442695, %v438_v11 }
 0x161   :  { %3990 = vpow2.f32 %v3260_v13 }
 0x163   :  { %v3989_v15 = vpop.eup %3988 }
 0x164   :  { %v442_v16 = vadd.f32 1.0, %v3989_v15 }
 0x166   :  { %3992 = vrcp.f32 %v442_v16 }
 0x16b   :  { %v3991_v17 = vpop.eup %3990 }
 0x16c   :  { %v448_v18 = vadd.f32 1.0, %v3991_v17 }
 0x16e   :  { %3994 = vrcp.f32 %v448_v18 }
 0x170   :  { %v3993_v19 = vpop.eup %3992 }
 0x171   :  { %v451_v20 = vmul.f32 2.0, %v3993_v19  ;;  %v455_v34 = vmul.f32 0.0, %v3993_v19 }
 0x173   :  { %v3261_v21 = vadd.f32 -1.0, %v451_v20 }
 0x175   :  { %457 = vrot.lane.b32.xlu0 %v3261_v21, %s4264_s4 }
 0x178   :  { %v3995_v22 = vpop.eup %3994 }
 0x179   :  { %v453_v23 = vmul.f32 2.0, %v3995_v22  ;;  %v472_v38 = vmul.f32 0.0, %v3995_v22 }
 0x17b   :  { %v3262_v25 = vadd.f32 -1.0, %v453_v23 }
 0x17d   :  { %474 = vrot.lane.b32.xlu0 %v3262_v25, %s4264_s4 }
 0x1e7   :  { %v458_v26 = vpop.permute.xlu0 %457 }
 0x1e8   :  { %v460_v28 = vmul.f32 %v3993_v19, %v458_v26 }
 0x1ea   :  { %462 = vrot.lane.b32.xlu1 %v460_v28, %s4265_s3 }
 0x1ef   :  { %v475_v31 = vpop.permute.xlu0 %474 }
 0x1f0   :  { %v477_v32 = vmul.f32 %v3995_v22, %v475_v31 }
 0x1f2   :  { %479 = vrot.lane.b32.xlu1 %v477_v32, %s4265_s3 }
 0x25c   :  { %v463_v35 = vpop.permute.xlu1 %462 }
 0x25d   :  { %v465_v37 = vadd.f32 %v463_v35, %v455_v34 }
 0x25f   :  { %3996 = vtanh.f32 %v465_v37 }
 0x264   :  { %v480_v40 = vpop.permute.xlu1 %479 }
 0x265   :  { %v482_v42 = vadd.f32 %v480_v40, %v472_v38 }
 0x267   :  { %3998 = vtanh.f32 %v482_v42 }
 0x269   :  { %v3997_v44 = vpop.eup %3996 }
 0x26a   :  { %468 = vrot.lane.b32.xlu0 %v3997_v44, %s4264_s4 }
 0x271   :  { %v3999_v46 = vpop.eup %3998 }
 0x272   :  { %485 = vrot.lane.b32.xlu1 %v3999_v46, %s4264_s4 }
 0x2dc   :  { %v469_v48 = vpop.permute.xlu0 %468 }
 0x2dd   :  { %v471_v50 = vmul.f32 %v3993_v19, %v469_v48 }
 0x2df   :  { %490 = vrot.lane.b32.xlu0 %v471_v50, %s4265_s3 }
 0x2e4   :  { %v486_v52 = vpop.permute.xlu1 %485 }
 0x2e5   :  { %v4553_v54 = vmul.f32 %v3995_v22, %v486_v52 }
 0x2e7   :  { %575 = vrot.lane.b32.xlu1 %v4553_v54, %s4265_s3 }
 0x351   :  { %v491_v56 = vpop.permute.xlu0 %490 }
 0x352   :  { %493 = vst.msk [vmem:[#allocation3] sm:$0xff] %vm293_vm2, %v491_v56  ;;  %3507 = vmatmul.mubr.msk.f32.vlgmr.msra.gmra.mrb[20].mxu1 %vm293_vm2, %v491_v56 }
 0x353   :  { %3797 = vmatpush3.bf16.msra.mxu1 %v4489_v24  ;;  %3517 = vmatprep.mubr.msk.f32.mxu1 %vm4263_vm0, %v4261_v0 }
 0x354   :  { %3798 = vmatprep.subr.bf16.mxu1 %v4262_v1 }
 0x357   :  { %3800 = vmatpush3.bf16.msra.mxu1 %v4493_v27 }
 0x358   :  { %3807 = vmatprep.subr.bf16.mxu1 %v4262_v1 }
 0x359   :  { %v576_v58 = vpop.permute.xlu1 %575 }
 0x35a   :  { %3518 = vmatmul.mubr.msk.f32.vlgmr.msra.gmra.mrb[22].mxu1 %vm293_vm2, %v576_v58 }
 0x35b   :  { %3809 = vmatpush3.bf16.msra.mxu1 %v4489_v24  ;;  %3539 = vmatprep.mubr.msk.f32.mxu1 %vm4263_vm0, %v4261_v0 }
 0x35c   :  { %3810 = vmatprep.subr.bf16.mxu1 %v4262_v1 }
 0x35f   :  { %3812 = vmatpush3.bf16.msra.mxu1 %v4493_v27 }
 0x360   :  { %3819 = vmatprep.subr.bf16.mxu1 %v4262_v1 }
 0x425   :  { %v570_v60 = vpop.f32.mrb[20].mxu1 }
 0x426   :  { %v574_v62 = vadd.f32 %v570_v60, %v4520_v39  ;;  %v3508_v2 = vpop.f32.mrb[21].mxu1 }
 0x428   :  { %v3265_v3 = vmul.f32 -1.442695, %v574_v62 }
 0x42a   :  { %4000 = vpow2.f32 %v3265_v3 }
 0x42d   :  { %v645_v4 = vpop.f32.mrb[22].mxu1 }
 0x42e   :  { %v649_v5 = vadd.f32 %v645_v4, %v4542_v61  ;;  %v3519_v6 = vpop.f32.mrb[23].mxu1 }
 0x430   :  { %v3266_v7 = vmul.f32 -1.442695, %v649_v5 }
 0x432   :  { %4002 = vpow2.f32 %v3266_v7 }
 0x434   :  { %v4001_v8 = vpop.eup %4000 }
 0x435   :  { %v653_v9 = vadd.f32 1.0, %v4001_v8 }
 0x437   :  { %4004 = vrcp.f32 %v653_v9 }
 0x43c   :  { %v4003_v11 = vpop.eup %4002 }
 0x43d   :  { %v659_v12 = vadd.f32 1.0, %v4003_v11 }
 0x43f   :  { %4006 = vrcp.f32 %v659_v12 }
 0x441   :  { %v4005_v13 = vpop.eup %4004 }
 0x442   :  { %v662_v15 = vmul.f32 2.0, %v4005_v13  ;;  %v666_v22 = vmul.f32 %v4005_v13, %v465_v37 }
 0x444   :  { %v3267_v16 = vadd.f32 -1.0, %v662_v15 }
 0x446   :  { %668 = vrot.lane.b32.xlu1 %v3267_v16, %s4264_s4 }
 0x449   :  { %v4007_v39 = vpop.eup %4006 }
 0x44a   :  { %v664_v17 = vmul.f32 2.0, %v4007_v39  ;;  %v683_v26 = vmul.f32 %v4007_v39, %v482_v42 }
 0x44c   :  { %v3268_v18 = vadd.f32 -1.0, %v664_v17 }
 0x44e   :  { %685 = vrot.lane.b32.xlu0 %v3268_v18, %s4264_s4 }
 0x4b8   :  { %v669_v61 = vpop.permute.xlu1 %668 }
 0x4b9   :  { %v671_v19 = vmul.f32 %v4005_v13, %v669_v61 }
 0x4bb   :  { %673 = vrot.lane.b32.xlu1 %v671_v19, %s4265_s3 }
 0x4c0   :  { %v686_v20 = vpop.permute.xlu0 %685 }
 0x4c1   :  { %v688_v21 = vmul.f32 %v4007_v39, %v686_v20 }
 0x4c3   :  { %690 = vrot.lane.b32.xlu0 %v688_v21, %s4265_s3 }
 0x52d   :  { %v674_v23 = vpop.permute.xlu1 %673 }
 0x52e   :  { %v676_v25 = vadd.f32 %v674_v23, %v666_v22 }
 0x530   :  { %4008 = vtanh.f32 %v676_v25 }
 0x535   :  { %v691_v28 = vpop.permute.xlu0 %690 }
 0x536   :  { %v693_v31 = vadd.f32 %v691_v28, %v683_v26 }
 0x538   :  { %4010 = vtanh.f32 %v693_v31 }
 0x53a   :  { %v4009_v32 = vpop.eup %4008 }
 0x53b   :  { %679 = vrot.lane.b32.xlu1 %v4009_v32, %s4264_s4 }
 0x542   :  { %v4011_v34 = vpop.eup %4010 }
 0x543   :  { %696 = vrot.lane.b32.xlu0 %v4011_v34, %s4264_s4 }
 0x5ad   :  { %v680_v35 = vpop.permute.xlu1 %679 }
 0x5ae   :  { %v682_v38 = vmul.f32 %v4005_v13, %v680_v35 }
 0x5b0   :  { %701 = vrot.lane.b32.xlu1 %v682_v38, %s4265_s3 }
 0x5b5   :  { %v697_v40 = vpop.permute.xlu0 %696 }
 0x5b6   :  { %v4581_v44 = vmul.f32 %v4007_v39, %v697_v40 }
 0x5b8   :  { %785 = vrot.lane.b32.xlu0 %v4581_v44, %s4265_s3 }
 0x622   :  { %v702_v37 = vpop.permute.xlu1 %701 }
 0x623   :  { %704 = vst.msk [vmem:[#allocation3 + $0x8] sm:$0xff] %vm293_vm2, %v702_v37  ;;  %3529 = vmatmul.mubr.msk.f32.vlgmr.msra.gmra.mrb[0].mxu0 %vm293_vm2, %v702_v37 }
 0x624   :  { %3815 = vmatpush3.bf16.msra.mxu0 %v4429_v10  ;;  %3550 = vmatprep.mubr.msk.f32.mxu0 %vm4263_vm0, %v4261_v0 }
 0x625   :  { %3816 = vmatprep.subr.bf16.mxu0 %v4262_v1 }
 0x628   :  { %3818 = vmatpush3.bf16.msra.mxu0 %v4444_v14 }
 0x629   :  { %3825 = vmatprep.subr.bf16.mxu0 %v4262_v1 }
 0x62a   :  { %v786_v42 = vpop.permute.xlu0 %785 }
 0x62b   :  { %3540 = vmatmul.mubr.msk.f32.vlgmr.msra.gmra.mrb[24].mxu1 %vm293_vm2, %v786_v42 }
 0x62c   :  { %3821 = vmatpush3.bf16.msra.mxu1 %v4489_v24  ;;  %3561 = vmatprep.mubr.msk.f32.mxu1 %vm4263_vm0, %v4261_v0 }
 0x62d   :  { %3822 = vmatprep.subr.bf16.mxu1 %v4262_v1 }
 0x630   :  { %3824 = vmatpush3.bf16.msra.mxu1 %v4493_v27 }
 0x631   :  { %3831 = vmatprep.subr.bf16.mxu1 %v4262_v1 }
 0x6f6   :  { %v780_v46 = vpop.f32.mrb[0].mxu0 }
 0x6f7   :  { %v784_v48 = vadd.f32 %v780_v46, %v4524_v43  ;;  %v3530_v50 = vpop.f32.mrb[1].mxu0 }
 0x6f9   :  { %v3271_v52 = vmul.f32 -1.442695, %v784_v48 }
 0x6fb   :  { %4012 = vpow2.f32 %v3271_v52 }
 0x6fe   :  { %v855_v56 = vpop.f32.mrb[24].mxu1 }
 0x6ff   :  { %v859_v58 = vadd.f32 %v855_v56, %v4538_v57  ;;  %v3541_v60 = vpop.f32.mrb[25].mxu1 }
 0x701   :  { %v3272_v62 = vmul.f32 -1.442695, %v859_v58 }
 0x703   :  { %4014 = vpow2.f32 %v3272_v62 }
 0x705   :  { %v4013_v2 = vpop.eup %4012 }
 0x706   :  { %v863_v3 = vadd.f32 1.0, %v4013_v2 }
 0x708   :  { %4016 = vrcp.f32 %v863_v3 }
 0x70d   :  { %v4015_v4 = vpop.eup %4014 }
 0x70e   :  { %v869_v5 = vadd.f32 1.0, %v4015_v4 }
 0x710   :  { %4018 = vrcp.f32 %v869_v5 }
 0x712   :  { %v4017_v6 = vpop.eup %4016 }
 0x713   :  { %v872_v7 = vmul.f32 2.0, %v4017_v6  ;;  %v876_v16 = vmul.f32 %v4017_v6, %v676_v25 }
 0x715   :  { %v3273_v8 = vadd.f32 -1.0, %v872_v7 }
 0x717   :  { %878 = vrot.lane.b32.xlu1 %v3273_v8, %s4264_s4 }
 0x71a   :  { %v4019_v43 = vpop.eup %4018 }
 0x71b   :  { %v874_v9 = vmul.f32 2.0, %v4019_v43  ;;  %v893_v18 = vmul.f32 %v4019_v43, %v693_v31 }
 0x71d   :  { %v3274_v11 = vadd.f32 -1.0, %v874_v9 }
 0x71f   :  { %895 = vrot.lane.b32.xlu0 %v3274_v11, %s4264_s4 }
 0x789   :  { %v879_v57 = vpop.permute.xlu1 %878 }
 0x78a   :  { %v881_v12 = vmul.f32 %v4017_v6, %v879_v57 }
 0x78c   :  { %883 = vrot.lane.b32.xlu1 %v881_v12, %s4265_s3 }
 0x791   :  { %v896_v13 = vpop.permute.xlu0 %895 }
 0x792   :  { %v898_v15 = vmul.f32 %v4019_v43, %v896_v13 }
 0x794   :  { %900 = vrot.lane.b32.xlu0 %v898_v15, %s4265_s3 }
 0x7fe   :  { %v884_v39 = vpop.permute.xlu1 %883 }
 0x7ff   :  { %v886_v17 = vadd.f32 %v884_v39, %v876_v16 }
 0x801   :  { %4020 = vtanh.f32 %v886_v17 }
 0x806   :  { %v901_v61 = vpop.permute.xlu0 %900 }
 0x807   :  { %v903_v19 = vadd.f32 %v901_v61, %v893_v18 }
 0x809   :  { %4022 = vtanh.f32 %v903_v19 }
 0x80b   :  { %v4021_v20 = vpop.eup %4020 }
 0x80c   :  { %889 = vrot.lane.b32.xlu1 %v4021_v20, %s4264_s4 }
 0x813   :  { %v4023_v21 = vpop.eup %4022 }
 0x814   :  { %906 = vrot.lane.b32.xlu0 %v4023_v21, %s4264_s4 }
 0x87e   :  { %v890_v22 = vpop.permute.xlu1 %889 }
 0x87f   :  { %v892_v23 = vmul.f32 %v4017_v6, %v890_v22 }
 0x881   :  { %911 = vrot.lane.b32.xlu1 %v892_v23, %s4265_s3 }
 0x886   :  { %v907_v26 = vpop.permute.xlu0 %906 }
 0x887   :  { %v4609_v28 = vmul.f32 %v4019_v43, %v907_v26 }
 0x889   :  { %995 = vrot.lane.b32.xlu0 %v4609_v28, %s4265_s3 }
 0x8f3   :  { %v912_v25 = vpop.permute.xlu1 %911 }
 0x8f4   :  { %914 = vst.msk [vmem:[#allocation3 + $0x10] sm:$0xff] %vm293_vm2, %v912_v25  ;;  %3551 = vmatmul.mubr.msk.f32.vlgmr.msra.gmra.mrb[2].mxu0 %vm293_vm2, %v912_v25 }
 0x8f5   :  { %3827 = vmatpush3.bf16.msra.mxu0 %v4429_v10  ;;  %3572 = vmatprep.mubr.msk.f32.mxu0 %vm4263_vm0, %v4261_v0 }
 0x8f6   :  { %3828 = vmatprep.subr.bf16.mxu0 %v4262_v1 }
 0x8f9   :  { %3830 = vmatpush3.bf16.msra.mxu0 %v4444_v14 }
 0x8fa   :  { %3837 = vmatprep.subr.bf16.mxu0 %v4262_v1 }
 0x8fb   :  { %v996_v31 = vpop.permute.xlu0 %995 }
 0x8fc   :  { %3562 = vmatmul.mubr.msk.f32.vlgmr.msra.gmra.mrb[26].mxu1 %vm293_vm2, %v996_v31 }
 0x8fd   :  { %3833 = vmatpush3.bf16.msra.mxu1 %v4489_v24  ;;  %3583 = vmatprep.mubr.msk.f32.mxu1 %vm4263_vm0, %v4261_v0 }
 0x8fe   :  { %3834 = vmatprep.subr.bf16.mxu1 %v4262_v1 }
 0x901   :  { %3836 = vmatpush3.bf16.msra.mxu1 %v4493_v27 }
 0x902   :  { %3843 = vmatprep.subr.bf16.mxu1 %v4262_v1 }
 0x9c7   :  { %v990_v32 = vpop.f32.mrb[2].mxu0 }
 0x9c8   :  { %v994_v34 = vadd.f32 %v990_v32, %v4528_v47  ;;  %v3552_v35 = vpop.f32.mrb[3].mxu0 }
 0x9ca   :  { %v3277_v38 = vmul.f32 -1.442695, %v994_v34 }
 0x9cc   :  { %4024 = vpow2.f32 %v3277_v38 }
 0x9cf   :  { %v1065_v40 = vpop.f32.mrb[26].mxu1 }
 0x9d0   :  { %v1069_v37 = vadd.f32 %v1065_v40, %v4534_v53  ;;  %v3563_v42 = vpop.f32.mrb[27].mxu1 }
 0x9d2   :  { %v3278_v46 = vmul.f32 -1.442695, %v1069_v37 }
 0x9d4   :  { %4026 = vpow2.f32 %v3278_v46 }
 0x9d6   :  { %v4025_v48 = vpop.eup %4024 }
 0x9d7   :  { %v1073_v50 = vadd.f32 1.0, %v4025_v48 }
 0x9d9   :  { %4028 = vrcp.f32 %v1073_v50 }
 0x9de   :  { %v4027_v52 = vpop.eup %4026 }
 0x9df   :  { %v1079_v56 = vadd.f32 1.0, %v4027_v52 }
 0x9e1   :  { %4030 = vrcp.f32 %v1079_v56 }
 0x9e3   :  { %v4029_v58 = vpop.eup %4028 }
 0x9e4   :  { %v1082_v60 = vmul.f32 2.0, %v4029_v58  ;;  %v1086_v7 = vmul.f32 %v4029_v58, %v886_v17 }
 0x9e6   :  { %v3279_v62 = vadd.f32 -1.0, %v1082_v60 }
 0x9e8   :  { %1088 = vrot.lane.b32.xlu1 %v3279_v62, %s4264_s4 }
 0x9eb   :  { %v4031_v47 = vpop.eup %4030 }
 0x9ec   :  { %v1084_v2 = vmul.f32 2.0, %v4031_v47  ;;  %v1103_v9 = vmul.f32 %v4031_v47, %v903_v19 }
 0x9ee   :  { %v3280_v3 = vadd.f32 -1.0, %v1084_v2 }
 0x9f0   :  { %1105 = vrot.lane.b32.xlu0 %v3280_v3, %s4264_s4 }
 0xa5a   :  { %v1089_v53 = vpop.permute.xlu1 %1088 }
 0xa5b   :  { %v1091_v4 = vmul.f32 %v4029_v58, %v1089_v53 }
 0xa5d   :  { %1093 = vrot.lane.b32.xlu1 %v1091_v4, %s4265_s3 }
 0xa62   :  { %v1106_v5 = vpop.permute.xlu0 %1105 }
 0xa63   :  { %v1108_v6 = vmul.f32 %v4031_v47, %v1106_v5 }
 0xa65   :  { %1110 = vrot.lane.b32.xlu0 %v1108_v6, %s4265_s3 }
 0xacf   :  { %v1094_v8 = vpop.permute.xlu1 %1093 }
 0xad0   :  { %v1096_v43 = vadd.f32 %v1094_v8, %v1086_v7 }
 0xad2   :  { %4032 = vtanh.f32 %v1096_v43 }
 0xad7   :  { %v1111_v11 = vpop.permute.xlu0 %1110 }
 0xad8   :  { %v1113_v57 = vadd.f32 %v1111_v11, %v1103_v9 }
 0xada   :  { %4034 = vtanh.f32 %v1113_v57 }
 0xadc   :  { %v4033_v12 = vpop.eup %4032 }
 0xadd   :  { %1099 = vrot.lane.b32.xlu1 %v4033_v12, %s4264_s4 }
 0xae4   :  { %v4035_v13 = vpop.eup %4034 }
 0xae5   :  { %1116 = vrot.lane.b32.xlu0 %v4035_v13, %s4264_s4 }
 0xb4f   :  { %v1100_v15 = vpop.permute.xlu1 %1099 }
 0xb50   :  { %v1102_v16 = vmul.f32 %v4029_v58, %v1100_v15 }
 0xb52   :  { %1121 = vrot.lane.b32.xlu1 %v1102_v16, %s4265_s3 }
 0xb57   :  { %v1117_v39 = vpop.permute.xlu0 %1116 }
 0xb58   :  { %v4637_v18 = vmul.f32 %v4031_v47, %v1117_v39 }
 0xb5a   :  { %1205 = vrot.lane.b32.xlu0 %v4637_v18, %s4265_s3 }
 0xbc4   :  { %v1122_v17 = vpop.permute.xlu1 %1121 }
 0xbc5   :  { %1124 = vst.msk [vmem:[#allocation3 + $0x18] sm:$0xff] %vm293_vm2, %v1122_v17  ;;  %3573 = vmatmul.mubr.msk.f32.vlgmr.msra.gmra.mrb[4].mxu0 %vm293_vm2, %v1122_v17 }
 0xbc6   :  { %3839 = vmatpush3.bf16.msra.mxu0 %v4429_v10  ;;  %3594 = vmatprep.mubr.msk.f32.mxu0 %vm4263_vm0, %v4261_v0 }
 0xbc7   :  { %3840 = vmatprep.subr.bf16.mxu0 %v4262_v1 }
 0xbca   :  { %3842 = vmatpush3.bf16.msra.mxu0 %v4444_v14 }
 0xbcb   :  { %3849 = vmatprep.subr.bf16.mxu0 %v4262_v1 }
 0xbcc   :  { %v1206_v61 = vpop.permute.xlu0 %1205 }
 0xbcd   :  { %3584 = vmatmul.mubr.msk.f32.vlgmr.msra.gmra.mrb[28].mxu1 %vm293_vm2, %v1206_v61 }
 0xbce   :  { %3845 = vmatpush3.bf16.msra.mxu1 %v4489_v24  ;;  %3605 = vmatprep.mubr.msk.f32.mxu1 %vm4263_vm0, %v4261_v0 }
 0xbcf   :  { %3846 = vmatprep.subr.bf16.mxu1 %v4262_v1 }
 0xbd2   :  { %3848 = vmatpush3.bf16.msra.mxu1 %v4493_v27 }
 0xbd3   :  { %3855 = vmatprep.subr.bf16.mxu1 %v4262_v1 }
 0xc98   :  { %v1200_v19 = vpop.f32.mrb[4].mxu0 }
 0xc99   :  { %v1204_v20 = vadd.f32 %v1200_v19, %v4532_v51  ;;  %v3574_v21 = vpop.f32.mrb[5].mxu0 }
 0xc9b   :  { %v3283_v22 = vmul.f32 -1.442695, %v1204_v20 }
 0xc9d   :  { %4036 = vpow2.f32 %v3283_v22 }
 0xca0   :  { %v1275_v23 = vpop.f32.mrb[28].mxu1 }
 0xca1   :  { %v1279_v26 = vadd.f32 %v1275_v23, %v4530_v49  ;;  %v3585_v25 = vpop.f32.mrb[29].mxu1 }
 0xca3   :  { %v3284_v31 = vmul.f32 -1.442695, %v1279_v26 }
 0xca5   :  { %4038 = vpow2.f32 %v3284_v31 }
 0xca7   :  { %v4037_v32 = vpop.eup %4036 }
 0xca8   :  { %v1283_v34 = vadd.f32 1.0, %v4037_v32 }
 0xcaa   :  { %4040 = vrcp.f32 %v1283_v34 }
 0xcaf   :  { %v4039_v35 = vpop.eup %4038 }
 0xcb0   :  { %v1289_v38 = vadd.f32 1.0, %v4039_v35 }
 0xcb2   :  { %4042 = vrcp.f32 %v1289_v38 }
 0xcb4   :  { %v4041_v40 = vpop.eup %4040 }
 0xcb5   :  { %v1292_v37 = vmul.f32 2.0, %v4041_v40  ;;  %v1296_v58 = vmul.f32 %v4041_v40, %v1096_v43 }
 0xcb7   :  { %v3285_v42 = vadd.f32 -1.0, %v1292_v37 }
 0xcb9   :  { %1298 = vrot.lane.b32.xlu1 %v3285_v42, %s4264_s4 }
 0xcbc   :  { %v4043_v51 = vpop.eup %4042 }
 0xcbd   :  { %v1294_v46 = vmul.f32 2.0, %v4043_v51  ;;  %v1313_v47 = vmul.f32 %v4043_v51, %v1113_v57 }
 0xcbf   :  { %v3286_v48 = vadd.f32 -1.0, %v1294_v46 }
 0xcc1   :  { %1315 = vrot.lane.b32.xlu0 %v3286_v48, %s4264_s4 }
 0xd2b   :  { %v1299_v49 = vpop.permute.xlu1 %1298 }
 0xd2c   :  { %v1301_v50 = vmul.f32 %v4041_v40, %v1299_v49 }
 0xd2e   :  { %1303 = vrot.lane.b32.xlu1 %v1301_v50, %s4265_s3 }
 0xd33   :  { %v1316_v52 = vpop.permute.xlu0 %1315 }
 0xd34   :  { %v1318_v56 = vmul.f32 %v4043_v51, %v1316_v52 }
 0xd36   :  { %1320 = vrot.lane.b32.xlu0 %v1318_v56, %s4265_s3 }
 0xda0   :  { %v1304_v60 = vpop.permute.xlu1 %1303 }
 0xda1   :  { %v1306_v62 = vadd.f32 %v1304_v60, %v1296_v58 }
 0xda3   :  { %4044 = vtanh.f32 %v1306_v62 }
 0xda8   :  { %v1321_v2 = vpop.permute.xlu0 %1320 }
 0xda9   :  { %v1323_v3 = vadd.f32 %v1321_v2, %v1313_v47 }
 0xdab   :  { %4046 = vtanh.f32 %v1323_v3 }
 0xdad   :  { %v4045_v53 = vpop.eup %4044 }
 0xdae   :  { %1309 = vrot.lane.b32.xlu1 %v4045_v53, %s4264_s4 }
 0xdb5   :  { %v4047_v4 = vpop.eup %4046 }
 0xdb6   :  { %1326 = vrot.lane.b32.xlu0 %v4047_v4, %s4264_s4 }
 0xe20   :  { %v1310_v5 = vpop.permute.xlu1 %1309 }
 0xe21   :  { %v1312_v6 = vmul.f32 %v4041_v40, %v1310_v5 }
 0xe23   :  { %1331 = vrot.lane.b32.xlu1 %v1312_v6, %s4265_s3 }
 0xe28   :  { %v1327_v7 = vpop.permute.xlu0 %1326 }
 0xe29   :  { %v4665_v8 = vmul.f32 %v4043_v51, %v1327_v7 }
 0xe2b   :  { %1415 = vrot.lane.b32.xlu0 %v4665_v8, %s4265_s3 }
 0xe95   :  { %v4669_v43 = vpop.permute.xlu1 %1331 }
 0xe96   :  { %3595 = vmatmul.mubr.msk.f32.vlgmr.msra.gmra.mrb[6].mxu0 %vm293_vm2, %v4669_v43 }
 0xe97   :  { %3851 = vmatpush3.bf16.msra.mxu0 %v4429_v10  ;;  %3616 = vmatprep.mubr.msk.f32.mxu0 %vm4263_vm0, %v4261_v0 }
 0xe98   :  { %3852 = vmatprep.subr.bf16.mxu0 %v4262_v1 }
 0xe9b   :  { %3854 = vmatpush3.bf16.msra.mxu0 %v4444_v14 }
 0xe9c   :  { %3861 = vmatprep.subr.bf16.mxu0 %v4262_v1 }
 0xe9d   :  { %v1416_v9 = vpop.permute.xlu0 %1415 }
 0xe9e   :  { %3606 = vmatmul.mubr.msk.f32.vlgmr.msra.gmra.mrb[30].mxu1 %vm293_vm2, %v1416_v9 }
 0xe9f   :  { %3857 = vmatpush3.bf16.msra.mxu1 %v4489_v24  ;;  %3627 = vmatprep.mubr.msk.f32.mxu1 %vm4263_vm0, %v4261_v0 }
 0xea0   :  { %3858 = vmatprep.subr.bf16.mxu1 %v4262_v1 }
 0xea3   :  { %3860 = vmatpush3.bf16.msra.mxu1 %v4493_v27 }
 0xea4   :  { %3867 = vmatprep.subr.bf16.mxu1 %v4262_v1 }
 0xf69   :  { %v1410_v11 = vpop.f32.mrb[6].mxu0 }
 0xf6a   :  { %v1414_v57 = vadd.f32 %v1410_v11, %v4536_v55  ;;  %v3596_v12 = vpop.f32.mrb[7].mxu0 }
 0xf6c   :  { %v3289_v13 = vmul.f32 -1.442695, %v1414_v57 }
 0xf6e   :  { %4048 = vpow2.f32 %v3289_v13 }
 0xf71   :  { %v1485_v15 = vpop.f32.mrb[30].mxu1 }
 0xf72   :  { %v1489_v16 = vadd.f32 %v1485_v15, %v4526_v45  ;;  %v3607_v39 = vpop.f32.mrb[31].mxu1 }
 0xf74   :  { %v3290_v17 = vmul.f32 -1.442695, %v1489_v16 }
 0xf76   :  { %4050 = vpow2.f32 %v3290_v17 }
 0xf78   :  { %v4049_v61 = vpop.eup %4048 }
 0xf79   :  { %v1493_v19 = vadd.f32 1.0, %v4049_v61 }
 0xf7b   :  { %4052 = vrcp.f32 %v1493_v19 }
 0xf80   :  { %v4051_v20 = vpop.eup %4050 }
 0xf81   :  { %v1499_v21 = vadd.f32 1.0, %v4051_v20 }
 0xf83   :  { %4054 = vrcp.f32 %v1499_v21 }
 0xf85   :  { %v4053_v22 = vpop.eup %4052 }
 0xf86   :  { %v1502_v23 = vmul.f32 2.0, %v4053_v22  ;;  %v1506_v38 = vmul.f32 %v4053_v22, %v1306_v62 }
 0xf88   :  { %v3291_v26 = vadd.f32 -1.0, %v1502_v23 }
 0xf8a   :  { %1508 = vrot.lane.b32.xlu1 %v3291_v26, %s4264_s4 }
 0xf8d   :  { %v4055_v55 = vpop.eup %4054 }
 0xf8e   :  { %v1504_v25 = vmul.f32 2.0, %v4055_v55  ;;  %v1523_v42 = vmul.f32 %v4055_v55, %v1323_v3 }
 0xf90   :  { %v3292_v31 = vadd.f32 -1.0, %v1504_v25 }
 0xf92   :  { %1525 = vrot.lane.b32.xlu0 %v3292_v31, %s4264_s4 }
 0xffc   :  { %v1509_v45 = vpop.permute.xlu1 %1508 }
 0xffd   :  { %v1511_v32 = vmul.f32 %v4053_v22, %v1509_v45 }
 0xfff   :  { %1513 = vrot.lane.b32.xlu1 %v1511_v32, %s4265_s3 }
0x1004   :  { %v1526_v34 = vpop.permute.xlu0 %1525 }
0x1005   :  { %v1528_v35 = vmul.f32 %v4055_v55, %v1526_v34 }
0x1007   :  { %1530 = vrot.lane.b32.xlu0 %v1528_v35, %s4265_s3 }
0x1071   :  { %v1514_v40 = vpop.permute.xlu1 %1513 }
0x1072   :  { %v1516_v37 = vadd.f32 %v1514_v40, %v1506_v38 }
0x1074   :  { %4056 = vtanh.f32 %v1516_v37 }
0x1079   :  { %v1531_v51 = vpop.permute.xlu0 %1530 }
0x107a   :  { %v1533_v46 = vadd.f32 %v1531_v51, %v1523_v42 }
0x107c   :  { %4058 = vtanh.f32 %v1533_v46 }
0x107e   :  { %v4057_v48 = vpop.eup %4056 }
0x107f   :  { %1519 = vrot.lane.b32.xlu1 %v4057_v48, %s4264_s4 }
0x1086   :  { %v4059_v49 = vpop.eup %4058 }
0x1087   :  { %1536 = vrot.lane.b32.xlu0 %v4059_v49, %s4264_s4 }
0x10f1   :  { %v1520_v50 = vpop.permute.xlu1 %1519 }
0x10f2   :  { %v1522_v52 = vmul.f32 %v4053_v22, %v1520_v50 }
0x10f4   :  { %1541 = vrot.lane.b32.xlu1 %v1522_v52, %s4265_s3 }
0x10f9   :  { %v1537_v56 = vpop.permute.xlu0 %1536 }
0x10fa   :  { %v4695_v58 = vmul.f32 %v4055_v55, %v1537_v56 }
0x10fc   :  { %1625 = vrot.lane.b32.xlu0 %v4695_v58, %s4265_s3 }
0x1166   :  { %v4699_v60 = vpop.permute.xlu1 %1541 }
0x1167   :  { %3617 = vmatmul.mubr.msk.f32.vlgmr.msra.gmra.mrb[8].mxu0 %vm293_vm2, %v4699_v60 }
0x1168   :  { %3863 = vmatpush3.bf16.msra.mxu0 %v4429_v10  ;;  %3638 = vmatprep.mubr.msk.f32.mxu0 %vm4263_vm0, %v4261_v0 }
0x1169   :  { %3864 = vmatprep.subr.bf16.mxu0 %v4262_v1 }
0x116c   :  { %3866 = vmatpush3.bf16.msra.mxu0 %v4444_v14 }
0x116e   :  { %v1626_v62 = vpop.permute.xlu0 %1625 }
0x116f   :  { %3628 = vmatmul.mubr.msk.f32.vlgmr.msra.gmra.mrb[32].mxu1 %vm293_vm2, %v1626_v62 }
0x1170   :  { %3869 = vmatpush3.bf16.msra.mxu1 %v4489_v24  ;;  %3649 = vmatprep.mubr.msk.f32.mxu1 %vm4263_vm0, %v4261_v0 }
0x1171   :  { %3870 = vmatprep.subr.bf16.mxu1 %v4262_v1 }
0x1174   :  { %3872 = vmatpush3.bf16.msra.mxu1 %v4493_v27 }
0x1175   :  { %3895 = vmatprep.subr.bf16.mxu1 %v4262_v1 }
0x123a   :  { %v1620_v10 = vpop.f32.mrb[8].mxu0 }
0x123b   :  { %v1624_v47 = vadd.f32 %v1620_v10, %v4540_v59  ;;  %v3618_v2 = vpop.f32.mrb[9].mxu0 }
0x123d   :  { %v3295_v3 = vmul.f32 -1.442695, %v1624_v47 }
0x123f   :  { %4060 = vpow2.f32 %v3295_v3 }
0x1242   :  { %v1695_v14 = vpop.f32.mrb[32].mxu1 }
0x1243   :  { %v1699_v53 = vadd.f32 %v1695_v14, %v4522_v41  ;;  %v3629_v4 = vpop.f32.mrb[33].mxu1 }
0x1245   :  { %v3296_v24 = vmul.f32 -1.442695, %v1699_v53 }
0x1247   :  { %4062 = vpow2.f32 %v3296_v24 }
0x1249   :  { %v4061_v5 = vpop.eup %4060 }
0x124a   :  { %v1703_v6 = vadd.f32 1.0, %v4061_v5 }
0x124c   :  { %4064 = vrcp.f32 %v1703_v6 }
0x1251   :  { %v4063_v7 = vpop.eup %4062 }
0x1252   :  { %v1709_v9 = vadd.f32 1.0, %v4063_v7 }
0x1254   :  { %4066 = vrcp.f32 %v1709_v9 }
0x1256   :  { %v4065_v27 = vpop.eup %4064 }
0x1257   :  { %v1712_v11 = vmul.f32 2.0, %v4065_v27  ;;  %v1716_v17 = vmul.f32 %v4065_v27, %v1516_v37 }
0x1259   :  { %v3297_v57 = vadd.f32 -1.0, %v1712_v11 }
0x125b   :  { %1718 = vrot.lane.b32.xlu1 %v3297_v57, %s4264_s4 }
0x125e   :  { %v4067_v59 = vpop.eup %4066 }
0x125f   :  { %v1714_v12 = vmul.f32 2.0, %v4067_v59  ;;  %v1733_v20 = vmul.f32 %v4067_v59, %v1533_v46 }
0x1261   :  { %v3298_v13 = vadd.f32 -1.0, %v1714_v12  ;;  %v1981_v12 = vld [vmem:[%s5006_s5 + $0x18] sm:$0xff] }
0x1263   :  { %1735 = vrot.lane.b32.xlu0 %v3298_v13, %s4264_s4  ;;  %v1978_v13 = vld [vmem:[%s5006_s5] sm:$0xff] }
0x12cd   :  { %v1719_v41 = vpop.permute.xlu1 %1718 }
0x12ce   :  { %v1721_v15 = vmul.f32 %v4065_v27, %v1719_v41 }
0x12d0   :  { %1723 = vrot.lane.b32.xlu1 %v1721_v15, %s4265_s3  ;;  %v1985_v15 = vld [vmem:[%s5006_s5 + $0x38] sm:$0xff] }
0x12d5   :  { %v1736_v16 = vpop.permute.xlu0 %1735 }
0x12d6   :  { %v1738_v39 = vmul.f32 %v4067_v59, %v1736_v16 }
0x12d8   :  { %1740 = vrot.lane.b32.xlu0 %v1738_v39, %s4265_s3 }
0x1342   :  { %v1724_v61 = vpop.permute.xlu1 %1723 }
0x1343   :  { %v1726_v19 = vadd.f32 %v1724_v61, %v1716_v17  ;;  %v1982_v17 = vld [vmem:[%s5006_s5 + $0x20] sm:$0xff]  ;;  %v1984_v61 = vld [vmem:[%s5006_s5 + $0x30] sm:$0xff] }
0x1345   :  { %4068 = vtanh.f32 %v1726_v19 }
0x134a   :  { %v1741_v21 = vpop.permute.xlu0 %1740 }
0x134b   :  { %v1743_v22 = vadd.f32 %v1741_v21, %v1733_v20  ;;  %v1987_v20 = vld [vmem:[%s5006_s5 + $0x48] sm:$0xff]  ;;  %v1989_v21 = vld [vmem:[%s5006_s5 + $0x58] sm:$0xff] }
0x134d   :  { %4070 = vtanh.f32 %v1743_v22 }
0x134f   :  { %v4069_v23 = vpop.eup %4068 }
0x1350   :  { %1729 = vrot.lane.b32.xlu1 %v4069_v23, %s4264_s4  ;;  %v1986_v23 = vld [vmem:[%s5006_s5 + $0x40] sm:$0xff] }
0x1357   :  { %v4071_v26 = vpop.eup %4070 }
0x1358   :  { %1746 = vrot.lane.b32.xlu0 %v4071_v26, %s4264_s4 }
0x13c2   :  { %v1730_v55 = vpop.permute.xlu1 %1729 }
0x13c3   :  { %v1732_v25 = vmul.f32 %v4065_v27, %v1730_v55  ;;  %v1991_v55 = vld [vmem:[%s5006_s5 + $0x68] sm:$0xff] }
0x13c5   :  { %1751 = vrot.lane.b32.xlu1 %v1732_v25, %s4265_s3  ;;  %v1993_v25 = vld [vmem:[%s5006_s5 + $0x78] sm:$0xff] }
0x13ca   :  { %v1747_v31 = vpop.permute.xlu0 %1746 }
0x13cb   :  { %v1749_v45 = vmul.f32 %v4067_v59, %v1747_v31  ;;  %v1979_v59 = vld [vmem:[%s5006_s5 + $0x8] sm:$0xff] }
0x13cc   :  { %v3873_v41 = vpack.c.bf16 %v1981_v12, %v1979_v59  ;;  %v1994_v59 = vld [vmem:[#allocation9] sm:$0x3] }
0x13cd   :  { %1835 = vrot.lane.b32.xlu0 %v1749_v45, %s4265_s3  ;;  %v2003_v12 = vrot.slane %v1994_v59, %v125_v30 }
0x13ce   :  { %3874 = vmatprep.subr.bf16.mxu0 %v3873_v41 }
0x1437   :  { %v4725_v32 = vpop.permute.xlu1 %1751 }
0x1438   :  { %3639 = vmatmul.mubr.msk.f32.vlgmr.msra.gmra.mrb[10].mxu0 %vm293_vm2, %v4725_v32 }
0x1439   :  { %2095 = vmatprep.mubr.f32.mxu0 %v4261_v0 }
0x143f   :  { %v1836_v34 = vpop.permute.xlu0 %1835 }
0x1440   :  { %3650 = vmatmul.mubr.msk.f32.vlgmr.msra.gmra.mrb[34].mxu1 %vm293_vm2, %v1836_v34  ;;  %v1990_v34 = vld [vmem:[%s5006_s5 + $0x60] sm:$0xff] }
0x1441   :  { %3671 = vmatprep.mubr.msk.f32.mxu1 %vm4263_vm0, %v4261_v0 }
0x150b   :  { %v1830_v35 = vpop.f32.mrb[10].mxu0 }
0x150c   :  { %v1834_v38 = vadd.f32 %v1830_v35, %v4544_v63  ;;  %v3640_v40 = vpop.f32.mrb[11].mxu0  ;;  %v1992_v35 = vld [vmem:[%s5006_s5 + $0x70] sm:$0xff] }
0x150e   :  { %v3301_v37 = vmul.f32 -1.442695, %v1834_v38  ;;  %v3887_v38 = vpack.c.bf16 %v1992_v35, %v1990_v34 }
0x1510   :  { %4072 = vpow2.f32 %v3301_v37 }
0x1513   :  { %v1905_v42 = vpop.f32.mrb[34].mxu1 }
0x1514   :  { %v1909_v51 = vadd.f32 %v1905_v42, %v4516_v36  ;;  %v3651_v46 = vpop.f32.mrb[35].mxu1 }
0x1516   :  { %v3302_v48 = vmul.f32 -1.442695, %v1909_v51 }
0x1518   :  { %4074 = vpow2.f32 %v3302_v48 }
0x151a   :  { %v4073_v49 = vpop.eup %4072 }
0x151b   :  { %v1913_v50 = vadd.f32 1.0, %v4073_v49 }
0x151d   :  { %4076 = vrcp.f32 %v1913_v50  ;;  %v2164_v50 = vld [vmem:[#allocation8] sm:$0xff] }
0x1522   :  { %v4075_v52 = vpop.eup %4074 }
0x1523   :  { %v1919_v56 = vadd.f32 1.0, %v4075_v52  ;;  %v2165_v52 = vld [vmem:[#allocation8 + $0x8] sm:$0xff] }
0x1525   :  { %4078 = vrcp.f32 %v1919_v56  ;;  %v3896_v56 = vpack.c.bf16 %v2165_v52, %v2164_v50 }
0x1527   :  { %v4735_v62 = vpop.eup %4076  ;;  %3897 = vmatpush3.bf16.msra.mxu1 %v3896_v56 }
0x1528   :  { %v1922_v10 = vmul.f32 2.0, %v4735_v62  ;;  %v1926_v24 = vmul.f32 %v4735_v62, %v1726_v19  ;;  %v3879_v19 = vpack.c.bf16 %v1984_v61, %v1982_v17  ;;  %3898 = vmatprep.subr.bf16.mxu1 %v4262_v1 }
0x152a   :  { %v3303_v63 = vadd.f32 -1.0, %v1922_v10 }
0x152c   :  { %1928 = vrot.lane.b32.xlu1 %v3303_v63, %s4264_s4  ;;  %v2160_v63 = vld [vmem:[#allocation6] sm:$0xff] }
0x152f   :  { %v4739_v47 = vpop.eup %4078 }
0x1530   :  { %v1924_v36 = vmul.f32 2.0, %v4739_v47  ;;  %v1943_v7 = vmul.f32 %v4739_v47, %v1743_v22  ;;  %v3881_v22 = vpack.c.bf16 %v1989_v21, %v1987_v20 }
0x1532   :  { %v3304_v2 = vadd.f32 -1.0, %v1924_v36 }
0x1534   :  { %1945 = vrot.lane.b32.xlu0 %v3304_v2, %s4264_s4 }
0x159e   :  { %v1929_v3 = vpop.permute.xlu1 %1928 }
0x159f   :  { %v1931_v14 = vmul.f32 %v4735_v62, %v1929_v3 }
0x15a1   :  { %1933 = vrot.lane.b32.xlu1 %v1931_v14, %s4265_s3 }
0x15a6   :  { %v1946_v53 = vpop.permute.xlu0 %1945 }
0x15a7   :  { %v1948_v4 = vmul.f32 %v4739_v47, %v1946_v53 }
0x15a9   :  { %1950 = vrot.lane.b32.xlu0 %v1948_v4, %s4265_s3 }
0x1613   :  { %v1934_v5 = vpop.permute.xlu1 %1933 }
0x1614   :  { %v1936_v6 = vadd.f32 %v1934_v5, %v1926_v24 }
0x1616   :  { %4080 = vtanh.f32 %v1936_v6 }
0x161b   :  { %v1951_v9 = vpop.permute.xlu0 %1950 }
0x161c   :  { %v1953_v27 = vadd.f32 %v1951_v9, %v1943_v7 }
0x161e   :  { %4082 = vtanh.f32 %v1953_v27 }
0x1620   :  { %v4081_v11 = vpop.eup %4080 }
0x1621   :  { %1939 = vrot.lane.b32.xlu1 %v4081_v11, %s4264_s4 }
0x1625   :  { %1756 = vrot.lane.b32.xlu1 %v1749_v45, %s4264_s4  ;;  %v3885_v45 = vpack.c.bf16 %v1993_v25, %v1991_v55 }
0x1628   :  { %v4083_v57 = vpop.eup %4082 }
0x1629   :  { %1956 = vrot.lane.b32.xlu0 %v4083_v57, %s4264_s4  ;;  %1336 = vrot.lane.b32.xlu1 %v4665_v8, %s4264_s4  ;;  %v1980_v8 = vld [vmem:[%s5006_s5 + $0x10] sm:$0xff] }
0x162a   :  { %v3875_v16 = vpack.c.bf16 %v1980_v8, %v1978_v13 }
0x162c   :  { %3876 = vmatpush1.bf16.msra.mxu0 %v3875_v16 }
0x162d   :  { %916 = vrot.lane.b32.xlu1 %v4609_v28, %s4264_s4  ;;  %v1983_v28 = vld [vmem:[%s5006_s5 + $0x28] sm:$0xff] }
0x162e   :  { %v3877_v39 = vpack.c.bf16 %v1985_v15, %v1983_v28  ;;  %v4879_v28 = vrot.slane %v1994_v59, %v121_v33 }
0x1630   :  { %3878 = vmatprep.subr.bf16.mxu0 %v3877_v39 }
0x1631   :  { %495 = vrot.lane.b32.xlu1 %v4553_v54, %s4264_s4  ;;  %3880 = vmatpush1.bf16.msra.mxu0 %v3879_v19  ;;  %v1988_v54 = vld [vmem:[%s5006_s5 + $0x50] sm:$0xff] }
0x1632   :  { %v3883_v26 = vpack.c.bf16 %v1988_v54, %v1986_v23  ;;  %3882 = vmatprep.subr.bf16.mxu0 %v3881_v22 }
0x1635   :  { %3884 = vmatpush1.bf16.msra.mxu0 %v3883_v26 }
0x1636   :  { %3886 = vmatprep.subr.bf16.mxu0 %v3885_v45 }
0x1639   :  { %3888 = vmatpush1.bf16.msra.mxu0 %v3887_v38 }
0x163a   :  { %3889 = vmatprep.subr.bf16.mxu0 %v4262_v1 }
0x1693   :  { %v1940_v31 = vpop.permute.xlu1 %1939 }
0x1694   :  { %v1942_v49 = vmul.f32 %v4735_v62, %v1940_v31  ;;  %v2163_v62 = vld [vmem:[#allocation6 + $0x18] sm:$0xff] }
0x1697   :  { %v1757_v40 = vpop.permute.xlu1 %1756 }
0x1698   :  { %1759 = vst.msk [vmem:[#allocation3 + $0x8] sm:$0xff] %vm498_vm3, %v1757_v40 }
0x169b   :  { %v1957_v37 = vpop.permute.xlu0 %1956  ;;  %v1337_v42 = vpop.permute.xlu1 %1336 }
0x169c   :  { %v1959_v51 = vmul.f32 %v4739_v47, %v1957_v37  ;;  %1339 = vst.msk [vmem:[#allocation3 + $0x18] sm:$0xff] %vm498_vm3, %v1337_v42  ;;  %v2161_v47 = vld [vmem:[#allocation6 + $0x8] sm:$0xff] }
0x169e   :  { %1966 = vrot.lane.b32.xlu0 %v1959_v51, %s4264_s4 }
0x169f   :  { %v917_v46 = vpop.permute.xlu1 %916  ;;  %v1971_v24 = vld [vmem:[#allocation3 + $0x8] sm:$0xff] }
0x16a0   :  { %919 = vst.msk [vmem:[#allocation3 + $0x28] sm:$0xff] %vm498_vm3, %v917_v46 }
0x16a1   :  { %1544 = vst.msk [vmem:[#allocation3 + $0x28] sm:$0xff] %vm293_vm2, %v4699_v60  ;;  %v2167_v60 = vld [vmem:[#allocation8 + $0x18] sm:$0xff] }
0x16a2   :  { %1546 = vrot.lane.b32.xlu0 %v4695_v58, %s4264_s4  ;;  %v2166_v58 = vld [vmem:[#allocation8 + $0x10] sm:$0xff] }
0x16a3   :  { %v496_v48 = vpop.permute.xlu1 %495  ;;  %v3899_v10 = vpack.c.bf16 %v2167_v60, %v2166_v58  ;;  %v1973_v6 = vld [vmem:[#allocation3 + $0x18] sm:$0xff] }
0x16a4   :  { %499 = vst.msk [vmem:[#allocation3 + $0x38] sm:$0xff] %vm498_vm3, %v496_v48 }
0x16a5   :  { %3900 = vmatpush3.bf16.msra.mxu1 %v3899_v10 }
0x16a6   :  { %1126 = vrot.lane.b32.xlu0 %v4637_v18, %s4264_s4  ;;  %3937 = vmatprep.subr.bf16.mxu1 %v4262_v1  ;;  %v4825_v18 = vpack.c.bf16 %v2161_v47, %v2160_v63 }
0x16a8   :  { %3672 = vmatmul.mubr.f32.vlgmr.msra.gmra.mrb[36].mxu1 %v4261_v0  ;;  %v1975_v7 = vld [vmem:[#allocation3 + $0x28] sm:$0xff] }
0x16a9   :  { %3939 = vmatpush3.bf16.msra.mxu1 %v4825_v18  ;;  %3748 = vmatprep.mubr.msk.f32.mxu1 %vm4263_vm0, %v4261_v0 }
0x16aa   :  { %706 = vrot.lane.b32.xlu0 %v4581_v44, %s4264_s4  ;;  %v2162_v44 = vld [vmem:[#allocation6 + $0x10] sm:$0xff]  ;;  %3940 = vmatprep.subr.bf16.mxu1 %v4262_v1 }
0x16ab   :  { %v4832_v36 = vpack.c.bf16 %v2163_v62, %v2162_v44 }
0x16ad   :  { %3942 = vmatpush3.bf16.msra.mxu1 %v4832_v36 }
0x16ae   :  { %1961 = vrot.lane.b32.xlu0 %v1942_v49, %s4265_s3  ;;  %3943 = vmatprep.subr.bf16.mxu1 %v4262_v1 }
0x1710   :  { %v1967_v2 = vpop.permute.xlu0 %1966 }
0x1711   :  { %1969 = vst.msk [vmem:[#allocation3] sm:$0xff] %vm498_vm3, %v1967_v2 }
0x1714   :  { %v1547_v3 = vpop.permute.xlu0 %1546 }
0x1715   :  { %1549 = vst.msk [vmem:[#allocation3 + $0x10] sm:$0xff] %vm498_vm3, %v1547_v3 }
0x1718   :  { %v1127_v14 = vpop.permute.xlu0 %1126  ;;  %v1970_v53 = vld [vmem:[#allocation3] sm:$0xff] }
0x1719   :  { %1129 = vst.msk [vmem:[#allocation3 + $0x20] sm:$0xff] %vm498_vm3, %v1127_v14  ;;  %3305 = vmatmul.mubr.msk.f32.vlgmr.msra.gmra.mrb[12].mxu0 %vm2006_vm4, %v1970_v53 }
0x171a   :  { %1334 = vst.msk [vmem:[#allocation3 + $0x20] sm:$0xff] %vm293_vm2, %v4669_v43  ;;  %3891 = vmatpush3.bf16.msra.mxu0 %v4825_v18  ;;  %2101 = vmatprep.mubr.f32.mxu0 %v4261_v0 }
0x171b   :  { %3892 = vmatprep.subr.bf16.mxu0 %v4262_v1 }
0x171c   :  { %v707_v4 = vpop.permute.xlu0 %706  ;;  %v1972_v5 = vld [vmem:[#allocation3 + $0x10] sm:$0xff] }
0x171d   :  { %709 = vst.msk [vmem:[#allocation3 + $0x30] sm:$0xff] %vm498_vm3, %v707_v4  ;;  %3306 = vmatmul.mubr.msk.f32.gmra.mrb[14].mxu0 %vm2006_vm4, %v1971_v24 }
0x171e   :  { %1754 = vst.msk [vmem:[#allocation3 + $0x30] sm:$0xff] %vm293_vm2, %v4725_v32  ;;  %2107 = vmatprep.mubr.f32.mxu0 %v4261_v0  ;;  %3894 = vmatpush3.bf16.msra.mxu0 %v4832_v36 }
0x171f   :  { %3901 = vmatprep.subr.bf16.mxu0 %v4262_v1 }
0x1720   :  { %v1962_v43 = vpop.permute.xlu0 %1961 }
0x1721   :  { %1964 = vst.msk [vmem:[#allocation3 + $0x38] sm:$0xff] %vm293_vm2, %v1962_v43  ;;  %3307 = vmatmul.mubr.msk.f32.gmra.mrb[16].mxu0 %vm2006_vm4, %v1972_v5  ;;  %v1974_v32 = vld [vmem:[#allocation3 + $0x20] sm:$0xff] }
0x1722   :  { %2113 = vmatprep.mubr.f32.mxu0 %v4261_v0 }
0x1725   :  { %3308 = vmatmul.mubr.msk.f32.gmra.mrb[18].mxu0 %vm2006_vm4, %v1973_v6  ;;  %v1976_v9 = vld [vmem:[#allocation3 + $0x30] sm:$0xff] }
0x1726   :  { %2119 = vmatprep.mubr.f32.mxu0 %v4261_v0 }
0x1728   :  { %v1977_v27 = vld [vmem:[#allocation3 + $0x38] sm:$0xff] }
0x1729   :  { %3309 = vmatmul.mubr.msk.f32.gmra.mrb[20].mxu0 %vm2006_vm4, %v1974_v32 }
0x172a   :  { %2125 = vmatprep.mubr.f32.mxu0 %v4261_v0 }
0x172d   :  { %3310 = vmatmul.mubr.msk.f32.gmra.mrb[22].mxu0 %vm2006_vm4, %v1975_v7 }
0x172e   :  { %2131 = vmatprep.mubr.f32.mxu0 %v4261_v0 }
0x1731   :  { %3311 = vmatmul.mubr.msk.f32.gmra.mrb[24].mxu0 %vm2006_vm4, %v1976_v9 }
0x1732   :  { %2137 = vmatprep.mubr.f32.mxu0 %v4261_v0 }
0x1735   :  { %3312 = vmatmul.mubr.msk.f32.gmra.mrb[26].mxu0 %vm2006_vm4, %v1977_v27 }
0x1736   :  { %3660 = vmatprep.mubr.msk.f32.mxu0 %vm4263_vm0, %v4261_v0 }
0x1739   :  { %3661 = vmatmul.mubr.f32.vlgmr.msra.gmra.mrb[12].mxu0 %v4261_v0 }
0x173a   :  { %3903 = vmatpush3.bf16.msra.mxu0 %v4825_v18  ;;  %3682 = vmatprep.mubr.msk.f32.mxu0 %vm4263_vm0, %v4261_v0 }
0x173b   :  { %3904 = vmatprep.subr.bf16.mxu0 %v4262_v1 }
0x173e   :  { %3906 = vmatpush3.bf16.msra.mxu0 %v4832_v36 }
0x173f   :  { %3907 = vmatprep.subr.bf16.mxu0 %v4262_v1 }
0x177b   :  { %v2307_v11 = vpop.f32.mrb[36].mxu1 }
0x177c   :  { %v3673_v57 = vpop.f32.mrb[37].mxu1 }
0x1808   :  { %v4875_v13 = vpop.f32.mrb[26].mxu0 }
0x1809   :  { %v2141_v41 = vpop.f32.mrb[27].mxu0 }
0x180a   :  { %v2142_v8 = vadd.f32 %v2141_v41, %v2003_v12 }
0x180c   :  { %v4881_v15 = vadd.f32 %v2307_v11, %v2142_v8  ;;  %v2236_v16 = vpop.f32.mrb[12].mxu0 }
0x180d   :  { %v3955_v39 = vadd.f32 %v2236_v16, %v4879_v28  ;;  %v3662_v17 = vpop.f32.mrb[13].mxu0 }
0x180f   :  { %v3313_v61 = vmul.f32 -1.442695, %v3955_v39 }
0x1811   :  { %4084 = vpow2.f32 %v3313_v61 }
0x181b   :  { %v4085_v19 = vpop.eup %4084 }
0x181c   :  { %v2315_v20 = vadd.f32 1.0, %v4085_v19 }
0x181e   :  { %4086 = vrcp.f32 %v2315_v20 }
0x1828   :  { %v4087_v30 = vpop.eup %4086 }
0x1829   :  { %v2324_v21 = vmul.f32 2.0, %v4087_v30  ;;  %v2328_v33 = vmul.f32 0.0, %v4087_v30 }
0x182b   :  { %v3315_v22 = vadd.f32 -1.0, %v2324_v21 }
0x182d   :  { %2330 = vrot.lane.b32.xlu1 %v3315_v22, %s4264_s4 }
0x189f   :  { %v2331_v23 = vpop.permute.xlu1 %2330 }
0x18a0   :  { %v2333_v29 = vmul.f32 %v4087_v30, %v2331_v23 }
0x18a2   :  { %2335 = vrot.lane.b32.xlu0 %v2333_v29, %s4265_s3 }
0x1914   :  { %v2336_v54 = vpop.permute.xlu0 %2335 }
0x1915   :  { %v2338_v26 = vadd.f32 %v2336_v54, %v2328_v33 }
0x1917   :  { %4088 = vtanh.f32 %v2338_v26 }
0x1921   :  { %v4089_v55 = vpop.eup %4088 }
0x1922   :  { %2341 = vrot.lane.b32.xlu1 %v4089_v55, %s4264_s4 }
0x1994   :  { %v2342_v25 = vpop.permute.xlu1 %2341 }
0x1995   :  { %v2344_v31 = vmul.f32 %v4087_v30, %v2342_v25 }
0x1997   :  { %2364 = vrot.lane.b32.xlu0 %v2344_v31, %s4265_s3 }
0x1a09   :  { %v2365_v45 = vpop.permute.xlu0 %2364 }
0x1a0a   :  { %3683 = vmatmul.mubr.msk.f32.vlgmr.msra.gmra.mrb[14].mxu0 %vm293_vm2, %v2365_v45 }
0x1a0b   :  { %3909 = vmatpush3.bf16.msra.mxu0 %v4825_v18  ;;  %3693 = vmatprep.mubr.msk.f32.mxu0 %vm4263_vm0, %v4261_v0 }
0x1a0c   :  { %3910 = vmatprep.subr.bf16.mxu0 %v4262_v1 }
0x1a0f   :  { %3912 = vmatpush3.bf16.msra.mxu0 %v4832_v36 }
0x1a10   :  { %3913 = vmatprep.subr.bf16.mxu0 %v4262_v1 }
0x1add   :  { %v2434_v34 = vpop.f32.mrb[14].mxu0 }
0x1ade   :  { %v3956_v35 = vadd.f32 %v2434_v34, %v4879_v28  ;;  %v3684_v38 = vpop.f32.mrb[15].mxu0 }
0x1ae0   :  { %v3318_v40 = vmul.f32 -1.442695, %v3956_v35 }
0x1ae2   :  { %4090 = vpow2.f32 %v3318_v40 }
0x1aec   :  { %v4091_v37 = vpop.eup %4090 }
0x1aed   :  { %v2442_v42 = vadd.f32 1.0, %v4091_v37 }
0x1aef   :  { %4092 = vrcp.f32 %v2442_v42 }
0x1af9   :  { %v4093_v51 = vpop.eup %4092 }
0x1afa   :  { %v2445_v46 = vmul.f32 2.0, %v4093_v51  ;;  %v2447_v52 = vmul.f32 %v4093_v51, %v2338_v26 }
0x1afc   :  { %v3319_v48 = vadd.f32 -1.0, %v2445_v46 }
0x1afe   :  { %2449 = vrot.lane.b32.xlu1 %v3319_v48, %s4264_s4 }
0x1b70   :  { %v2450_v49 = vpop.permute.xlu1 %2449 }
0x1b71   :  { %v2452_v50 = vmul.f32 %v4093_v51, %v2450_v49 }
0x1b73   :  { %2454 = vrot.lane.b32.xlu0 %v2452_v50, %s4265_s3 }
0x1be5   :  { %v2455_v56 = vpop.permute.xlu0 %2454 }
0x1be6   :  { %v2457_v58 = vadd.f32 %v2455_v56, %v2447_v52 }
0x1be8   :  { %4094 = vtanh.f32 %v2457_v58 }
0x1bf2   :  { %v4095_v60 = vpop.eup %4094 }
0x1bf3   :  { %2460 = vrot.lane.b32.xlu1 %v4095_v60, %s4264_s4 }
0x1c65   :  { %v2461_v10 = vpop.permute.xlu1 %2460 }
0x1c66   :  { %v2463_v63 = vmul.f32 %v4093_v51, %v2461_v10 }
0x1c68   :  { %2466 = vrot.lane.b32.xlu0 %v2463_v63, %s4265_s3 }
0x1cda   :  { %v2467_v47 = vpop.permute.xlu0 %2466 }
0x1cdb   :  { %3694 = vmatmul.mubr.msk.f32.vlgmr.msra.gmra.mrb[16].mxu0 %vm293_vm2, %v2467_v47 }
0x1cdc   :  { %3915 = vmatpush3.bf16.msra.mxu0 %v4825_v18  ;;  %3704 = vmatprep.mubr.msk.f32.mxu0 %vm4263_vm0, %v4261_v0 }
0x1cdd   :  { %3916 = vmatprep.subr.bf16.mxu0 %v4262_v1 }
0x1ce0   :  { %3918 = vmatpush3.bf16.msra.mxu0 %v4832_v36 }
0x1ce1   :  { %3919 = vmatprep.subr.bf16.mxu0 %v4262_v1 }
0x1dae   :  { %v2536_v44 = vpop.f32.mrb[16].mxu0 }
0x1daf   :  { %v3957_v62 = vadd.f32 %v2536_v44, %v4879_v28  ;;  %v3695_v2 = vpop.f32.mrb[17].mxu0 }
0x1db1   :  { %v3321_v3 = vmul.f32 -1.442695, %v3957_v62 }
0x1db3   :  { %4096 = vpow2.f32 %v3321_v3 }
0x1dbd   :  { %v4097_v14 = vpop.eup %4096 }
0x1dbe   :  { %v2544_v53 = vadd.f32 1.0, %v4097_v14 }
0x1dc0   :  { %4098 = vrcp.f32 %v2544_v53 }
0x1dca   :  { %v4099_v4 = vpop.eup %4098 }
0x1dcb   :  { %v2547_v24 = vmul.f32 2.0, %v4099_v4  ;;  %v2549_v32 = vmul.f32 %v4099_v4, %v2457_v58 }
0x1dcd   :  { %v3322_v43 = vadd.f32 -1.0, %v2547_v24 }
0x1dcf   :  { %2551 = vrot.lane.b32.xlu1 %v3322_v43, %s4264_s4 }
0x1e41   :  { %v2552_v5 = vpop.permute.xlu1 %2551 }
0x1e42   :  { %v2554_v6 = vmul.f32 %v4099_v4, %v2552_v5 }
0x1e44   :  { %2556 = vrot.lane.b32.xlu0 %v2554_v6, %s4265_s3 }
0x1eb6   :  { %v2557_v7 = vpop.permute.xlu0 %2556 }
0x1eb7   :  { %v2559_v9 = vadd.f32 %v2557_v7, %v2549_v32 }
0x1eb9   :  { %4100 = vtanh.f32 %v2559_v9 }
0x1ec3   :  { %v4101_v27 = vpop.eup %4100 }
0x1ec4   :  { %2562 = vrot.lane.b32.xlu1 %v4101_v27, %s4264_s4 }
0x1f36   :  { %v2563_v11 = vpop.permute.xlu1 %2562 }
0x1f37   :  { %v2565_v57 = vmul.f32 %v4099_v4, %v2563_v11 }
0x1f39   :  { %2568 = vrot.lane.b32.xlu0 %v2565_v57, %s4265_s3 }
0x1fab   :  { %v2569_v59 = vpop.permute.xlu0 %2568 }
0x1fac   :  { %3705 = vmatmul.mubr.msk.f32.vlgmr.msra.gmra.mrb[18].mxu0 %vm293_vm2, %v2569_v59 }
0x1fad   :  { %3921 = vmatpush3.bf16.msra.mxu0 %v4825_v18  ;;  %3715 = vmatprep.mubr.msk.f32.mxu0 %vm4263_vm0, %v4261_v0 }
0x1fae   :  { %3922 = vmatprep.subr.bf16.mxu0 %v4262_v1 }
0x1fb1   :  { %3924 = vmatpush3.bf16.msra.mxu0 %v4832_v36 }
0x1fb2   :  { %3925 = vmatprep.subr.bf16.mxu0 %v4262_v1 }
0x207f   :  { %v2638_v12 = vpop.f32.mrb[18].mxu0 }
0x2080   :  { %v3958_v41 = vadd.f32 %v2638_v12, %v4879_v28  ;;  %v3706_v8 = vpop.f32.mrb[19].mxu0 }
0x2082   :  { %v3324_v16 = vmul.f32 -1.442695, %v3958_v41 }
0x2084   :  { %4102 = vpow2.f32 %v3324_v16 }
0x208e   :  { %v4103_v39 = vpop.eup %4102 }
0x208f   :  { %v2646_v17 = vadd.f32 1.0, %v4103_v39 }
0x2091   :  { %4104 = vrcp.f32 %v2646_v17 }
0x209b   :  { %v4105_v61 = vpop.eup %4104 }
0x209c   :  { %v2649_v19 = vmul.f32 2.0, %v4105_v61  ;;  %v2651_v22 = vmul.f32 %v4105_v61, %v2559_v9 }
0x209e   :  { %v3325_v20 = vadd.f32 -1.0, %v2649_v19 }
0x20a0   :  { %2653 = vrot.lane.b32.xlu1 %v3325_v20, %s4264_s4 }
0x2112   :  { %v2654_v30 = vpop.permute.xlu1 %2653 }
0x2113   :  { %v2656_v21 = vmul.f32 %v4105_v61, %v2654_v30 }
0x2115   :  { %2658 = vrot.lane.b32.xlu0 %v2656_v21, %s4265_s3 }
0x2187   :  { %v2659_v23 = vpop.permute.xlu0 %2658 }
0x2188   :  { %v2661_v29 = vadd.f32 %v2659_v23, %v2651_v22 }
0x218a   :  { %4106 = vtanh.f32 %v2661_v29 }
0x2194   :  { %v4107_v33 = vpop.eup %4106 }
0x2195   :  { %2664 = vrot.lane.b32.xlu1 %v4107_v33, %s4264_s4 }
0x2207   :  { %v2665_v54 = vpop.permute.xlu1 %2664 }
0x2208   :  { %v2667_v26 = vmul.f32 %v4105_v61, %v2665_v54  ;;  %v3314_v61 = vmul.f32 -1.442695, %v4881_v15 }
0x220a   :  { %2670 = vrot.lane.b32.xlu0 %v2667_v26, %s4265_s3 }
0x227c   :  { %v2671_v55 = vpop.permute.xlu0 %2670 }
0x227d   :  { %3716 = vmatmul.mubr.msk.f32.vlgmr.msra.gmra.mrb[20].mxu0 %vm293_vm2, %v2671_v55 }
0x227e   :  { %3927 = vmatpush3.bf16.msra.mxu0 %v4825_v18  ;;  %3726 = vmatprep.mubr.msk.f32.mxu0 %vm4263_vm0, %v4261_v0 }
0x227f   :  { %3928 = vmatprep.subr.bf16.mxu0 %v4262_v1 }
0x2282   :  { %3930 = vmatpush3.bf16.msra.mxu0 %v4832_v36 }
0x2283   :  { %3931 = vmatprep.subr.bf16.mxu0 %v4262_v1 }
0x2350   :  { %v2740_v25 = vpop.f32.mrb[20].mxu0 }
0x2351   :  { %v3959_v31 = vadd.f32 %v2740_v25, %v4879_v28  ;;  %v3717_v45 = vpop.f32.mrb[21].mxu0 }
0x2353   :  { %v3327_v34 = vmul.f32 -1.442695, %v3959_v31 }
0x2355   :  { %4108 = vpow2.f32 %v3327_v34 }
0x235f   :  { %v4109_v35 = vpop.eup %4108 }
0x2360   :  { %v2748_v38 = vadd.f32 1.0, %v4109_v35 }
0x2362   :  { %4110 = vrcp.f32 %v2748_v38 }
0x236c   :  { %v4111_v40 = vpop.eup %4110 }
0x236d   :  { %v2751_v37 = vmul.f32 2.0, %v4111_v40  ;;  %v2753_v48 = vmul.f32 %v4111_v40, %v2661_v29 }
0x236f   :  { %v3328_v42 = vadd.f32 -1.0, %v2751_v37  ;;  %v3081_v37 = vld [vmem:[%s5011_s10 + $0x8] sm:$0xff] }
0x2371   :  { %2755 = vrot.lane.b32.xlu1 %v3328_v42, %s4264_s4 }
0x23e3   :  { %v2756_v51 = vpop.permute.xlu1 %2755 }
0x23e4   :  { %v2758_v46 = vmul.f32 %v4111_v40, %v2756_v51  ;;  %v3082_v51 = vld [vmem:[%s5011_s10 + $0x10] sm:$0xff] }
0x23e6   :  { %2760 = vrot.lane.b32.xlu0 %v2758_v46, %s4265_s3  ;;  %v3083_v46 = vld [vmem:[%s5011_s10 + $0x18] sm:$0xff] }
0x2458   :  { %v2761_v49 = vpop.permute.xlu0 %2760 }
0x2459   :  { %v2763_v50 = vadd.f32 %v2761_v49, %v2753_v48  ;;  %v3947_v48 = vpack.c.bf16 %v3083_v46, %v3082_v51 }
0x245b   :  { %4112 = vtanh.f32 %v2763_v50 }
0x2465   :  { %v4113_v52 = vpop.eup %4112 }
0x2466   :  { %2766 = vrot.lane.b32.xlu1 %v4113_v52, %s4264_s4  ;;  %v2140_v52 = vadd.f32 %v4875_v13, %v4879_v28 }
0x24d8   :  { %v2767_v56 = vpop.permute.xlu1 %2766 }
0x24d9   :  { %v2769_v58 = vmul.f32 %v4111_v40, %v2767_v56  ;;  %v3080_v40 = vld [vmem:[%s5011_s10] sm:$0xff] }
0x24da   :  { %v3944_v42 = vpack.c.bf16 %v3081_v37, %v3080_v40 }
0x24db   :  { %2772 = vrot.lane.b32.xlu0 %v2769_v58, %s4265_s3 }
0x254d   :  { %v2773_v60 = vpop.permute.xlu0 %2772 }
0x254e   :  { %3727 = vmatmul.mubr.msk.f32.vlgmr.msra.gmra.mrb[22].mxu0 %vm293_vm2, %v2773_v60 }
0x254f   :  { %3933 = vmatpush3.bf16.msra.mxu0 %v4825_v18  ;;  %3737 = vmatprep.mubr.msk.f32.mxu0 %vm4263_vm0, %v4261_v0 }
0x2550   :  { %3934 = vmatprep.subr.bf16.mxu0 %v4262_v1 }
0x2553   :  { %3936 = vmatpush3.bf16.msra.mxu0 %v4832_v36 }
0x2621   :  { %v2842_v10 = vpop.f32.mrb[22].mxu0 }
0x2622   :  { %v3960_v63 = vadd.f32 %v2842_v10, %v4879_v28  ;;  %v3728_v47 = vpop.f32.mrb[23].mxu0 }
0x2624   :  { %v3330_v44 = vmul.f32 -1.442695, %v3960_v63 }
0x2626   :  { %4114 = vpow2.f32 %v3330_v44 }
0x2630   :  { %v4115_v62 = vpop.eup %4114 }
0x2631   :  { %v2850_v2 = vadd.f32 1.0, %v4115_v62 }
0x2633   :  { %4116 = vrcp.f32 %v2850_v2 }
0x263d   :  { %v4117_v3 = vpop.eup %4116 }
0x263e   :  { %v2853_v14 = vmul.f32 2.0, %v4117_v3  ;;  %v2855_v24 = vmul.f32 %v4117_v3, %v2763_v50 }
0x2640   :  { %v3331_v53 = vadd.f32 -1.0, %v2853_v14 }
0x2642   :  { %2857 = vrot.lane.b32.xlu1 %v3331_v53, %s4264_s4 }
0x26b4   :  { %v2858_v18 = vpop.permute.xlu1 %2857 }
0x26b5   :  { %v2860_v4 = vmul.f32 %v4117_v3, %v2858_v18 }
0x26b7   :  { %2862 = vrot.lane.b32.xlu0 %v2860_v4, %s4265_s3 }
0x2729   :  { %v2863_v36 = vpop.permute.xlu0 %2862 }
0x272a   :  { %v2865_v43 = vadd.f32 %v2863_v36, %v2855_v24  ;;  %v3076_v36 = vld [vmem:[%s5010_s9] sm:$0xff] }
0x272c   :  { %4118 = vtanh.f32 %v2865_v43 }
0x2736   :  { %v4119_v5 = vpop.eup %4118 }
0x2737   :  { %2868 = vrot.lane.b32.xlu1 %v4119_v5, %s4264_s4 }
0x27a9   :  { %v2869_v6 = vpop.permute.xlu1 %2868 }
0x27aa   :  { %v2871_v32 = vmul.f32 %v4117_v3, %v2869_v6  ;;  %v3079_v6 = vld [vmem:[%s5010_s9 + $0x18] sm:$0xff] }
0x27ac   :  { %2874 = vrot.lane.b32.xlu0 %v2871_v32, %s4265_s3 }
0x281e   :  { %v2875_v7 = vpop.permute.xlu0 %2874 }
0x281f   :  { %3738 = vmatmul.mubr.msk.f32.vlgmr.msra.gmra.mrb[24].mxu0 %vm293_vm2, %v2875_v7 }
0x28f2   :  { %v2944_v9 = vpop.f32.mrb[24].mxu0 }
0x28f3   :  { %v3961_v27 = vadd.f32 %v2944_v9, %v4879_v28  ;;  %v3739_v11 = vpop.f32.mrb[25].mxu0 }
0x28f5   :  { %v3333_v57 = vmul.f32 -1.442695, %v3961_v27 }
0x28f7   :  { %4120 = vpow2.f32 %v3333_v57 }
0x2901   :  { %v4121_v59 = vpop.eup %4120 }
0x2902   :  { %v2952_v12 = vadd.f32 1.0, %v4121_v59  ;;  %v3340_v59 = vld [vmem:[#allocation11] ss:$0 sm:$0xff] }
0x2904   :  { %4122 = vrcp.f32 %v2952_v12 }
0x2905   :  { %4124 = vpow2.f32 %v3314_v61 }
0x290e   :  { %v4123_v41 = vpop.eup %4122 }
0x290f   :  { %v2955_v8 = vmul.f32 2.0, %v4123_v41  ;;  %v4125_v19 = vpop.eup %4124  ;;  %v2957_v30 = vmul.f32 %v4123_v41, %v2865_v43  ;;  %v3077_v43 = vld [vmem:[%s5010_s9 + $0x8] sm:$0xff] }
0x2910   :  { %v2321_v20 = vadd.f32 1.0, %v4125_v19  ;;  %v3950_v5 = vpack.c.bf16 %v3077_v43, %v3076_v36 }
0x2911   :  { %v3334_v16 = vadd.f32 -1.0, %v2955_v8 }
0x2912   :  { %4126 = vrcp.f32 %v2321_v20 }
0x2913   :  { %2959 = vrot.lane.b32.xlu1 %v3334_v16, %s4264_s4 }
0x291c   :  { %v4127_v23 = vpop.eup %4126 }
0x291d   :  { %v2326_v29 = vmul.f32 2.0, %v4127_v23  ;;  %v2345_v45 = vmul.f32 0.0, %v4127_v23 }
0x291f   :  { %v3316_v54 = vadd.f32 -1.0, %v2326_v29 }
0x2985   :  { %v2960_v39 = vpop.permute.xlu1 %2959 }
0x2986   :  { %v2962_v17 = vmul.f32 %v4123_v41, %v2960_v39 }
0x2988   :  { %2964 = vrot.lane.b32.xlu0 %v2962_v17, %s4265_s3 }
0x29fa   :  { %v2965_v21 = vpop.permute.xlu0 %2964 }
0x29fb   :  { %v2967_v22 = vadd.f32 %v2965_v21, %v2957_v30 }
0x29fd   :  { %4128 = vtanh.f32 %v2967_v22 }
0x2a07   :  { %v4129_v33 = vpop.eup %4128 }
0x2a08   :  { %2970 = vrot.lane.b32.xlu1 %v4129_v33, %s4264_s4 }
0x2a0c   :  { %2347 = vrot.lane.b32.xlu1 %v3316_v54, %s4264_s4 }
0x2a7a   :  { %v2971_v26 = vpop.permute.xlu1 %2970 }
0x2a7b   :  { %v2973_v55 = vmul.f32 %v4123_v41, %v2971_v26 }
0x2a7d   :  { %2976 = vrot.lane.b32.xlu0 %v2973_v55, %s4265_s3 }
0x2a7e   :  { %v2348_v15 = vpop.permute.xlu1 %2347 }
0x2a7f   :  { %v2350_v25 = vmul.f32 %v4127_v23, %v2348_v15 }
0x2a81   :  { %2352 = vrot.lane.b32.xlu1 %v2350_v25, %s4265_s3 }
0x2aef   :  { %v2977_v31 = vpop.permute.xlu0 %2976 }
0x2af0   :  { %3749 = vmatmul.mubr.msk.f32.vlgmr.msra.gmra.mrb[38].mxu1 %vm293_vm2, %v2977_v31 }
0x2af1   :  { %3759 = vmatprep.mubr.msk.f32.mxu1 %vm4263_vm0, %v4261_v0  ;;  %3945 = vmatpush3.bf16.msra.mxu1 %v3944_v42 }
0x2af2   :  { %3946 = vmatprep.subr.bf16.mxu1 %v4262_v1 }
0x2af3   :  { %v2353_v34 = vpop.permute.xlu1 %2352 }
0x2af4   :  { %v2355_v35 = vadd.f32 %v2353_v34, %v2345_v45 }
0x2af5   :  { %3948 = vmatpush3.bf16.msra.mxu1 %v3947_v48 }
0x2af6   :  { %4130 = vtanh.f32 %v2355_v35  ;;  %3949 = vmatprep.subr.bf16.mxu1 %v4262_v1 }
0x2b00   :  { %v4131_v38 = vpop.eup %4130 }
0x2b01   :  { %2358 = vrot.lane.b32.xlu1 %v4131_v38, %s4264_s4 }
0x2b73   :  { %v2359_v49 = vpop.permute.xlu1 %2358 }
0x2b74   :  { %v2361_v50 = vmul.f32 %v4127_v23, %v2359_v49 }
0x2b76   :  { %3085 = vrot.lane.b32.xlu1 %v2361_v50, %s4265_s3 }
0x2bc3   :  { %v3046_v56 = vpop.f32.mrb[38].mxu1 }
0x2bc4   :  { %v3050_v58 = vadd.f32 %v3046_v56, %v2140_v52  ;;  %v3750_v60 = vpop.f32.mrb[39].mxu1 }
0x2bc6   :  { %v3336_v10 = vmul.f32 -1.442695, %v3050_v58 }
0x2bc8   :  { %4132 = vpow2.f32 %v3336_v10 }
0x2bd2   :  { %v4133_v63 = vpop.eup %4132 }
0x2bd3   :  { %v3054_v47 = vadd.f32 1.0, %v4133_v63 }
0x2bd5   :  { %4134 = vrcp.f32 %v3054_v47 }
0x2bdf   :  { %v4135_v44 = vpop.eup %4134 }
0x2be0   :  { %v3057_v62 = vmul.f32 2.0, %v4135_v44  ;;  %v3059_v18 = vmul.f32 %v4135_v44, %v2967_v22 }
0x2be2   :  { %v3337_v2 = vadd.f32 -1.0, %v3057_v62 }
0x2be4   :  { %3061 = vrot.lane.b32.xlu0 %v3337_v2, %s4264_s4 }
0x2be8   :  { %v3086_v3 = vpop.permute.xlu1 %3085 }
0x2be9   :  { %3760 = vmatmul.mubr.msk.f32.vlgmr.msra.gmra.mrb[40].mxu1 %vm293_vm2, %v3086_v3 }
0x2bea   :  { %3770 = vmatprep.mubr.msk.f32.mxu1 %vm4263_vm0, %v4261_v0  ;;  %v3078_v0 = vld [vmem:[%s5010_s9 + $0x10] sm:$0xff]  ;;  %3951 = vmatpush3.bf16.msra.mxu1 %v3950_v5 }
0x2beb   :  { %v3953_v32 = vpack.c.bf16 %v3079_v6, %v3078_v0  ;;  %3952 = vmatprep.subr.bf16.mxu1 %v4262_v1 }
0x2bee   :  { %3954 = vmatpush3.bf16.msra.mxu1 %v3953_v32 }
0x2c56   :  { %v3062_v13 = vpop.permute.xlu0 %3061 }
0x2c57   :  { %v3064_v28 = vmul.f32 %v4135_v44, %v3062_v13 }
0x2c59   :  { %3066 = vrot.lane.b32.xlu0 %v3064_v28, %s4265_s3 }
0x2cbc   :  { %v3155_v14 = vpop.f32.mrb[40].mxu1 }
0x2cbd   :  { %v3761_v53 = vpop.f32.mrb[41].mxu1 }
0x2ccb   :  { %v3067_v4 = vpop.permute.xlu0 %3066 }
0x2ccc   :  { %v3069_v24 = vadd.f32 %v3067_v4, %v3059_v18 }
0x2cce   :  { %4136 = vtanh.f32 %v3069_v24 }
0x2cd8   :  { %v4137_v7 = vpop.eup %4136 }
0x2cd9   :  { %3072 = vrot.lane.b32.xlu0 %v4137_v7, %s4264_s4 }
0x2d4b   :  { %v3073_v9 = vpop.permute.xlu0 %3072 }
0x2d4c   :  { %v3075_v27 = vmul.f32 %v4135_v44, %v3073_v9 }
0x2d4e   :  { %3160 = vrot.lane.b32.xlu0 %v3075_v27, %s4265_s3 }
0x2dc0   :  { %v3161_v11 = vpop.permute.xlu0 %3160 }
0x2dc1   :  { %3771 = vmatmul.mubr.msk.f32.vlgmr.msra.gmra.mrb[42].mxu1 %vm293_vm2, %v3161_v11 }
0x2e94   :  { %v3230_v57 = vpop.f32.mrb[42].mxu1 }
0x2e95   :  { %v3231_v12 = vadd.f32 %v3230_v57, %v3155_v14  ;;  %v3772_v41 = vpop.f32.mrb[43].mxu1 }
0x2e97   :  { %v3241_v8 = vadd.f32 %v3340_v59, %v3231_v12 }
0x2e99   :  { %3243 = vst.msk [vmem:[%s5013_s12] sm:$0xff] %vm3242_vm5, %v3241_v8 }
0x2e9a   :  { %3248 = vsyncpa [#allocation5], 1 }
0x2e9b   :  { %3249 = vsyncpa [#allocation7], 1 }
0x2e9c   :  { %3250 = vsyncpa [#allocation10], 1 }

</bundles_post_ra>
